<compile_context>
chip_gen: v7x
topology: tpu7x:2x2x1
jax: 0.10.0
libtpu: 0.0.40
codegen_flags: <defaults>
</compile_context>

<pallas_src>
import functools

import numpy as np
import jax
import jax.numpy as jnp
from jax.experimental import pallas as pl
from jax.experimental.pallas import tpu as pltpu

# ---------------- model config (small, consistent with a seq2seq LM) --------
VOCAB = 64
D_MODEL = 32
N_HEADS = 4
HEAD_DIM = D_MODEL // N_HEADS
D_FF = 64
N_ENC_LAYERS = 2
N_DEC_LAYERS = 2
MAX_POS = 64
PAD_ID = 1
EMB_SCALE = float(np.sqrt(D_MODEL))  # Marian: embed_scale = sqrt(d_model)

_VMEM = pl.BlockSpec(memory_space=pltpu.MemorySpace.VMEM)


# ---------------- in-kernel helpers ------------------------------------------
def _layernorm(x, g, b):
    mu = jnp.mean(x, axis=-1, keepdims=True)
    var = jnp.mean(jnp.square(x - mu), axis=-1, keepdims=True)
    return (x - mu) * jax.lax.rsqrt(var + 1e-5) * g + b


def _multi_head_attention(q_ref, kv_ref, mask_ref, out_ref, B, Lq, Lk,
                          q_off, k_off, v_off):
    """All heads / batches unrolled at trace time, fully in-VMEM.

    q_ref : ref with queries at lane offset q_off            (B*Lq, >= q_off+D)
    kv_ref: ref with keys at k_off and values at v_off       (B*Lk, ...)
    mask_ref: additive attention mask ref                    (B*Lq, Lk)
    out_ref : VMEM scratch (B*Lq, D_MODEL); heads written lane-contiguously so
              the merged context needs no transpose before the O projection.
    """
    scale = HEAD_DIM ** -0.5
    for b in range(B):
        m_b = mask_ref[b * Lq:(b + 1) * Lq, :]                       # (Lq, Lk)
        for h in range(N_HEADS):
            c = h * HEAD_DIM
            qh = q_ref[b * Lq:(b + 1) * Lq,
                       q_off + c:q_off + c + HEAD_DIM] * scale       # (Lq, Dh)
            kh = kv_ref[b * Lk:(b + 1) * Lk,
                        k_off + c:k_off + c + HEAD_DIM]              # (Lk, Dh)
            vh = kv_ref[b * Lk:(b + 1) * Lk,
                        v_off + c:v_off + c + HEAD_DIM]              # (Lk, Dh)
            # q @ k^T without an explicit transpose (contract on head dim).
            s = jax.lax.dot_general(qh, kh, (((1,), (1,)), ((), ())),
                                    preferred_element_type=jnp.float32) + m_b
            s = s - jnp.max(s, axis=-1, keepdims=True)
            p = jnp.exp(s)
            p = p / jnp.sum(p, axis=-1, keepdims=True)
            out_ref[b * Lq:(b + 1) * Lq, c:c + HEAD_DIM] = jnp.dot(
                p, vh, preferred_element_type=jnp.float32)


# ---------------- fused per-layer kernels -------------------------------------
def _encoder_layer_kernel(x_ref, mask_ref,
                          wqkv_ref, bqkv_ref, wo_ref, bo_ref,
                          ln1_g_ref, ln1_b_ref,
                          fc1_w_ref, fc1_b_ref, fc2_w_ref, fc2_b_ref,
                          ln2_g_ref, ln2_b_ref,
                          o_ref, qkv_s, attn_s, *, B, L):
    x = x_ref[...]                                                    # (B*L, D)
    # fused QKV projection: one (D, 3D) matmul instead of three tiny ones
    qkv_s[...] = (jnp.dot(x, wqkv_ref[...], preferred_element_type=jnp.float32)
                  + bqkv_ref[...])
    _multi_head_attention(qkv_s, qkv_s, mask_ref, attn_s, B, L, L,
                          q_off=0, k_off=D_MODEL, v_off=2 * D_MODEL)
    attn = (jnp.dot(attn_s[...], wo_ref[...], preferred_element_type=jnp.float32)
            + bo_ref[...])
    h = _layernorm(x + attn, ln1_g_ref[...], ln1_b_ref[...])   # post-LN (Marian)
    f = (jnp.dot(h, fc1_w_ref[...], preferred_element_type=jnp.float32)
         + fc1_b_ref[...])
    f = f * jax.nn.sigmoid(f)                                   # SiLU ("swish")
    f = (jnp.dot(f, fc2_w_ref[...], preferred_element_type=jnp.float32)
         + fc2_b_ref[...])
    o_ref[...] = _layernorm(h + f, ln2_g_ref[...], ln2_b_ref[...])


def _decoder_layer_kernel(d_ref, enc_ref, self_mask_ref, cross_mask_ref,
                          wqkv_ref, bqkv_ref, wo_ref, bo_ref,
                          ln1_g_ref, ln1_b_ref,
                          cwq_ref, cbq_ref, cwkv_ref, cbkv_ref, cwo_ref, cbo_ref,
                          ln2_g_ref, ln2_b_ref,
                          fc1_w_ref, fc1_b_ref, fc2_w_ref, fc2_b_ref,
                          ln3_g_ref, ln3_b_ref,
                          o_ref, qkv_s, attn_s, cq_s, ckv_s, *, B, T, S):
    d = d_ref[...]                                                    # (B*T, D)
    enc = enc_ref[...]                                                # (B*S, D)
    # --- causal self-attention (fused QKV) ---
    qkv_s[...] = (jnp.dot(d, wqkv_ref[...], preferred_element_type=jnp.float32)
                  + bqkv_ref[...])
    _multi_head_attention(qkv_s, qkv_s, self_mask_ref, attn_s, B, T, T,
                          q_off=0, k_off=D_MODEL, v_off=2 * D_MODEL)
    attn = (jnp.dot(attn_s[...], wo_ref[...], preferred_element_type=jnp.float32)
            + bo_ref[...])
    h = _layernorm(d + attn, ln1_g_ref[...], ln1_b_ref[...])
    # --- cross-attention over the encoder output (fused KV) ---
    cq_s[...] = (jnp.dot(h, cwq_ref[...], preferred_element_type=jnp.float32)
                 + cbq_ref[...])
    ckv_s[...] = (jnp.dot(enc, cwkv_ref[...], preferred_element_type=jnp.float32)
                  + cbkv_ref[...])
    _multi_head_attention(cq_s, ckv_s, cross_mask_ref, attn_s, B, T, S,
                          q_off=0, k_off=0, v_off=D_MODEL)
    attn = (jnp.dot(attn_s[...], cwo_ref[...], preferred_element_type=jnp.float32)
            + cbo_ref[...])
    h = _layernorm(h + attn, ln2_g_ref[...], ln2_b_ref[...])
    # --- feed-forward ---
    f = (jnp.dot(h, fc1_w_ref[...], preferred_element_type=jnp.float32)
         + fc1_b_ref[...])
    f = f * jax.nn.sigmoid(f)
    f = (jnp.dot(f, fc2_w_ref[...], preferred_element_type=jnp.float32)
         + fc2_b_ref[...])
    o_ref[...] = _layernorm(h + f, ln3_g_ref[...], ln3_b_ref[...])


def _lmhead_ce_kernel(d_ref, e_ref, bias_ref, labels_ref, logits_ref, loss_ref):
    d = d_ref[...]                                                    # (M, D)
    e = e_ref[...]                                                    # (V, D)
    # tied lm_head: d @ E^T done as a transposed-RHS contraction (no wrapper E.T)
    logits = (jax.lax.dot_general(d, e, (((1,), (1,)), ((), ())),
                                  preferred_element_type=jnp.float32)
              + bias_ref[...])                                        # (M, V)
    logits_ref[...] = logits
    labels = labels_ref[...]                                          # (M, 1)
    m = jnp.max(logits, axis=-1, keepdims=True)
    lse = jnp.log(jnp.sum(jnp.exp(logits - m), axis=-1, keepdims=True)) + m
    iota = jax.lax.broadcasted_iota(jnp.int32, logits.shape, 1)
    onehot = (iota == labels).astype(jnp.float32)
    picked = jnp.sum(logits * onehot, axis=-1, keepdims=True)
    nll = lse - picked                                                # (M, 1)
    # mean over tokens reduced in-kernel (via a tiny matvec on the MXU)
    inv_m = jnp.full((1, nll.shape[0]), 1.0 / nll.shape[0], jnp.float32)
    loss_ref[...] = jnp.dot(inv_m, nll, preferred_element_type=jnp.float32)


# ---------------- pallas_call wrappers (one call per layer) -------------------
def pallas_encoder_layer(x, mask, p, B, L):
    M = x.shape[0]
    return pl.pallas_call(
        functools.partial(_encoder_layer_kernel, B=B, L=L),
        out_shape=jax.ShapeDtypeStruct((M, D_MODEL), jnp.float32),
        in_specs=[_VMEM] * 14,
        out_specs=_VMEM,
        scratch_shapes=[pltpu.VMEM((M, 3 * D_MODEL), jnp.float32),
                        pltpu.VMEM((M, D_MODEL), jnp.float32)],
    )(x, mask, p['wqkv'], p['bqkv'], p['wo'], p['bo'],
      p['ln1_g'], p['ln1_b'], p['fc1_w'], p['fc1_b'],
      p['fc2_w'], p['fc2_b'], p['ln2_g'], p['ln2_b'])


def pallas_decoder_layer(d, enc_out, self_mask, cross_mask, p, B, T, S):
    M = d.shape[0]
    Me = enc_out.shape[0]
    return pl.pallas_call(
        functools.partial(_decoder_layer_kernel, B=B, T=T, S=S),
        out_shape=jax.ShapeDtypeStruct((M, D_MODEL), jnp.float32),
        in_specs=[_VMEM] * 24,
        out_specs=_VMEM,
        scratch_shapes=[pltpu.VMEM((M, 3 * D_MODEL), jnp.float32),
                        pltpu.VMEM((M, D_MODEL), jnp.float32),
                        pltpu.VMEM((M, D_MODEL), jnp.float32),
                        pltpu.VMEM((Me, 2 * D_MODEL), jnp.float32)],
    )(d, enc_out, self_mask, cross_mask,
      p['wqkv'], p['bqkv'], p['wo'], p['bo'], p['ln1_g'], p['ln1_b'],
      p['cwq'], p['cbq'], p['cwkv'], p['cbkv'], p['cwo'], p['cbo'],
      p['ln2_g'], p['ln2_b'],
      p['fc1_w'], p['fc1_b'], p['fc2_w'], p['fc2_b'],
      p['ln3_g'], p['ln3_b'])


def pallas_lmhead_ce(d2d, E, bias, labels2d):
    M = d2d.shape[0]
    return pl.pallas_call(
        _lmhead_ce_kernel,
        out_shape=(jax.ShapeDtypeStruct((M, VOCAB), jnp.float32),
                   jax.ShapeDtypeStruct((1, 1), jnp.float32)),
        in_specs=[_VMEM] * 4,
        out_specs=(_VMEM, _VMEM),
    )(d2d, E, bias, labels2d)


# ---------------- model glue ---------------------------------------------------
def sinusoidal_positions(max_len, d):
    pos = np.arange(max_len)[:, None].astype(np.float64)
    i = np.arange(d)[None, :].astype(np.float64)
    angle = pos / np.power(10000.0, (2.0 * (i // 2)) / d)
    pe = np.where(i % 2 == 0, np.sin(angle), np.cos(angle))
    return jnp.asarray(pe, dtype=jnp.float32)


def additive_padding_mask(attn_k, Lq):
    """(B, Lk) {0,1} attention vector -> (B*Lq, Lk) additive mask."""
    B, Lk = attn_k.shape
    m = (1.0 - attn_k.astype(jnp.float32)) * -1e9
    return jnp.broadcast_to(m[:, None, :], (B, Lq, Lk)).reshape(B * Lq, Lk)


def causal_mask(T):
    tri = jnp.tril(jnp.ones((T, T), jnp.float32))
    return (1.0 - tri) * -1e9


def shift_tokens_right(labels, pad_id):
    # Marian: decoder_start_token_id == pad_token_id
    B, _ = labels.shape
    start = jnp.full((B, 1), pad_id, labels.dtype)
    return jnp.concatenate([start, labels[:, :-1]], axis=1)


def mt_forward(params, input_ids, input_attn, target_ids, target_attn):
    """Mirrors MT.forward(...) -> (out.logits, out.loss)."""
    B, S = input_ids.shape
    T = target_ids.shape[1]
    E = params['embed']
    pos = params['pos']

    # Embedding_ long-id branch == row gather (jnp.take); MT.forward divides by
    # enc_emb_scale and the HF encoder consumes the inputs_embeds as-is.
    inp_emb = jnp.take(E, input_ids, axis=0) / EMB_SCALE
    h = (inp_emb + pos[:S][None]).reshape(B * S, D_MODEL)

    enc_mask = additive_padding_mask(input_attn, S)                  # (B*S, S)
    for p in params['enc_layers']:
        h = pallas_encoder_layer(h, enc_mask, p, B, S)
    enc_out = h

    # Decoder: labels -> shift_tokens_right, embedded internally * embed_scale.
    dec_ids = shift_tokens_right(target_ids, PAD_ID)
    d = (jnp.take(E, dec_ids, axis=0) * EMB_SCALE + pos[:T][None]
         ).reshape(B * T, D_MODEL)
    self_mask = (additive_padding_mask(target_attn, T)
                 + jnp.tile(causal_mask(T), (B, 1)))                 # (B*T, T)
    cross_mask = additive_padding_mask(input_attn, T)                # (B*T, S)
    for p in params['dec_layers']:
        d = pallas_decoder_layer(d, enc_out, self_mask, cross_mask, p, B, T, S)

    # lm_head tied to embedding weight + final_logits_bias, fused with the
    # token-level cross-entropy (out.loss = mean NLL over all tokens).
    logits2d, loss = pallas_lmhead_ce(
        d, E, params['final_logits_bias'],
        target_ids.reshape(B * T, 1).astype(jnp.int32))
    return logits2d.reshape(B, T, VOCAB), loss[0, 0]


# ---------------- deterministic parameter init --------------------------------
def init_params(key):
    keys = iter(jax.random.split(key, 128))

    def dense(shape):
        return 0.02 * jax.random.normal(next(keys), shape, dtype=jnp.float32)

    def enc_layer_params():
        return dict(
            wqkv=dense((D_MODEL, 3 * D_MODEL)),
            bqkv=jnp.zeros((1, 3 * D_MODEL), jnp.float32),
            wo=dense((D_MODEL, D_MODEL)), bo=jnp.zeros((1, D_MODEL), jnp.float32),
            ln1_g=jnp.ones((1, D_MODEL), jnp.float32),
            ln1_b=jnp.zeros((1, D_MODEL), jnp.float32),
            fc1_w=dense((D_MODEL, D_FF)), fc1_b=jnp.zeros((1, D_FF), jnp.float32),
            fc2_w=dense((D_FF, D_MODEL)), fc2_b=jnp.zeros((1, D_MODEL), jnp.float32),
            ln2_g=jnp.ones((1, D_MODEL), jnp.float32),
            ln2_b=jnp.zeros((1, D_MODEL), jnp.float32))

    def dec_layer_params():
        p = enc_layer_params()
        p.update(
            cwq=dense((D_MODEL, D_MODEL)), cbq=jnp.zeros((1, D_MODEL), jnp.float32),
            cwkv=dense((D_MODEL, 2 * D_MODEL)),
            cbkv=jnp.zeros((1, 2 * D_MODEL), jnp.float32),
            cwo=dense((D_MODEL, D_MODEL)), cbo=jnp.zeros((1, D_MODEL), jnp.float32),
            ln3_g=jnp.ones((1, D_MODEL), jnp.float32),
            ln3_b=jnp.zeros((1, D_MODEL), jnp.float32))
        return p

    return dict(
        embed=dense((VOCAB, D_MODEL)),
        pos=sinusoidal_positions(MAX_POS, D_MODEL),
        final_logits_bias=jnp.zeros((1, VOCAB), jnp.float32),
        enc_layers=[enc_layer_params() for _ in range(N_ENC_LAYERS)],
        dec_layers=[dec_layer_params() for _ in range(N_DEC_LAYERS)],
    )


# ---------------- main ---------------------------------------------------------
if __name__ == "__main__":
    key = jax.random.PRNGKey(0)
    k_in, k_tgt, k_par = jax.random.split(key, 3)

    B, S, T = 2, 8, 8
    params = init_params(k_par)

    input_ids = jax.random.randint(k_in, (B, S), 2, VOCAB, dtype=jnp.int32)
    target_ids = jax.random.randint(k_tgt, (B, T), 2, VOCAB, dtype=jnp.int32)
    input_attn = jnp.ones((B, S), jnp.float32).at[1, -2:].set(0.0)
    target_attn = jnp.ones((B, T), jnp.float32)

    logits, loss = jax.jit(mt_forward)(params, input_ids, input_attn,
                                       target_ids, target_attn)
    jax.block_until_ready((logits, loss))

    assert logits.shape == (B, T, VOCAB)
    assert bool(jnp.isfinite(loss))
    print("KERNEL_OK")
</pallas_src>

<mosaic_0001>
module attributes {stable_mosaic.version = 11 : i64} {
  func.func @_lmhead_ce_kernel(%arg0: memref<16x32xf32, #tpu.memory_space<vmem>>, %arg1: memref<64x32xf32, #tpu.memory_space<vmem>>, %arg2: memref<1x64xf32, #tpu.memory_space<vmem>>, %arg3: memref<16x1xi32, #tpu.memory_space<vmem>>, %arg4: memref<16x64xf32, #tpu.memory_space<vmem>>, %arg5: memref<1x1xf32, #tpu.memory_space<vmem>>) attributes {dimension_semantics = [], scalar_prefetch = 0 : i64, scratch_operands = 0 : i64, tpu.core_type = #tpu.core_type<tc>} {
    %c0 = arith.constant 0 : index
    %c0_0 = arith.constant 0 : index
    %0 = vector.load %arg0[%c0, %c0_0] : memref<16x32xf32, #tpu.memory_space<vmem>>, vector<16x32xf32>
    %c0_1 = arith.constant 0 : index
    %c0_2 = arith.constant 0 : index
    %1 = vector.load %arg1[%c0_1, %c0_2] : memref<64x32xf32, #tpu.memory_space<vmem>>, vector<64x32xf32>
    %cst = arith.constant dense<0.000000e+00> : vector<16x64xf32>
    %2 = tpu.matmul %0, %1, %cst {dimension_numbers = #tpu.dot_dimension_numbers<[1], [1], [0], [0], [0, 0, 1, 0], [], []>} : vector<16x32xf32>, vector<64x32xf32>, vector<16x64xf32> -> vector<16x64xf32>
    %c0_3 = arith.constant 0 : index
    %c0_4 = arith.constant 0 : index
    %3 = vector.load %arg2[%c0_3, %c0_4] : memref<1x64xf32, #tpu.memory_space<vmem>>, vector<1x64xf32>
    %4 = vector.broadcast %3 : vector<1x64xf32> to vector<16x64xf32>
    %5 = arith.addf %2, %4 : vector<16x64xf32>
    %c0_5 = arith.constant 0 : index
    %c0_6 = arith.constant 0 : index
    %6 = vector.load %arg4[%c0_5, %c0_6] : memref<16x64xf32, #tpu.memory_space<vmem>>, vector<16x64xf32>
    tpu.vector_store %arg4[%c0_5, %c0_6], %5 {strides = array<i32>} : memref<16x64xf32, #tpu.memory_space<vmem>>, vector<16x64xf32>,
    %c0_7 = arith.constant 0 : index
    %c0_8 = arith.constant 0 : index
    %7 = vector.load %arg3[%c0_7, %c0_8] : memref<16x1xi32, #tpu.memory_space<vmem>>, vector<16x1xi32>
    %cst_9 = arith.constant dense<0xFF800000> : vector<16xf32>
    %8 = vector.multi_reduction <maximumf>, %5, %cst_9 [1] : vector<16x64xf32> to vector<16xf32>
    %9 = vector.shape_cast %8 : vector<16xf32> to vector<16x1xf32>
    %10 = vector.broadcast %9 : vector<16x1xf32> to vector<16x64xf32>
    %11 = arith.subf %5, %10 : vector<16x64xf32>
    %12 = math.exp %11 : vector<16x64xf32>
    %cst_10 = arith.constant dense<0.000000e+00> : vector<16xf32>
    %13 = vector.multi_reduction <add>, %12, %cst_10 [1] : vector<16x64xf32> to vector<16xf32>
    %14 = vector.shape_cast %13 : vector<16xf32> to vector<16x1xf32>
    %15 = math.log %14 : vector<16x1xf32>
    %16 = arith.addf %15, %9 : vector<16x1xf32>
    %17 = tpu.iota {dimensions = array<i32: 1>} : vector<16x64xi32>
    %18 = vector.broadcast %7 : vector<16x1xi32> to vector<16x64xi32>
    %19 = arith.cmpi eq, %17, %18 : vector<16x64xi32>
    %20 = arith.extui %19 : vector<16x64xi1> to vector<16x64xi32>
    %21 = arith.sitofp %20 : vector<16x64xi32> to vector<16x64xf32>
    %22 = arith.mulf %5, %21 : vector<16x64xf32>
    %cst_11 = arith.constant dense<0.000000e+00> : vector<16xf32>
    %23 = vector.multi_reduction <add>, %22, %cst_11 [1] : vector<16x64xf32> to vector<16xf32>
    %24 = vector.shape_cast %23 : vector<16xf32> to vector<16x1xf32>
    %25 = arith.subf %16, %24 : vector<16x1xf32>
    %cst_12 = arith.constant 6.250000e-02 : f32
    %26 = vector.broadcast %cst_12 : f32 to vector<1x16xf32>
    %cst_13 = arith.constant dense<0.000000e+00> : vector<1x1xf32>
    %27 = tpu.matmul %26, %25, %cst_13 {dimension_numbers = #tpu.dot_dimension_numbers<[1], [0], [0], [1], [0, 0, 1, 1], [], []>} : vector<1x16xf32>, vector<16x1xf32>, vector<1x1xf32> -> vector<1x1xf32>
    %c0_14 = arith.constant 0 : index
    %c0_15 = arith.constant 0 : index
    %28 = vector.load %arg5[%c0_14, %c0_15] : memref<1x1xf32, #tpu.memory_space<vmem>>, vector<1x1xf32>
    tpu.vector_store %arg5[%c0_14, %c0_15], %27 {strides = array<i32>} : memref<1x1xf32, #tpu.memory_space<vmem>>, vector<1x1xf32>,
    return
  }
}

module attributes {stable_mosaic.version = 11 : i64} {
  func.func @_encoder_layer_kernel(%arg0: memref<16x32xf32, #tpu.memory_space<vmem>>, %arg1: memref<16x8xf32, #tpu.memory_space<vmem>>, %arg2: memref<32x96xf32, #tpu.memory_space<vmem>>, %arg3: memref<1x96xf32, #tpu.memory_space<vmem>>, %arg4: memref<32x32xf32, #tpu.memory_space<vmem>>, %arg5: memref<1x32xf32, #tpu.memory_space<vmem>>, %arg6: memref<1x32xf32, #tpu.memory_space<vmem>>, %arg7: memref<1x32xf32, #tpu.memory_space<vmem>>, %arg8: memref<32x64xf32, #tpu.memory_space<vmem>>, %arg9: memref<1x64xf32, #tpu.memory_space<vmem>>, %arg10: memref<64x32xf32, #tpu.memory_space<vmem>>, %arg11: memref<1x32xf32, #tpu.memory_space<vmem>>, %arg12: memref<1x32xf32, #tpu.memory_space<vmem>>, %arg13: memref<1x32xf32, #tpu.memory_space<vmem>>, %arg14: memref<16x32xf32, #tpu.memory_space<vmem>>, %arg15: memref<16x96xf32, #tpu.memory_space<vmem>>, %arg16: memref<16x32xf32, #tpu.memory_space<vmem>>) attributes {dimension_semantics = [], scalar_prefetch = 0 : i64, scratch_operands = 2 : i64, tpu.core_type = #tpu.core_type<tc>} {
    %c0 = arith.constant 0 : index
    %c0_0 = arith.constant 0 : index
    %0 = vector.load %arg0[%c0, %c0_0] : memref<16x32xf32, #tpu.memory_space<vmem>>, vector<16x32xf32>
    %c0_1 = arith.constant 0 : index
    %c0_2 = arith.constant 0 : index
    %1 = vector.load %arg2[%c0_1, %c0_2] : memref<32x96xf32, #tpu.memory_space<vmem>>, vector<32x96xf32>
    %cst = arith.constant dense<0.000000e+00> : vector<16x96xf32>
    %2 = tpu.matmul %0, %1, %cst {dimension_numbers = #tpu.dot_dimension_numbers<[1], [0], [0], [1], [0, 0, 1, 1], [], []>} : vector<16x32xf32>, vector<32x96xf32>, vector<16x96xf32> -> vector<16x96xf32>
    %c0_3 = arith.constant 0 : index
    %c0_4 = arith.constant 0 : index
    %3 = vector.load %arg3[%c0_3, %c0_4] : memref<1x96xf32, #tpu.memory_space<vmem>>, vector<1x96xf32>
    %4 = vector.broadcast %3 : vector<1x96xf32> to vector<16x96xf32>
    %5 = arith.addf %2, %4 : vector<16x96xf32>
    %c0_5 = arith.constant 0 : index
    %c0_6 = arith.constant 0 : index
    %6 = vector.load %arg15[%c0_5, %c0_6] : memref<16x96xf32, #tpu.memory_space<vmem>>, vector<16x96xf32>
    tpu.vector_store %arg15[%c0_5, %c0_6], %5 {strides = array<i32>} : memref<16x96xf32, #tpu.memory_space<vmem>>, vector<16x96xf32>,
    %c0_7 = arith.constant 0 : index
    %c0_8 = arith.constant 0 : index
    %7 = vector.load %arg1[%c0_7, %c0_8] : memref<16x8xf32, #tpu.memory_space<vmem>>, vector<8x8xf32>
    %c0_9 = arith.constant 0 : index
    %c0_10 = arith.constant 0 : index
    %8 = vector.load %arg15[%c0_9, %c0_10] : memref<16x96xf32, #tpu.memory_space<vmem>>, vector<8x8xf32>
    %cst_11 = arith.constant 0.353553385 : f32
    %9 = vector.broadcast %cst_11 : f32 to vector<8x8xf32>
    %10 = arith.mulf %8, %9 : vector<8x8xf32>
    %c0_12 = arith.constant 0 : index
    %c32 = arith.constant 32 : index
    %11 = vector.load %arg15[%c0_12, %c32] : memref<16x96xf32, #tpu.memory_space<vmem>>, vector<8x8xf32>
    %c0_13 = arith.constant 0 : index
    %c64 = arith.constant 64 : index
    %12 = vector.load %arg15[%c0_13, %c64] : memref<16x96xf32, #tpu.memory_space<vmem>>, vector<8x8xf32>
    %cst_14 = arith.constant dense<0.000000e+00> : vector<8x8xf32>
    %13 = tpu.matmul %10, %11, %cst_14 {dimension_numbers = #tpu.dot_dimension_numbers<[1], [1], [0], [0], [0, 0, 1, 0], [], []>} : vector<8x8xf32>, vector<8x8xf32>, vector<8x8xf32> -> vector<8x8xf32>
    %14 = arith.addf %13, %7 : vector<8x8xf32>
    %cst_15 = arith.constant dense<0xFF800000> : vector<8xf32>
    %15 = vector.multi_reduction <maximumf>, %14, %cst_15 [1] : vector<8x8xf32> to vector<8xf32>
    %16 = vector.shape_cast %15 : vector<8xf32> to vector<8x1xf32>
    %17 = vector.broadcast %16 : vector<8x1xf32> to vector<8x8xf32>
    %18 = arith.subf %14, %17 : vector<8x8xf32>
    %19 = math.exp %18 : vector<8x8xf32>
    %cst_16 = arith.constant dense<0.000000e+00> : vector<8xf32>
    %20 = vector.multi_reduction <add>, %19, %cst_16 [1] : vector<8x8xf32> to vector<8xf32>
    %21 = vector.shape_cast %20 : vector<8xf32> to vector<8x1xf32>
    %22 = vector.broadcast %21 : vector<8x1xf32> to vector<8x8xf32>
    %23 = arith.divf %19, %22 : vector<8x8xf32>
    %cst_17 = arith.constant dense<0.000000e+00> : vector<8x8xf32>
    %24 = tpu.matmul %23, %12, %cst_17 {dimension_numbers = #tpu.dot_dimension_numbers<[1], [0], [0], [1], [0, 0, 1, 1], [], []>} : vector<8x8xf32>, vector<8x8xf32>, vector<8x8xf32> -> vector<8x8xf32>
    %c0_18 = arith.constant 0 : index
    %c0_19 = arith.constant 0 : index
    %25 = vector.load %arg16[%c0_18, %c0_19] : memref<16x32xf32, #tpu.memory_space<vmem>>, vector<8x8xf32>
    tpu.vector_store %arg16[%c0_18, %c0_19], %24 {strides = array<i32>} : memref<16x32xf32, #tpu.memory_space<vmem>>, vector<8x8xf32>,
    %c0_20 = arith.constant 0 : index
    %c8 = arith.constant 8 : index
    %26 = vector.load %arg15[%c0_20, %c8] : memref<16x96xf32, #tpu.memory_space<vmem>>, vector<8x8xf32>
    %cst_21 = arith.constant 0.353553385 : f32
    %27 = vector.broadcast %cst_21 : f32 to vector<8x8xf32>
    %28 = arith.mulf %26, %27 : vector<8x8xf32>
    %c0_22 = arith.constant 0 : index
    %c40 = arith.constant 40 : index
    %29 = vector.load %arg15[%c0_22, %c40] : memref<16x96xf32, #tpu.memory_space<vmem>>, vector<8x8xf32>
    %c0_23 = arith.constant 0 : index
    %c72 = arith.constant 72 : index
    %30 = vector.load %arg15[%c0_23, %c72] : memref<16x96xf32, #tpu.memory_space<vmem>>, vector<8x8xf32>
    %cst_24 = arith.constant dense<0.000000e+00> : vector<8x8xf32>
    %31 = tpu.matmul %28, %29, %cst_24 {dimension_numbers = #tpu.dot_dimension_numbers<[1], [1], [0], [0], [0, 0, 1, 0], [], []>} : vector<8x8xf32>, vector<8x8xf32>, vector<8x8xf32> -> vector<8x8xf32>
    %32 = arith.addf %31, %7 : vector<8x8xf32>
    %cst_25 = arith.constant dense<0xFF800000> : vector<8xf32>
    %33 = vector.multi_reduction <maximumf>, %32, %cst_25 [1] : vector<8x8xf32> to vector<8xf32>
    %34 = vector.shape_cast %33 : vector<8xf32> to vector<8x1xf32>
    %35 = vector.broadcast %34 : vector<8x1xf32> to vector<8x8xf32>
    %36 = arith.subf %32, %35 : vector<8x8xf32>
    %37 = math.exp %36 : vector<8x8xf32>
    %cst_26 = arith.constant dense<0.000000e+00> : vector<8xf32>
    %38 = vector.multi_reduction <add>, %37, %cst_26 [1] : vector<8x8xf32> to vector<8xf32>
    %39 = vector.shape_cast %38 : vector<8xf32> to vector<8x1xf32>
    %40 = vector.broadcast %39 : vector<8x1xf32> to vector<8x8xf32>
    %41 = arith.divf %37, %40 : vector<8x8xf32>
    %cst_27 = arith.constant dense<0.000000e+00> : vector<8x8xf32>
    %42 = tpu.matmul %41, %30, %cst_27 {dimension_numbers = #tpu.dot_dimension_numbers<[1], [0], [0], [1], [0, 0, 1, 1], [], []>} : vector<8x8xf32>, vector<8x8xf32>, vector<8x8xf32> -> vector<8x8xf32>
    %c0_28 = arith.constant 0 : index
    %c8_29 = arith.constant 8 : index
    %43 = vector.load %arg16[%c0_28, %c8_29] : memref<16x32xf32, #tpu.memory_space<vmem>>, vector<8x8xf32>
    tpu.vector_store %arg16[%c0_28, %c8_29], %42 {strides = array<i32>} : memref<16x32xf32, #tpu.memory_space<vmem>>, vector<8x8xf32>,
    %c0_30 = arith.constant 0 : index
    %c16 = arith.constant 16 : index
    %44 = vector.load %arg15[%c0_30, %c16] : memref<16x96xf32, #tpu.memory_space<vmem>>, vector<8x8xf32>
    %cst_31 = arith.constant 0.353553385 : f32
    %45 = vector.broadcast %cst_31 : f32 to vector<8x8xf32>
    %46 = arith.mulf %44, %45 : vector<8x8xf32>
    %c0_32 = arith.constant 0 : index
    %c48 = arith.constant 48 : index
    %47 = vector.load %arg15[%c0_32, %c48] : memref<16x96xf32, #tpu.memory_space<vmem>>, vector<8x8xf32>
    %c0_33 = arith.constant 0 : index
    %c80 = arith.constant 80 : index
    %48 = vector.load %arg15[%c0_33, %c80] : memref<16x96xf32, #tpu.memory_space<vmem>>, vector<8x8xf32>
    %cst_34 = arith.constant dense<0.000000e+00> : vector<8x8xf32>
    %49 = tpu.matmul %46, %47, %cst_34 {dimension_numbers = #tpu.dot_dimension_numbers<[1], [1], [0], [0], [0, 0, 1, 0], [], []>} : vector<8x8xf32>, vector<8x8xf32>, vector<8x8xf32> -> vector<8x8xf32>
    %50 = arith.addf %49, %7 : vector<8x8xf32>
    %cst_35 = arith.constant dense<0xFF800000> : vector<8xf32>
    %51 = vector.multi_reduction <maximumf>, %50, %cst_35 [1] : vector<8x8xf32> to vector<8xf32>
    %52 = vector.shape_cast %51 : vector<8xf32> to vector<8x1xf32>
    %53 = vector.broadcast %52 : vector<8x1xf32> to vector<8x8xf32>
    %54 = arith.subf %50, %53 : vector<8x8xf32>
    %55 = math.exp %54 : vector<8x8xf32>
    %cst_36 = arith.constant dense<0.000000e+00> : vector<8xf32>
    %56 = vector.multi_reduction <add>, %55, %cst_36 [1] : vector<8x8xf32> to vector<8xf32>
    %57 = vector.shape_cast %56 : vector<8xf32> to vector<8x1xf32>
    %58 = vector.broadcast %57 : vector<8x1xf32> to vector<8x8xf32>
    %59 = arith.divf %55, %58 : vector<8x8xf32>
    %cst_37 = arith.constant dense<0.000000e+00> : vector<8x8xf32>
    %60 = tpu.matmul %59, %48, %cst_37 {dimension_numbers = #tpu.dot_dimension_numbers<[1], [0], [0], [1], [0, 0, 1, 1], [], []>} : vector<8x8xf32>, vector<8x8xf32>, vector<8x8xf32> -> vector<8x8xf32>
    %c0_38 = arith.constant 0 : index
    %c16_39 = arith.constant 16 : index
    %61 = vector.load %arg16[%c0_38, %c16_39] : memref<16x32xf32, #tpu.memory_space<vmem>>, vector<8x8xf32>
    tpu.vector_store %arg16[%c0_38, %c16_39], %60 {strides = array<i32>} : memref<16x32xf32, #tpu.memory_space<vmem>>, vector<8x8xf32>,
    %c0_40 = arith.constant 0 : index
    %c24 = arith.constant 24 : index
    %62 = vector.load %arg15[%c0_40, %c24] : memref<16x96xf32, #tpu.memory_space<vmem>>, vector<8x8xf32>
    %cst_41 = arith.constant 0.353553385 : f32
    %63 = vector.broadcast %cst_41 : f32 to vector<8x8xf32>
    %64 = arith.mulf %62, %63 : vector<8x8xf32>
    %c0_42 = arith.constant 0 : index
    %c56 = arith.constant 56 : index
    %65 = vector.load %arg15[%c0_42, %c56] : memref<16x96xf32, #tpu.memory_space<vmem>>, vector<8x8xf32>
    %c0_43 = arith.constant 0 : index
    %c88 = arith.constant 88 : index
    %66 = vector.load %arg15[%c0_43, %c88] : memref<16x96xf32, #tpu.memory_space<vmem>>, vector<8x8xf32>
    %cst_44 = arith.constant dense<0.000000e+00> : vector<8x8xf32>
    %67 = tpu.matmul %64, %65, %cst_44 {dimension_numbers = #tpu.dot_dimension_numbers<[1], [1], [0], [0], [0, 0, 1, 0], [], []>} : vector<8x8xf32>, vector<8x8xf32>, vector<8x8xf32> -> vector<8x8xf32>
    %68 = arith.addf %67, %7 : vector<8x8xf32>
    %cst_45 = arith.constant dense<0xFF800000> : vector<8xf32>
    %69 = vector.multi_reduction <maximumf>, %68, %cst_45 [1] : vector<8x8xf32> to vector<8xf32>
    %70 = vector.shape_cast %69 : vector<8xf32> to vector<8x1xf32>
    %71 = vector.broadcast %70 : vector<8x1xf32> to vector<8x8xf32>
    %72 = arith.subf %68, %71 : vector<8x8xf32>
    %73 = math.exp %72 : vector<8x8xf32>
    %cst_46 = arith.constant dense<0.000000e+00> : vector<8xf32>
    %74 = vector.multi_reduction <add>, %73, %cst_46 [1] : vector<8x8xf32> to vector<8xf32>
    %75 = vector.shape_cast %74 : vector<8xf32> to vector<8x1xf32>
    %76 = vector.broadcast %75 : vector<8x1xf32> to vector<8x8xf32>
    %77 = arith.divf %73, %76 : vector<8x8xf32>
    %cst_47 = arith.constant dense<0.000000e+00> : vector<8x8xf32>
    %78 = tpu.matmul %77, %66, %cst_47 {dimension_numbers = #tpu.dot_dimension_numbers<[1], [0], [0], [1], [0, 0, 1, 1], [], []>} : vector<8x8xf32>, vector<8x8xf32>, vector<8x8xf32> -> vector<8x8xf32>
    %c0_48 = arith.constant 0 : index
    %c24_49 = arith.constant 24 : index
    %79 = vector.load %arg16[%c0_48, %c24_49] : memref<16x32xf32, #tpu.memory_space<vmem>>, vector<8x8xf32>
    tpu.vector_store %arg16[%c0_48, %c24_49], %78 {strides = array<i32>} : memref<16x32xf32, #tpu.memory_space<vmem>>, vector<8x8xf32>,
    %c8_50 = arith.constant 8 : index
    %c0_51 = arith.constant 0 : index
    %80 = vector.load %arg1[%c8_50, %c0_51] : memref<16x8xf32, #tpu.memory_space<vmem>>, vector<8x8xf32>
    %c8_52 = arith.constant 8 : index
    %c0_53 = arith.constant 0 : index
    %81 = vector.load %arg15[%c8_52, %c0_53] : memref<16x96xf32, #tpu.memory_space<vmem>>, vector<8x8xf32>
    %cst_54 = arith.constant 0.353553385 : f32
    %82 = vector.broadcast %cst_54 : f32 to vector<8x8xf32>
    %83 = arith.mulf %81, %82 : vector<8x8xf32>
    %c8_55 = arith.constant 8 : index
    %c32_56 = arith.constant 32 : index
    %84 = vector.load %arg15[%c8_55, %c32_56] : memref<16x96xf32, #tpu.memory_space<vmem>>, vector<8x8xf32>
    %c8_57 = arith.constant 8 : index
    %c64_58 = arith.constant 64 : index
    %85 = vector.load %arg15[%c8_57, %c64_58] : memref<16x96xf32, #tpu.memory_space<vmem>>, vector<8x8xf32>
    %cst_59 = arith.constant dense<0.000000e+00> : vector<8x8xf32>
    %86 = tpu.matmul %83, %84, %cst_59 {dimension_numbers = #tpu.dot_dimension_numbers<[1], [1], [0], [0], [0, 0, 1, 0], [], []>} : vector<8x8xf32>, vector<8x8xf32>, vector<8x8xf32> -> vector<8x8xf32>
    %87 = arith.addf %86, %80 : vector<8x8xf32>
    %cst_60 = arith.constant dense<0xFF800000> : vector<8xf32>
    %88 = vector.multi_reduction <maximumf>, %87, %cst_60 [1] : vector<8x8xf32> to vector<8xf32>
    %89 = vector.shape_cast %88 : vector<8xf32> to vector<8x1xf32>
    %90 = vector.broadcast %89 : vector<8x1xf32> to vector<8x8xf32>
    %91 = arith.subf %87, %90 : vector<8x8xf32>
    %92 = math.exp %91 : vector<8x8xf32>
    %cst_61 = arith.constant dense<0.000000e+00> : vector<8xf32>
    %93 = vector.multi_reduction <add>, %92, %cst_61 [1] : vector<8x8xf32> to vector<8xf32>
    %94 = vector.shape_cast %93 : vector<8xf32> to vector<8x1xf32>
    %95 = vector.broadcast %94 : vector<8x1xf32> to vector<8x8xf32>
    %96 = arith.divf %92, %95 : vector<8x8xf32>
    %cst_62 = arith.constant dense<0.000000e+00> : vector<8x8xf32>
    %97 = tpu.matmul %96, %85, %cst_62 {dimension_numbers = #tpu.dot_dimension_numbers<[1], [0], [0], [1], [0, 0, 1, 1], [], []>} : vector<8x8xf32>, vector<8x8xf32>, vector<8x8xf32> -> vector<8x8xf32>
    %c8_63 = arith.constant 8 : index
    %c0_64 = arith.constant 0 : index
    %98 = vector.load %arg16[%c8_63, %c0_64] : memref<16x32xf32, #tpu.memory_space<vmem>>, vector<8x8xf32>
    tpu.vector_store %arg16[%c8_63, %c0_64], %97 {strides = array<i32>} : memref<16x32xf32, #tpu.memory_space<vmem>>, vector<8x8xf32>,
    %c8_65 = arith.constant 8 : index
    %c8_66 = arith.constant 8 : index
    %99 = vector.load %arg15[%c8_65, %c8_66] : memref<16x96xf32, #tpu.memory_space<vmem>>, vector<8x8xf32>
    %cst_67 = arith.constant 0.353553385 : f32
    %100 = vector.broadcast %cst_67 : f32 to vector<8x8xf32>
    %101 = arith.mulf %99, %100 : vector<8x8xf32>
    %c8_68 = arith.constant 8 : index
    %c40_69 = arith.constant 40 : index
    %102 = vector.load %arg15[%c8_68, %c40_69] : memref<16x96xf32, #tpu.memory_space<vmem>>, vector<8x8xf32>
    %c8_70 = arith.constant 8 : index
    %c72_71 = arith.constant 72 : index
    %103 = vector.load %arg15[%c8_70, %c72_71] : memref<16x96xf32, #tpu.memory_space<vmem>>, vector<8x8xf32>
    %cst_72 = arith.constant dense<0.000000e+00> : vector<8x8xf32>
    %104 = tpu.matmul %101, %102, %cst_72 {dimension_numbers = #tpu.dot_dimension_numbers<[1], [1], [0], [0], [0, 0, 1, 0], [], []>} : vector<8x8xf32>, vector<8x8xf32>, vector<8x8xf32> -> vector<8x8xf32>
    %105 = arith.addf %104, %80 : vector<8x8xf32>
    %cst_73 = arith.constant dense<0xFF800000> : vector<8xf32>
    %106 = vector.multi_reduction <maximumf>, %105, %cst_73 [1] : vector<8x8xf32> to vector<8xf32>
    %107 = vector.shape_cast %106 : vector<8xf32> to vector<8x1xf32>
    %108 = vector.broadcast %107 : vector<8x1xf32> to vector<8x8xf32>
    %109 = arith.subf %105, %108 : vector<8x8xf32>
    %110 = math.exp %109 : vector<8x8xf32>
    %cst_74 = arith.constant dense<0.000000e+00> : vector<8xf32>
    %111 = vector.multi_reduction <add>, %110, %cst_74 [1] : vector<8x8xf32> to vector<8xf32>
    %112 = vector.shape_cast %111 : vector<8xf32> to vector<8x1xf32>
    %113 = vector.broadcast %112 : vector<8x1xf32> to vector<8x8xf32>
    %114 = arith.divf %110, %113 : vector<8x8xf32>
    %cst_75 = arith.constant dense<0.000000e+00> : vector<8x8xf32>
    %115 = tpu.matmul %114, %103, %cst_75 {dimension_numbers = #tpu.dot_dimension_numbers<[1], [0], [0], [1], [0, 0, 1, 1], [], []>} : vector<8x8xf32>, vector<8x8xf32>, vector<8x8xf32> -> vector<8x8xf32>
    %c8_76 = arith.constant 8 : index
    %c8_77 = arith.constant 8 : index
    %116 = vector.load %arg16[%c8_76, %c8_77] : memref<16x32xf32, #tpu.memory_space<vmem>>, vector<8x8xf32>
    tpu.vector_store %arg16[%c8_76, %c8_77], %115 {strides = array<i32>} : memref<16x32xf32, #tpu.memory_space<vmem>>, vector<8x8xf32>,
    %c8_78 = arith.constant 8 : index
    %c16_79 = arith.constant 16 : index
    %117 = vector.load %arg15[%c8_78, %c16_79] : memref<16x96xf32, #tpu.memory_space<vmem>>, vector<8x8xf32>
    %cst_80 = arith.constant 0.353553385 : f32
    %118 = vector.broadcast %cst_80 : f32 to vector<8x8xf32>
    %119 = arith.mulf %117, %118 : vector<8x8xf32>
    %c8_81 = arith.constant 8 : index
    %c48_82 = arith.constant 48 : index
    %120 = vector.load %arg15[%c8_81, %c48_82] : memref<16x96xf32, #tpu.memory_space<vmem>>, vector<8x8xf32>
    %c8_83 = arith.constant 8 : index
    %c80_84 = arith.constant 80 : index
    %121 = vector.load %arg15[%c8_83, %c80_84] : memref<16x96xf32, #tpu.memory_space<vmem>>, vector<8x8xf32>
    %cst_85 = arith.constant dense<0.000000e+00> : vector<8x8xf32>
    %122 = tpu.matmul %119, %120, %cst_85 {dimension_numbers = #tpu.dot_dimension_numbers<[1], [1], [0], [0], [0, 0, 1, 0], [], []>} : vector<8x8xf32>, vector<8x8xf32>, vector<8x8xf32> -> vector<8x8xf32>
    %123 = arith.addf %122, %80 : vector<8x8xf32>
    %cst_86 = arith.constant dense<0xFF800000> : vector<8xf32>
    %124 = vector.multi_reduction <maximumf>, %123, %cst_86 [1] : vector<8x8xf32> to vector<8xf32>
    %125 = vector.shape_cast %124 : vector<8xf32> to vector<8x1xf32>
    %126 = vector.broadcast %125 : vector<8x1xf32> to vector<8x8xf32>
    %127 = arith.subf %123, %126 : vector<8x8xf32>
    %128 = math.exp %127 : vector<8x8xf32>
    %cst_87 = arith.constant dense<0.000000e+00> : vector<8xf32>
    %129 = vector.multi_reduction <add>, %128, %cst_87 [1] : vector<8x8xf32> to vector<8xf32>
    %130 = vector.shape_cast %129 : vector<8xf32> to vector<8x1xf32>
    %131 = vector.broadcast %130 : vector<8x1xf32> to vector<8x8xf32>
    %132 = arith.divf %128, %131 : vector<8x8xf32>
    %cst_88 = arith.constant dense<0.000000e+00> : vector<8x8xf32>
    %133 = tpu.matmul %132, %121, %cst_88 {dimension_numbers = #tpu.dot_dimension_numbers<[1], [0], [0], [1], [0, 0, 1, 1], [], []>} : vector<8x8xf32>, vector<8x8xf32>, vector<8x8xf32> -> vector<8x8xf32>
    %c8_89 = arith.constant 8 : index
    %c16_90 = arith.constant 16 : index
    %134 = vector.load %arg16[%c8_89, %c16_90] : memref<16x32xf32, #tpu.memory_space<vmem>>, vector<8x8xf32>
    tpu.vector_store %arg16[%c8_89, %c16_90], %133 {strides = array<i32>} : memref<16x32xf32, #tpu.memory_space<vmem>>, vector<8x8xf32>,
    %c8_91 = arith.constant 8 : index
    %c24_92 = arith.constant 24 : index
    %135 = vector.load %arg15[%c8_91, %c24_92] : memref<16x96xf32, #tpu.memory_space<vmem>>, vector<8x8xf32>
    %cst_93 = arith.constant 0.353553385 : f32
    %136 = vector.broadcast %cst_93 : f32 to vector<8x8xf32>
    %137 = arith.mulf %135, %136 : vector<8x8xf32>
    %c8_94 = arith.constant 8 : index
    %c56_95 = arith.constant 56 : index
    %138 = vector.load %arg15[%c8_94, %c56_95] : memref<16x96xf32, #tpu.memory_space<vmem>>, vector<8x8xf32>
    %c8_96 = arith.constant 8 : index
    %c88_97 = arith.constant 88 : index
    %139 = vector.load %arg15[%c8_96, %c88_97] : memref<16x96xf32, #tpu.memory_space<vmem>>, vector<8x8xf32>
    %cst_98 = arith.constant dense<0.000000e+00> : vector<8x8xf32>
    %140 = tpu.matmul %137, %138, %cst_98 {dimension_numbers = #tpu.dot_dimension_numbers<[1], [1], [0], [0], [0, 0, 1, 0], [], []>} : vector<8x8xf32>, vector<8x8xf32>, vector<8x8xf32> -> vector<8x8xf32>
    %141 = arith.addf %140, %80 : vector<8x8xf32>
    %cst_99 = arith.constant dense<0xFF800000> : vector<8xf32>
    %142 = vector.multi_reduction <maximumf>, %141, %cst_99 [1] : vector<8x8xf32> to vector<8xf32>
    %143 = vector.shape_cast %142 : vector<8xf32> to vector<8x1xf32>
    %144 = vector.broadcast %143 : vector<8x1xf32> to vector<8x8xf32>
    %145 = arith.subf %141, %144 : vector<8x8xf32>
    %146 = math.exp %145 : vector<8x8xf32>
    %cst_100 = arith.constant dense<0.000000e+00> : vector<8xf32>
    %147 = vector.multi_reduction <add>, %146, %cst_100 [1] : vector<8x8xf32> to vector<8xf32>
    %148 = vector.shape_cast %147 : vector<8xf32> to vector<8x1xf32>
    %149 = vector.broadcast %148 : vector<8x1xf32> to vector<8x8xf32>
    %150 = arith.divf %146, %149 : vector<8x8xf32>
    %cst_101 = arith.constant dense<0.000000e+00> : vector<8x8xf32>
    %151 = tpu.matmul %150, %139, %cst_101 {dimension_numbers = #tpu.dot_dimension_numbers<[1], [0], [0], [1], [0, 0, 1, 1], [], []>} : vector<8x8xf32>, vector<8x8xf32>, vector<8x8xf32> -> vector<8x8xf32>
    %c8_102 = arith.constant 8 : index
    %c24_103 = arith.constant 24 : index
    %152 = vector.load %arg16[%c8_102, %c24_103] : memref<16x32xf32, #tpu.memory_space<vmem>>, vector<8x8xf32>
    tpu.vector_store %arg16[%c8_102, %c24_103], %151 {strides = array<i32>} : memref<16x32xf32, #tpu.memory_space<vmem>>, vector<8x8xf32>,
    %c0_104 = arith.constant 0 : index
    %c0_105 = arith.constant 0 : index
    %153 = vector.load %arg16[%c0_104, %c0_105] : memref<16x32xf32, #tpu.memory_space<vmem>>, vector<16x32xf32>
    %c0_106 = arith.constant 0 : index
    %c0_107 = arith.constant 0 : index
    %154 = vector.load %arg4[%c0_106, %c0_107] : memref<32x32xf32, #tpu.memory_space<vmem>>, vector<32x32xf32>
    %cst_108 = arith.constant dense<0.000000e+00> : vector<16x32xf32>
    %155 = tpu.matmul %153, %154, %cst_108 {dimension_numbers = #tpu.dot_dimension_numbers<[1], [0], [0], [1], [0, 0, 1, 1], [], []>} : vector<16x32xf32>, vector<32x32xf32>, vector<16x32xf32> -> vector<16x32xf32>
    %c0_109 = arith.constant 0 : index
    %c0_110 = arith.constant 0 : index
    %156 = vector.load %arg5[%c0_109, %c0_110] : memref<1x32xf32, #tpu.memory_space<vmem>>, vector<1x32xf32>
    %157 = vector.broadcast %156 : vector<1x32xf32> to vector<16x32xf32>
    %158 = arith.addf %155, %157 : vector<16x32xf32>
    %159 = arith.addf %0, %158 : vector<16x32xf32>
    %c0_111 = arith.constant 0 : index
    %c0_112 = arith.constant 0 : index
    %160 = vector.load %arg6[%c0_111, %c0_112] : memref<1x32xf32, #tpu.memory_space<vmem>>, vector<1x32xf32>
    %c0_113 = arith.constant 0 : index
    %c0_114 = arith.constant 0 : index
    %161 = vector.load %arg7[%c0_113, %c0_114] : memref<1x32xf32, #tpu.memory_space<vmem>>, vector<1x32xf32>
    %cst_115 = arith.constant dense<0.000000e+00> : vector<16xf32>
    %162 = vector.multi_reduction <add>, %159, %cst_115 [1] : vector<16x32xf32> to vector<16xf32>
    %163 = vector.shape_cast %162 : vector<16xf32> to vector<16x1xf32>
    %cst_116 = arith.constant 3.200000e+01 : f32
    %164 = vector.broadcast %cst_116 : f32 to vector<16x1xf32>
    %165 = arith.divf %163, %164 : vector<16x1xf32>
    %166 = vector.broadcast %165 : vector<16x1xf32> to vector<16x32xf32>
    %167 = arith.subf %159, %166 : vector<16x32xf32>
    %168 = arith.mulf %167, %167 : vector<16x32xf32>
    %cst_117 = arith.constant dense<0.000000e+00> : vector<16xf32>
    %169 = vector.multi_reduction <add>, %168, %cst_117 [1] : vector<16x32xf32> to vector<16xf32>
    %170 = vector.shape_cast %169 : vector<16xf32> to vector<16x1xf32>
    %cst_118 = arith.constant 3.200000e+01 : f32
    %171 = vector.broadcast %cst_118 : f32 to vector<16x1xf32>
    %172 = arith.divf %170, %171 : vector<16x1xf32>
    %173 = vector.broadcast %165 : vector<16x1xf32> to vector<16x32xf32>
    %174 = arith.subf %159, %173 : vector<16x32xf32>
    %cst_119 = arith.constant 9.99999974E-6 : f32
    %175 = vector.broadcast %cst_119 : f32 to vector<16x1xf32>
    %176 = arith.addf %172, %175 : vector<16x1xf32>
    %177 = math.rsqrt %176 : vector<16x1xf32>
    %178 = vector.broadcast %177 : vector<16x1xf32> to vector<16x32xf32>
    %179 = arith.mulf %174, %178 : vector<16x32xf32>
    %180 = vector.broadcast %160 : vector<1x32xf32> to vector<16x32xf32>
    %181 = arith.mulf %179, %180 : vector<16x32xf32>
    %182 = vector.broadcast %161 : vector<1x32xf32> to vector<16x32xf32>
    %183 = arith.addf %181, %182 : vector<16x32xf32>
    %c0_120 = arith.constant 0 : index
    %c0_121 = arith.constant 0 : index
    %184 = vector.load %arg8[%c0_120, %c0_121] : memref<32x64xf32, #tpu.memory_space<vmem>>, vector<32x64xf32>
    %cst_122 = arith.constant dense<0.000000e+00> : vector<16x64xf32>
    %185 = tpu.matmul %183, %184, %cst_122 {dimension_numbers = #tpu.dot_dimension_numbers<[1], [0], [0], [1], [0, 0, 1, 1], [], []>} : vector<16x32xf32>, vector<32x64xf32>, vector<16x64xf32> -> vector<16x64xf32>
    %c0_123 = arith.constant 0 : index
    %c0_124 = arith.constant 0 : index
    %186 = vector.load %arg9[%c0_123, %c0_124] : memref<1x64xf32, #tpu.memory_space<vmem>>, vector<1x64xf32>
    %187 = vector.broadcast %186 : vector<1x64xf32> to vector<16x64xf32>
    %188 = arith.addf %185, %187 : vector<16x64xf32>
    %189 = arith.negf %188 : vector<16x64xf32>
    %190 = math.exp %189 : vector<16x64xf32>
    %cst_125 = arith.constant 1.000000e+00 : f32
    %191 = vector.broadcast %cst_125 : f32 to vector<16x64xf32>
    %192 = arith.addf %191, %190 : vector<16x64xf32>
    %193 = arith.divf %191, %192 : vector<16x64xf32>
    %194 = arith.mulf %188, %193 : vector<16x64xf32>
    %c0_126 = arith.constant 0 : index
    %c0_127 = arith.constant 0 : index
    %195 = vector.load %arg10[%c0_126, %c0_127] : memref<64x32xf32, #tpu.memory_space<vmem>>, vector<64x32xf32>
    %cst_128 = arith.constant dense<0.000000e+00> : vector<16x32xf32>
    %196 = tpu.matmul %194, %195, %cst_128 {dimension_numbers = #tpu.dot_dimension_numbers<[1], [0], [0], [1], [0, 0, 1, 1], [], []>} : vector<16x64xf32>, vector<64x32xf32>, vector<16x32xf32> -> vector<16x32xf32>
    %c0_129 = arith.constant 0 : index
    %c0_130 = arith.constant 0 : index
    %197 = vector.load %arg11[%c0_129, %c0_130] : memref<1x32xf32, #tpu.memory_space<vmem>>, vector<1x32xf32>
    %198 = vector.broadcast %197 : vector<1x32xf32> to vector<16x32xf32>
    %199 = arith.addf %196, %198 : vector<16x32xf32>
    %200 = arith.addf %183, %199 : vector<16x32xf32>
    %c0_131 = arith.constant 0 : index
    %c0_132 = arith.constant 0 : index
    %201 = vector.load %arg12[%c0_131, %c0_132] : memref<1x32xf32, #tpu.memory_space<vmem>>, vector<1x32xf32>
    %c0_133 = arith.constant 0 : index
    %c0_134 = arith.constant 0 : index
    %202 = vector.load %arg13[%c0_133, %c0_134] : memref<1x32xf32, #tpu.memory_space<vmem>>, vector<1x32xf32>
    %cst_135 = arith.constant dense<0.000000e+00> : vector<16xf32>
    %203 = vector.multi_reduction <add>, %200, %cst_135 [1] : vector<16x32xf32> to vector<16xf32>
    %204 = vector.shape_cast %203 : vector<16xf32> to vector<16x1xf32>
    %cst_136 = arith.constant 3.200000e+01 : f32
    %205 = vector.broadcast %cst_136 : f32 to vector<16x1xf32>
    %206 = arith.divf %204, %205 : vector<16x1xf32>
    %207 = vector.broadcast %206 : vector<16x1xf32> to vector<16x32xf32>
    %208 = arith.subf %200, %207 : vector<16x32xf32>
    %209 = arith.mulf %208, %208 : vector<16x32xf32>
    %cst_137 = arith.constant dense<0.000000e+00> : vector<16xf32>
    %210 = vector.multi_reduction <add>, %209, %cst_137 [1] : vector<16x32xf32> to vector<16xf32>
    %211 = vector.shape_cast %210 : vector<16xf32> to vector<16x1xf32>
    %cst_138 = arith.constant 3.200000e+01 : f32
    %212 = vector.broadcast %cst_138 : f32 to vector<16x1xf32>
    %213 = arith.divf %211, %212 : vector<16x1xf32>
    %214 = vector.broadcast %206 : vector<16x1xf32> to vector<16x32xf32>
    %215 = arith.subf %200, %214 : vector<16x32xf32>
    %cst_139 = arith.constant 9.99999974E-6 : f32
    %216 = vector.broadcast %cst_139 : f32 to vector<16x1xf32>
    %217 = arith.addf %213, %216 : vector<16x1xf32>
    %218 = math.rsqrt %217 : vector<16x1xf32>
    %219 = vector.broadcast %218 : vector<16x1xf32> to vector<16x32xf32>
    %220 = arith.mulf %215, %219 : vector<16x32xf32>
    %221 = vector.broadcast %201 : vector<1x32xf32> to vector<16x32xf32>
    %222 = arith.mulf %220, %221 : vector<16x32xf32>
    %223 = vector.broadcast %202 : vector<1x32xf32> to vector<16x32xf32>
    %224 = arith.addf %222, %223 : vector<16x32xf32>
    %c0_140 = arith.constant 0 : index
    %c0_141 = arith.constant 0 : index
    %225 = vector.load %arg14[%c0_140, %c0_141] : memref<16x32xf32, #tpu.memory_space<vmem>>, vector<16x32xf32>
    tpu.vector_store %arg14[%c0_140, %c0_141], %224 {strides = array<i32>} : memref<16x32xf32, #tpu.memory_space<vmem>>, vector<16x32xf32>,
    return
  }
}

module attributes {stable_mosaic.version = 11 : i64} {
  func.func @_decoder_layer_kernel(%arg0: memref<16x32xf32, #tpu.memory_space<vmem>>, %arg1: memref<16x32xf32, #tpu.memory_space<vmem>>, %arg2: memref<16x8xf32, #tpu.memory_space<vmem>>, %arg3: memref<16x8xf32, #tpu.memory_space<vmem>>, %arg4: memref<32x96xf32, #tpu.memory_space<vmem>>, %arg5: memref<1x96xf32, #tpu.memory_space<vmem>>, %arg6: memref<32x32xf32, #tpu.memory_space<vmem>>, %arg7: memref<1x32xf32, #tpu.memory_space<vmem>>, %arg8: memref<1x32xf32, #tpu.memory_space<vmem>>, %arg9: memref<1x32xf32, #tpu.memory_space<vmem>>, %arg10: memref<32x32xf32, #tpu.memory_space<vmem>>, %arg11: memref<1x32xf32, #tpu.memory_space<vmem>>, %arg12: memref<32x64xf32, #tpu.memory_space<vmem>>, %arg13: memref<1x64xf32, #tpu.memory_space<vmem>>, %arg14: memref<32x32xf32, #tpu.memory_space<vmem>>, %arg15: memref<1x32xf32, #tpu.memory_space<vmem>>, %arg16: memref<1x32xf32, #tpu.memory_space<vmem>>, %arg17: memref<1x32xf32, #tpu.memory_space<vmem>>, %arg18: memref<32x64xf32, #tpu.memory_space<vmem>>, %arg19: memref<1x64xf32, #tpu.memory_space<vmem>>, %arg20: memref<64x32xf32, #tpu.memory_space<vmem>>, %arg21: memref<1x32xf32, #tpu.memory_space<vmem>>, %arg22: memref<1x32xf32, #tpu.memory_space<vmem>>, %arg23: memref<1x32xf32, #tpu.memory_space<vmem>>, %arg24: memref<16x32xf32, #tpu.memory_space<vmem>>, %arg25: memref<16x96xf32, #tpu.memory_space<vmem>>, %arg26: memref<16x32xf32, #tpu.memory_space<vmem>>, %arg27: memref<16x32xf32, #tpu.memory_space<vmem>>, %arg28: memref<16x64xf32, #tpu.memory_space<vmem>>) attributes {dimension_semantics = [], scalar_prefetch = 0 : i64, scratch_operands = 4 : i64, tpu.core_type = #tpu.core_type<tc>} {
    %c0 = arith.constant 0 : index
    %c0_0 = arith.constant 0 : index
    %0 = vector.load %arg0[%c0, %c0_0] : memref<16x32xf32, #tpu.memory_space<vmem>>, vector<16x32xf32>
    %c0_1 = arith.constant 0 : index
    %c0_2 = arith.constant 0 : index
    %1 = vector.load %arg1[%c0_1, %c0_2] : memref<16x32xf32, #tpu.memory_space<vmem>>, vector<16x32xf32>
    %c0_3 = arith.constant 0 : index
    %c0_4 = arith.constant 0 : index
    %2 = vector.load %arg4[%c0_3, %c0_4] : memref<32x96xf32, #tpu.memory_space<vmem>>, vector<32x96xf32>
    %cst = arith.constant dense<0.000000e+00> : vector<16x96xf32>
    %3 = tpu.matmul %0, %2, %cst {dimension_numbers = #tpu.dot_dimension_numbers<[1], [0], [0], [1], [0, 0, 1, 1], [], []>} : vector<16x32xf32>, vector<32x96xf32>, vector<16x96xf32> -> vector<16x96xf32>
    %c0_5 = arith.constant 0 : index
    %c0_6 = arith.constant 0 : index
    %4 = vector.load %arg5[%c0_5, %c0_6] : memref<1x96xf32, #tpu.memory_space<vmem>>, vector<1x96xf32>
    %5 = vector.broadcast %4 : vector<1x96xf32> to vector<16x96xf32>
    %6 = arith.addf %3, %5 : vector<16x96xf32>
    %c0_7 = arith.constant 0 : index
    %c0_8 = arith.constant 0 : index
    %7 = vector.load %arg25[%c0_7, %c0_8] : memref<16x96xf32, #tpu.memory_space<vmem>>, vector<16x96xf32>
    tpu.vector_store %arg25[%c0_7, %c0_8], %6 {strides = array<i32>} : memref<16x96xf32, #tpu.memory_space<vmem>>, vector<16x96xf32>,
    %c0_9 = arith.constant 0 : index
    %c0_10 = arith.constant 0 : index
    %8 = vector.load %arg2[%c0_9, %c0_10] : memref<16x8xf32, #tpu.memory_space<vmem>>, vector<8x8xf32>
    %c0_11 = arith.constant 0 : index
    %c0_12 = arith.constant 0 : index
    %9 = vector.load %arg25[%c0_11, %c0_12] : memref<16x96xf32, #tpu.memory_space<vmem>>, vector<8x8xf32>
    %cst_13 = arith.constant 0.353553385 : f32
    %10 = vector.broadcast %cst_13 : f32 to vector<8x8xf32>
    %11 = arith.mulf %9, %10 : vector<8x8xf32>
    %c0_14 = arith.constant 0 : index
    %c32 = arith.constant 32 : index
    %12 = vector.load %arg25[%c0_14, %c32] : memref<16x96xf32, #tpu.memory_space<vmem>>, vector<8x8xf32>
    %c0_15 = arith.constant 0 : index
    %c64 = arith.constant 64 : index
    %13 = vector.load %arg25[%c0_15, %c64] : memref<16x96xf32, #tpu.memory_space<vmem>>, vector<8x8xf32>
    %cst_16 = arith.constant dense<0.000000e+00> : vector<8x8xf32>
    %14 = tpu.matmul %11, %12, %cst_16 {dimension_numbers = #tpu.dot_dimension_numbers<[1], [1], [0], [0], [0, 0, 1, 0], [], []>} : vector<8x8xf32>, vector<8x8xf32>, vector<8x8xf32> -> vector<8x8xf32>
    %15 = arith.addf %14, %8 : vector<8x8xf32>
    %cst_17 = arith.constant dense<0xFF800000> : vector<8xf32>
    %16 = vector.multi_reduction <maximumf>, %15, %cst_17 [1] : vector<8x8xf32> to vector<8xf32>
    %17 = vector.shape_cast %16 : vector<8xf32> to vector<8x1xf32>
    %18 = vector.broadcast %17 : vector<8x1xf32> to vector<8x8xf32>
    %19 = arith.subf %15, %18 : vector<8x8xf32>
    %20 = math.exp %19 : vector<8x8xf32>
    %cst_18 = arith.constant dense<0.000000e+00> : vector<8xf32>
    %21 = vector.multi_reduction <add>, %20, %cst_18 [1] : vector<8x8xf32> to vector<8xf32>
    %22 = vector.shape_cast %21 : vector<8xf32> to vector<8x1xf32>
    %23 = vector.broadcast %22 : vector<8x1xf32> to vector<8x8xf32>
    %24 = arith.divf %20, %23 : vector<8x8xf32>
    %cst_19 = arith.constant dense<0.000000e+00> : vector<8x8xf32>
    %25 = tpu.matmul %24, %13, %cst_19 {dimension_numbers = #tpu.dot_dimension_numbers<[1], [0], [0], [1], [0, 0, 1, 1], [], []>} : vector<8x8xf32>, vector<8x8xf32>, vector<8x8xf32> -> vector<8x8xf32>
    %c0_20 = arith.constant 0 : index
    %c0_21 = arith.constant 0 : index
    %26 = vector.load %arg26[%c0_20, %c0_21] : memref<16x32xf32, #tpu.memory_space<vmem>>, vector<8x8xf32>
    tpu.vector_store %arg26[%c0_20, %c0_21], %25 {strides = array<i32>} : memref<16x32xf32, #tpu.memory_space<vmem>>, vector<8x8xf32>,
    %c0_22 = arith.constant 0 : index
    %c8 = arith.constant 8 : index
    %27 = vector.load %arg25[%c0_22, %c8] : memref<16x96xf32, #tpu.memory_space<vmem>>, vector<8x8xf32>
    %cst_23 = arith.constant 0.353553385 : f32
    %28 = vector.broadcast %cst_23 : f32 to vector<8x8xf32>
    %29 = arith.mulf %27, %28 : vector<8x8xf32>
    %c0_24 = arith.constant 0 : index
    %c40 = arith.constant 40 : index
    %30 = vector.load %arg25[%c0_24, %c40] : memref<16x96xf32, #tpu.memory_space<vmem>>, vector<8x8xf32>
    %c0_25 = arith.constant 0 : index
    %c72 = arith.constant 72 : index
    %31 = vector.load %arg25[%c0_25, %c72] : memref<16x96xf32, #tpu.memory_space<vmem>>, vector<8x8xf32>
    %cst_26 = arith.constant dense<0.000000e+00> : vector<8x8xf32>
    %32 = tpu.matmul %29, %30, %cst_26 {dimension_numbers = #tpu.dot_dimension_numbers<[1], [1], [0], [0], [0, 0, 1, 0], [], []>} : vector<8x8xf32>, vector<8x8xf32>, vector<8x8xf32> -> vector<8x8xf32>
    %33 = arith.addf %32, %8 : vector<8x8xf32>
    %cst_27 = arith.constant dense<0xFF800000> : vector<8xf32>
    %34 = vector.multi_reduction <maximumf>, %33, %cst_27 [1] : vector<8x8xf32> to vector<8xf32>
    %35 = vector.shape_cast %34 : vector<8xf32> to vector<8x1xf32>
    %36 = vector.broadcast %35 : vector<8x1xf32> to vector<8x8xf32>
    %37 = arith.subf %33, %36 : vector<8x8xf32>
    %38 = math.exp %37 : vector<8x8xf32>
    %cst_28 = arith.constant dense<0.000000e+00> : vector<8xf32>
    %39 = vector.multi_reduction <add>, %38, %cst_28 [1] : vector<8x8xf32> to vector<8xf32>
    %40 = vector.shape_cast %39 : vector<8xf32> to vector<8x1xf32>
    %41 = vector.broadcast %40 : vector<8x1xf32> to vector<8x8xf32>
    %42 = arith.divf %38, %41 : vector<8x8xf32>
    %cst_29 = arith.constant dense<0.000000e+00> : vector<8x8xf32>
    %43 = tpu.matmul %42, %31, %cst_29 {dimension_numbers = #tpu.dot_dimension_numbers<[1], [0], [0], [1], [0, 0, 1, 1], [], []>} : vector<8x8xf32>, vector<8x8xf32>, vector<8x8xf32> -> vector<8x8xf32>
    %c0_30 = arith.constant 0 : index
    %c8_31 = arith.constant 8 : index
    %44 = vector.load %arg26[%c0_30, %c8_31] : memref<16x32xf32, #tpu.memory_space<vmem>>, vector<8x8xf32>
    tpu.vector_store %arg26[%c0_30, %c8_31], %43 {strides = array<i32>} : memref<16x32xf32, #tpu.memory_space<vmem>>, vector<8x8xf32>,
    %c0_32 = arith.constant 0 : index
    %c16 = arith.constant 16 : index
    %45 = vector.load %arg25[%c0_32, %c16] : memref<16x96xf32, #tpu.memory_space<vmem>>, vector<8x8xf32>
    %cst_33 = arith.constant 0.353553385 : f32
    %46 = vector.broadcast %cst_33 : f32 to vector<8x8xf32>
    %47 = arith.mulf %45, %46 : vector<8x8xf32>
    %c0_34 = arith.constant 0 : index
    %c48 = arith.constant 48 : index
    %48 = vector.load %arg25[%c0_34, %c48] : memref<16x96xf32, #tpu.memory_space<vmem>>, vector<8x8xf32>
    %c0_35 = arith.constant 0 : index
    %c80 = arith.constant 80 : index
    %49 = vector.load %arg25[%c0_35, %c80] : memref<16x96xf32, #tpu.memory_space<vmem>>, vector<8x8xf32>
    %cst_36 = arith.constant dense<0.000000e+00> : vector<8x8xf32>
    %50 = tpu.matmul %47, %48, %cst_36 {dimension_numbers = #tpu.dot_dimension_numbers<[1], [1], [0], [0], [0, 0, 1, 0], [], []>} : vector<8x8xf32>, vector<8x8xf32>, vector<8x8xf32> -> vector<8x8xf32>
    %51 = arith.addf %50, %8 : vector<8x8xf32>
    %cst_37 = arith.constant dense<0xFF800000> : vector<8xf32>
    %52 = vector.multi_reduction <maximumf>, %51, %cst_37 [1] : vector<8x8xf32> to vector<8xf32>
    %53 = vector.shape_cast %52 : vector<8xf32> to vector<8x1xf32>
    %54 = vector.broadcast %53 : vector<8x1xf32> to vector<8x8xf32>
    %55 = arith.subf %51, %54 : vector<8x8xf32>
    %56 = math.exp %55 : vector<8x8xf32>
    %cst_38 = arith.constant dense<0.000000e+00> : vector<8xf32>
    %57 = vector.multi_reduction <add>, %56, %cst_38 [1] : vector<8x8xf32> to vector<8xf32>
    %58 = vector.shape_cast %57 : vector<8xf32> to vector<8x1xf32>
    %59 = vector.broadcast %58 : vector<8x1xf32> to vector<8x8xf32>
    %60 = arith.divf %56, %59 : vector<8x8xf32>
    %cst_39 = arith.constant dense<0.000000e+00> : vector<8x8xf32>
    %61 = tpu.matmul %60, %49, %cst_39 {dimension_numbers = #tpu.dot_dimension_numbers<[1], [0], [0], [1], [0, 0, 1, 1], [], []>} : vector<8x8xf32>, vector<8x8xf32>, vector<8x8xf32> -> vector<8x8xf32>
    %c0_40 = arith.constant 0 : index
    %c16_41 = arith.constant 16 : index
    %62 = vector.load %arg26[%c0_40, %c16_41] : memref<16x32xf32, #tpu.memory_space<vmem>>, vector<8x8xf32>
    tpu.vector_store %arg26[%c0_40, %c16_41], %61 {strides = array<i32>} : memref<16x32xf32, #tpu.memory_space<vmem>>, vector<8x8xf32>,
    %c0_42 = arith.constant 0 : index
    %c24 = arith.constant 24 : index
    %63 = vector.load %arg25[%c0_42, %c24] : memref<16x96xf32, #tpu.memory_space<vmem>>, vector<8x8xf32>
    %cst_43 = arith.constant 0.353553385 : f32
    %64 = vector.broadcast %cst_43 : f32 to vector<8x8xf32>
    %65 = arith.mulf %63, %64 : vector<8x8xf32>
    %c0_44 = arith.constant 0 : index
    %c56 = arith.constant 56 : index
    %66 = vector.load %arg25[%c0_44, %c56] : memref<16x96xf32, #tpu.memory_space<vmem>>, vector<8x8xf32>
    %c0_45 = arith.constant 0 : index
    %c88 = arith.constant 88 : index
    %67 = vector.load %arg25[%c0_45, %c88] : memref<16x96xf32, #tpu.memory_space<vmem>>, vector<8x8xf32>
    %cst_46 = arith.constant dense<0.000000e+00> : vector<8x8xf32>
    %68 = tpu.matmul %65, %66, %cst_46 {dimension_numbers = #tpu.dot_dimension_numbers<[1], [1], [0], [0], [0, 0, 1, 0], [], []>} : vector<8x8xf32>, vector<8x8xf32>, vector<8x8xf32> -> vector<8x8xf32>
    %69 = arith.addf %68, %8 : vector<8x8xf32>
    %cst_47 = arith.constant dense<0xFF800000> : vector<8xf32>
    %70 = vector.multi_reduction <maximumf>, %69, %cst_47 [1] : vector<8x8xf32> to vector<8xf32>
    %71 = vector.shape_cast %70 : vector<8xf32> to vector<8x1xf32>
    %72 = vector.broadcast %71 : vector<8x1xf32> to vector<8x8xf32>
    %73 = arith.subf %69, %72 : vector<8x8xf32>
    %74 = math.exp %73 : vector<8x8xf32>
    %cst_48 = arith.constant dense<0.000000e+00> : vector<8xf32>
    %75 = vector.multi_reduction <add>, %74, %cst_48 [1] : vector<8x8xf32> to vector<8xf32>
    %76 = vector.shape_cast %75 : vector<8xf32> to vector<8x1xf32>
    %77 = vector.broadcast %76 : vector<8x1xf32> to vector<8x8xf32>
    %78 = arith.divf %74, %77 : vector<8x8xf32>
    %cst_49 = arith.constant dense<0.000000e+00> : vector<8x8xf32>
    %79 = tpu.matmul %78, %67, %cst_49 {dimension_numbers = #tpu.dot_dimension_numbers<[1], [0], [0], [1], [0, 0, 1, 1], [], []>} : vector<8x8xf32>, vector<8x8xf32>, vector<8x8xf32> -> vector<8x8xf32>
    %c0_50 = arith.constant 0 : index
    %c24_51 = arith.constant 24 : index
    %80 = vector.load %arg26[%c0_50, %c24_51] : memref<16x32xf32, #tpu.memory_space<vmem>>, vector<8x8xf32>
    tpu.vector_store %arg26[%c0_50, %c24_51], %79 {strides = array<i32>} : memref<16x32xf32, #tpu.memory_space<vmem>>, vector<8x8xf32>,
    %c8_52 = arith.constant 8 : index
    %c0_53 = arith.constant 0 : index
    %81 = vector.load %arg2[%c8_52, %c0_53] : memref<16x8xf32, #tpu.memory_space<vmem>>, vector<8x8xf32>
    %c8_54 = arith.constant 8 : index
    %c0_55 = arith.constant 0 : index
    %82 = vector.load %arg25[%c8_54, %c0_55] : memref<16x96xf32, #tpu.memory_space<vmem>>, vector<8x8xf32>
    %cst_56 = arith.constant 0.353553385 : f32
    %83 = vector.broadcast %cst_56 : f32 to vector<8x8xf32>
    %84 = arith.mulf %82, %83 : vector<8x8xf32>
    %c8_57 = arith.constant 8 : index
    %c32_58 = arith.constant 32 : index
    %85 = vector.load %arg25[%c8_57, %c32_58] : memref<16x96xf32, #tpu.memory_space<vmem>>, vector<8x8xf32>
    %c8_59 = arith.constant 8 : index
    %c64_60 = arith.constant 64 : index
    %86 = vector.load %arg25[%c8_59, %c64_60] : memref<16x96xf32, #tpu.memory_space<vmem>>, vector<8x8xf32>
    %cst_61 = arith.constant dense<0.000000e+00> : vector<8x8xf32>
    %87 = tpu.matmul %84, %85, %cst_61 {dimension_numbers = #tpu.dot_dimension_numbers<[1], [1], [0], [0], [0, 0, 1, 0], [], []>} : vector<8x8xf32>, vector<8x8xf32>, vector<8x8xf32> -> vector<8x8xf32>
    %88 = arith.addf %87, %81 : vector<8x8xf32>
    %cst_62 = arith.constant dense<0xFF800000> : vector<8xf32>
    %89 = vector.multi_reduction <maximumf>, %88, %cst_62 [1] : vector<8x8xf32> to vector<8xf32>
    %90 = vector.shape_cast %89 : vector<8xf32> to vector<8x1xf32>
    %91 = vector.broadcast %90 : vector<8x1xf32> to vector<8x8xf32>
    %92 = arith.subf %88, %91 : vector<8x8xf32>
    %93 = math.exp %92 : vector<8x8xf32>
    %cst_63 = arith.constant dense<0.000000e+00> : vector<8xf32>
    %94 = vector.multi_reduction <add>, %93, %cst_63 [1] : vector<8x8xf32> to vector<8xf32>
    %95 = vector.shape_cast %94 : vector<8xf32> to vector<8x1xf32>
    %96 = vector.broadcast %95 : vector<8x1xf32> to vector<8x8xf32>
    %97 = arith.divf %93, %96 : vector<8x8xf32>
    %cst_64 = arith.constant dense<0.000000e+00> : vector<8x8xf32>
    %98 = tpu.matmul %97, %86, %cst_64 {dimension_numbers = #tpu.dot_dimension_numbers<[1], [0], [0], [1], [0, 0, 1, 1], [], []>} : vector<8x8xf32>, vector<8x8xf32>, vector<8x8xf32> -> vector<8x8xf32>
    %c8_65 = arith.constant 8 : index
    %c0_66 = arith.constant 0 : index
    %99 = vector.load %arg26[%c8_65, %c0_66] : memref<16x32xf32, #tpu.memory_space<vmem>>, vector<8x8xf32>
    tpu.vector_store %arg26[%c8_65, %c0_66], %98 {strides = array<i32>} : memref<16x32xf32, #tpu.memory_space<vmem>>, vector<8x8xf32>,
    %c8_67 = arith.constant 8 : index
    %c8_68 = arith.constant 8 : index
    %100 = vector.load %arg25[%c8_67, %c8_68] : memref<16x96xf32, #tpu.memory_space<vmem>>, vector<8x8xf32>
    %cst_69 = arith.constant 0.353553385 : f32
    %101 = vector.broadcast %cst_69 : f32 to vector<8x8xf32>
    %102 = arith.mulf %100, %101 : vector<8x8xf32>
    %c8_70 = arith.constant 8 : index
    %c40_71 = arith.constant 40 : index
    %103 = vector.load %arg25[%c8_70, %c40_71] : memref<16x96xf32, #tpu.memory_space<vmem>>, vector<8x8xf32>
    %c8_72 = arith.constant 8 : index
    %c72_73 = arith.constant 72 : index
    %104 = vector.load %arg25[%c8_72, %c72_73] : memref<16x96xf32, #tpu.memory_space<vmem>>, vector<8x8xf32>
    %cst_74 = arith.constant dense<0.000000e+00> : vector<8x8xf32>
    %105 = tpu.matmul %102, %103, %cst_74 {dimension_numbers = #tpu.dot_dimension_numbers<[1], [1], [0], [0], [0, 0, 1, 0], [], []>} : vector<8x8xf32>, vector<8x8xf32>, vector<8x8xf32> -> vector<8x8xf32>
    %106 = arith.addf %105, %81 : vector<8x8xf32>
    %cst_75 = arith.constant dense<0xFF800000> : vector<8xf32>
    %107 = vector.multi_reduction <maximumf>, %106, %cst_75 [1] : vector<8x8xf32> to vector<8xf32>
    %108 = vector.shape_cast %107 : vector<8xf32> to vector<8x1xf32>
    %109 = vector.broadcast %108 : vector<8x1xf32> to vector<8x8xf32>
    %110 = arith.subf %106, %109 : vector<8x8xf32>
    %111 = math.exp %110 : vector<8x8xf32>
    %cst_76 = arith.constant dense<0.000000e+00> : vector<8xf32>
    %112 = vector.multi_reduction <add>, %111, %cst_76 [1] : vector<8x8xf32> to vector<8xf32>
    %113 = vector.shape_cast %112 : vector<8xf32> to vector<8x1xf32>
    %114 = vector.broadcast %113 : vector<8x1xf32> to vector<8x8xf32>
    %115 = arith.divf %111, %114 : vector<8x8xf32>
    %cst_77 = arith.constant dense<0.000000e+00> : vector<8x8xf32>
    %116 = tpu.matmul %115, %104, %cst_77 {dimension_numbers = #tpu.dot_dimension_numbers<[1], [0], [0], [1], [0, 0, 1, 1], [], []>} : vector<8x8xf32>, vector<8x8xf32>, vector<8x8xf32> -> vector<8x8xf32>
    %c8_78 = arith.constant 8 : index
    %c8_79 = arith.constant 8 : index
    %117 = vector.load %arg26[%c8_78, %c8_79] : memref<16x32xf32, #tpu.memory_space<vmem>>, vector<8x8xf32>
    tpu.vector_store %arg26[%c8_78, %c8_79], %116 {strides = array<i32>} : memref<16x32xf32, #tpu.memory_space<vmem>>, vector<8x8xf32>,
    %c8_80 = arith.constant 8 : index
    %c16_81 = arith.constant 16 : index
    %118 = vector.load %arg25[%c8_80, %c16_81] : memref<16x96xf32, #tpu.memory_space<vmem>>, vector<8x8xf32>
    %cst_82 = arith.constant 0.353553385 : f32
    %119 = vector.broadcast %cst_82 : f32 to vector<8x8xf32>
    %120 = arith.mulf %118, %119 : vector<8x8xf32>
    %c8_83 = arith.constant 8 : index
    %c48_84 = arith.constant 48 : index
    %121 = vector.load %arg25[%c8_83, %c48_84] : memref<16x96xf32, #tpu.memory_space<vmem>>, vector<8x8xf32>
    %c8_85 = arith.constant 8 : index
    %c80_86 = arith.constant 80 : index
    %122 = vector.load %arg25[%c8_85, %c80_86] : memref<16x96xf32, #tpu.memory_space<vmem>>, vector<8x8xf32>
    %cst_87 = arith.constant dense<0.000000e+00> : vector<8x8xf32>
    %123 = tpu.matmul %120, %121, %cst_87 {dimension_numbers = #tpu.dot_dimension_numbers<[1], [1], [0], [0], [0, 0, 1, 0], [], []>} : vector<8x8xf32>, vector<8x8xf32>, vector<8x8xf32> -> vector<8x8xf32>
    %124 = arith.addf %123, %81 : vector<8x8xf32>
    %cst_88 = arith.constant dense<0xFF800000> : vector<8xf32>
    %125 = vector.multi_reduction <maximumf>, %124, %cst_88 [1] : vector<8x8xf32> to vector<8xf32>
    %126 = vector.shape_cast %125 : vector<8xf32> to vector<8x1xf32>
    %127 = vector.broadcast %126 : vector<8x1xf32> to vector<8x8xf32>
    %128 = arith.subf %124, %127 : vector<8x8xf32>
    %129 = math.exp %128 : vector<8x8xf32>
    %cst_89 = arith.constant dense<0.000000e+00> : vector<8xf32>
    %130 = vector.multi_reduction <add>, %129, %cst_89 [1] : vector<8x8xf32> to vector<8xf32>
    %131 = vector.shape_cast %130 : vector<8xf32> to vector<8x1xf32>
    %132 = vector.broadcast %131 : vector<8x1xf32> to vector<8x8xf32>
    %133 = arith.divf %129, %132 : vector<8x8xf32>
    %cst_90 = arith.constant dense<0.000000e+00> : vector<8x8xf32>
    %134 = tpu.matmul %133, %122, %cst_90 {dimension_numbers = #tpu.dot_dimension_numbers<[1], [0], [0], [1], [0, 0, 1, 1], [], []>} : vector<8x8xf32>, vector<8x8xf32>, vector<8x8xf32> -> vector<8x8xf32>
    %c8_91 = arith.constant 8 : index
    %c16_92 = arith.constant 16 : index
    %135 = vector.load %arg26[%c8_91, %c16_92] : memref<16x32xf32, #tpu.memory_space<vmem>>, vector<8x8xf32>
    tpu.vector_store %arg26[%c8_91, %c16_92], %134 {strides = array<i32>} : memref<16x32xf32, #tpu.memory_space<vmem>>, vector<8x8xf32>,
    %c8_93 = arith.constant 8 : index
    %c24_94 = arith.constant 24 : index
    %136 = vector.load %arg25[%c8_93, %c24_94] : memref<16x96xf32, #tpu.memory_space<vmem>>, vector<8x8xf32>
    %cst_95 = arith.constant 0.353553385 : f32
    %137 = vector.broadcast %cst_95 : f32 to vector<8x8xf32>
    %138 = arith.mulf %136, %137 : vector<8x8xf32>
    %c8_96 = arith.constant 8 : index
    %c56_97 = arith.constant 56 : index
    %139 = vector.load %arg25[%c8_96, %c56_97] : memref<16x96xf32, #tpu.memory_space<vmem>>, vector<8x8xf32>
    %c8_98 = arith.constant 8 : index
    %c88_99 = arith.constant 88 : index
    %140 = vector.load %arg25[%c8_98, %c88_99] : memref<16x96xf32, #tpu.memory_space<vmem>>, vector<8x8xf32>
    %cst_100 = arith.constant dense<0.000000e+00> : vector<8x8xf32>
    %141 = tpu.matmul %138, %139, %cst_100 {dimension_numbers = #tpu.dot_dimension_numbers<[1], [1], [0], [0], [0, 0, 1, 0], [], []>} : vector<8x8xf32>, vector<8x8xf32>, vector<8x8xf32> -> vector<8x8xf32>
    %142 = arith.addf %141, %81 : vector<8x8xf32>
    %cst_101 = arith.constant dense<0xFF800000> : vector<8xf32>
    %143 = vector.multi_reduction <maximumf>, %142, %cst_101 [1] : vector<8x8xf32> to vector<8xf32>
    %144 = vector.shape_cast %143 : vector<8xf32> to vector<8x1xf32>
    %145 = vector.broadcast %144 : vector<8x1xf32> to vector<8x8xf32>
    %146 = arith.subf %142, %145 : vector<8x8xf32>
    %147 = math.exp %146 : vector<8x8xf32>
    %cst_102 = arith.constant dense<0.000000e+00> : vector<8xf32>
    %148 = vector.multi_reduction <add>, %147, %cst_102 [1] : vector<8x8xf32> to vector<8xf32>
    %149 = vector.shape_cast %148 : vector<8xf32> to vector<8x1xf32>
    %150 = vector.broadcast %149 : vector<8x1xf32> to vector<8x8xf32>
    %151 = arith.divf %147, %150 : vector<8x8xf32>
    %cst_103 = arith.constant dense<0.000000e+00> : vector<8x8xf32>
    %152 = tpu.matmul %151, %140, %cst_103 {dimension_numbers = #tpu.dot_dimension_numbers<[1], [0], [0], [1], [0, 0, 1, 1], [], []>} : vector<8x8xf32>, vector<8x8xf32>, vector<8x8xf32> -> vector<8x8xf32>
    %c8_104 = arith.constant 8 : index
    %c24_105 = arith.constant 24 : index
    %153 = vector.load %arg26[%c8_104, %c24_105] : memref<16x32xf32, #tpu.memory_space<vmem>>, vector<8x8xf32>
    tpu.vector_store %arg26[%c8_104, %c24_105], %152 {strides = array<i32>} : memref<16x32xf32, #tpu.memory_space<vmem>>, vector<8x8xf32>,
    %c0_106 = arith.constant 0 : index
    %c0_107 = arith.constant 0 : index
    %154 = vector.load %arg26[%c0_106, %c0_107] : memref<16x32xf32, #tpu.memory_space<vmem>>, vector<16x32xf32>
    %c0_108 = arith.constant 0 : index
    %c0_109 = arith.constant 0 : index
    %155 = vector.load %arg6[%c0_108, %c0_109] : memref<32x32xf32, #tpu.memory_space<vmem>>, vector<32x32xf32>
    %cst_110 = arith.constant dense<0.000000e+00> : vector<16x32xf32>
    %156 = tpu.matmul %154, %155, %cst_110 {dimension_numbers = #tpu.dot_dimension_numbers<[1], [0], [0], [1], [0, 0, 1, 1], [], []>} : vector<16x32xf32>, vector<32x32xf32>, vector<16x32xf32> -> vector<16x32xf32>
    %c0_111 = arith.constant 0 : index
    %c0_112 = arith.constant 0 : index
    %157 = vector.load %arg7[%c0_111, %c0_112] : memref<1x32xf32, #tpu.memory_space<vmem>>, vector<1x32xf32>
    %158 = vector.broadcast %157 : vector<1x32xf32> to vector<16x32xf32>
    %159 = arith.addf %156, %158 : vector<16x32xf32>
    %160 = arith.addf %0, %159 : vector<16x32xf32>
    %c0_113 = arith.constant 0 : index
    %c0_114 = arith.constant 0 : index
    %161 = vector.load %arg8[%c0_113, %c0_114] : memref<1x32xf32, #tpu.memory_space<vmem>>, vector<1x32xf32>
    %c0_115 = arith.constant 0 : index
    %c0_116 = arith.constant 0 : index
    %162 = vector.load %arg9[%c0_115, %c0_116] : memref<1x32xf32, #tpu.memory_space<vmem>>, vector<1x32xf32>
    %cst_117 = arith.constant dense<0.000000e+00> : vector<16xf32>
    %163 = vector.multi_reduction <add>, %160, %cst_117 [1] : vector<16x32xf32> to vector<16xf32>
    %164 = vector.shape_cast %163 : vector<16xf32> to vector<16x1xf32>
    %cst_118 = arith.constant 3.200000e+01 : f32
    %165 = vector.broadcast %cst_118 : f32 to vector<16x1xf32>
    %166 = arith.divf %164, %165 : vector<16x1xf32>
    %167 = vector.broadcast %166 : vector<16x1xf32> to vector<16x32xf32>
    %168 = arith.subf %160, %167 : vector<16x32xf32>
    %169 = arith.mulf %168, %168 : vector<16x32xf32>
    %cst_119 = arith.constant dense<0.000000e+00> : vector<16xf32>
    %170 = vector.multi_reduction <add>, %169, %cst_119 [1] : vector<16x32xf32> to vector<16xf32>
    %171 = vector.shape_cast %170 : vector<16xf32> to vector<16x1xf32>
    %cst_120 = arith.constant 3.200000e+01 : f32
    %172 = vector.broadcast %cst_120 : f32 to vector<16x1xf32>
    %173 = arith.divf %171, %172 : vector<16x1xf32>
    %174 = vector.broadcast %166 : vector<16x1xf32> to vector<16x32xf32>
    %175 = arith.subf %160, %174 : vector<16x32xf32>
    %cst_121 = arith.constant 9.99999974E-6 : f32
    %176 = vector.broadcast %cst_121 : f32 to vector<16x1xf32>
    %177 = arith.addf %173, %176 : vector<16x1xf32>
    %178 = math.rsqrt %177 : vector<16x1xf32>
    %179 = vector.broadcast %178 : vector<16x1xf32> to vector<16x32xf32>
    %180 = arith.mulf %175, %179 : vector<16x32xf32>
    %181 = vector.broadcast %161 : vector<1x32xf32> to vector<16x32xf32>
    %182 = arith.mulf %180, %181 : vector<16x32xf32>
    %183 = vector.broadcast %162 : vector<1x32xf32> to vector<16x32xf32>
    %184 = arith.addf %182, %183 : vector<16x32xf32>
    %c0_122 = arith.constant 0 : index
    %c0_123 = arith.constant 0 : index
    %185 = vector.load %arg10[%c0_122, %c0_123] : memref<32x32xf32, #tpu.memory_space<vmem>>, vector<32x32xf32>
    %cst_124 = arith.constant dense<0.000000e+00> : vector<16x32xf32>
    %186 = tpu.matmul %184, %185, %cst_124 {dimension_numbers = #tpu.dot_dimension_numbers<[1], [0], [0], [1], [0, 0, 1, 1], [], []>} : vector<16x32xf32>, vector<32x32xf32>, vector<16x32xf32> -> vector<16x32xf32>
    %c0_125 = arith.constant 0 : index
    %c0_126 = arith.constant 0 : index
    %187 = vector.load %arg11[%c0_125, %c0_126] : memref<1x32xf32, #tpu.memory_space<vmem>>, vector<1x32xf32>
    %188 = vector.broadcast %187 : vector<1x32xf32> to vector<16x32xf32>
    %189 = arith.addf %186, %188 : vector<16x32xf32>
    %c0_127 = arith.constant 0 : index
    %c0_128 = arith.constant 0 : index
    %190 = vector.load %arg27[%c0_127, %c0_128] : memref<16x32xf32, #tpu.memory_space<vmem>>, vector<16x32xf32>
    tpu.vector_store %arg27[%c0_127, %c0_128], %189 {strides = array<i32>} : memref<16x32xf32, #tpu.memory_space<vmem>>, vector<16x32xf32>,
    %c0_129 = arith.constant 0 : index
    %c0_130 = arith.constant 0 : index
    %191 = vector.load %arg12[%c0_129, %c0_130] : memref<32x64xf32, #tpu.memory_space<vmem>>, vector<32x64xf32>
    %cst_131 = arith.constant dense<0.000000e+00> : vector<16x64xf32>
    %192 = tpu.matmul %1, %191, %cst_131 {dimension_numbers = #tpu.dot_dimension_numbers<[1], [0], [0], [1], [0, 0, 1, 1], [], []>} : vector<16x32xf32>, vector<32x64xf32>, vector<16x64xf32> -> vector<16x64xf32>
    %c0_132 = arith.constant 0 : index
    %c0_133 = arith.constant 0 : index
    %193 = vector.load %arg13[%c0_132, %c0_133] : memref<1x64xf32, #tpu.memory_space<vmem>>, vector<1x64xf32>
    %194 = vector.broadcast %193 : vector<1x64xf32> to vector<16x64xf32>
    %195 = arith.addf %192, %194 : vector<16x64xf32>
    %c0_134 = arith.constant 0 : index
    %c0_135 = arith.constant 0 : index
    %196 = vector.load %arg28[%c0_134, %c0_135] : memref<16x64xf32, #tpu.memory_space<vmem>>, vector<16x64xf32>
    tpu.vector_store %arg28[%c0_134, %c0_135], %195 {strides = array<i32>} : memref<16x64xf32, #tpu.memory_space<vmem>>, vector<16x64xf32>,
    %c0_136 = arith.constant 0 : index
    %c0_137 = arith.constant 0 : index
    %197 = vector.load %arg3[%c0_136, %c0_137] : memref<16x8xf32, #tpu.memory_space<vmem>>, vector<8x8xf32>
    %c0_138 = arith.constant 0 : index
    %c0_139 = arith.constant 0 : index
    %198 = vector.load %arg27[%c0_138, %c0_139] : memref<16x32xf32, #tpu.memory_space<vmem>>, vector<8x8xf32>
    %cst_140 = arith.constant 0.353553385 : f32
    %199 = vector.broadcast %cst_140 : f32 to vector<8x8xf32>
    %200 = arith.mulf %198, %199 : vector<8x8xf32>
    %c0_141 = arith.constant 0 : index
    %c0_142 = arith.constant 0 : index
    %201 = vector.load %arg28[%c0_141, %c0_142] : memref<16x64xf32, #tpu.memory_space<vmem>>, vector<8x8xf32>
    %c0_143 = arith.constant 0 : index
    %c32_144 = arith.constant 32 : index
    %202 = vector.load %arg28[%c0_143, %c32_144] : memref<16x64xf32, #tpu.memory_space<vmem>>, vector<8x8xf32>
    %cst_145 = arith.constant dense<0.000000e+00> : vector<8x8xf32>
    %203 = tpu.matmul %200, %201, %cst_145 {dimension_numbers = #tpu.dot_dimension_numbers<[1], [1], [0], [0], [0, 0, 1, 0], [], []>} : vector<8x8xf32>, vector<8x8xf32>, vector<8x8xf32> -> vector<8x8xf32>
    %204 = arith.addf %203, %197 : vector<8x8xf32>
    %cst_146 = arith.constant dense<0xFF800000> : vector<8xf32>
    %205 = vector.multi_reduction <maximumf>, %204, %cst_146 [1] : vector<8x8xf32> to vector<8xf32>
    %206 = vector.shape_cast %205 : vector<8xf32> to vector<8x1xf32>
    %207 = vector.broadcast %206 : vector<8x1xf32> to vector<8x8xf32>
    %208 = arith.subf %204, %207 : vector<8x8xf32>
    %209 = math.exp %208 : vector<8x8xf32>
    %cst_147 = arith.constant dense<0.000000e+00> : vector<8xf32>
    %210 = vector.multi_reduction <add>, %209, %cst_147 [1] : vector<8x8xf32> to vector<8xf32>
    %211 = vector.shape_cast %210 : vector<8xf32> to vector<8x1xf32>
    %212 = vector.broadcast %211 : vector<8x1xf32> to vector<8x8xf32>
    %213 = arith.divf %209, %212 : vector<8x8xf32>
    %cst_148 = arith.constant dense<0.000000e+00> : vector<8x8xf32>
    %214 = tpu.matmul %213, %202, %cst_148 {dimension_numbers = #tpu.dot_dimension_numbers<[1], [0], [0], [1], [0, 0, 1, 1], [], []>} : vector<8x8xf32>, vector<8x8xf32>, vector<8x8xf32> -> vector<8x8xf32>
    %c0_149 = arith.constant 0 : index
    %c0_150 = arith.constant 0 : index
    %215 = vector.load %arg26[%c0_149, %c0_150] : memref<16x32xf32, #tpu.memory_space<vmem>>, vector<8x8xf32>
    tpu.vector_store %arg26[%c0_149, %c0_150], %214 {strides = array<i32>} : memref<16x32xf32, #tpu.memory_space<vmem>>, vector<8x8xf32>,
    %c0_151 = arith.constant 0 : index
    %c8_152 = arith.constant 8 : index
    %216 = vector.load %arg27[%c0_151, %c8_152] : memref<16x32xf32, #tpu.memory_space<vmem>>, vector<8x8xf32>
    %cst_153 = arith.constant 0.353553385 : f32
    %217 = vector.broadcast %cst_153 : f32 to vector<8x8xf32>
    %218 = arith.mulf %216, %217 : vector<8x8xf32>
    %c0_154 = arith.constant 0 : index
    %c8_155 = arith.constant 8 : index
    %219 = vector.load %arg28[%c0_154, %c8_155] : memref<16x64xf32, #tpu.memory_space<vmem>>, vector<8x8xf32>
    %c0_156 = arith.constant 0 : index
    %c40_157 = arith.constant 40 : index
    %220 = vector.load %arg28[%c0_156, %c40_157] : memref<16x64xf32, #tpu.memory_space<vmem>>, vector<8x8xf32>
    %cst_158 = arith.constant dense<0.000000e+00> : vector<8x8xf32>
    %221 = tpu.matmul %218, %219, %cst_158 {dimension_numbers = #tpu.dot_dimension_numbers<[1], [1], [0], [0], [0, 0, 1, 0], [], []>} : vector<8x8xf32>, vector<8x8xf32>, vector<8x8xf32> -> vector<8x8xf32>
    %222 = arith.addf %221, %197 : vector<8x8xf32>
    %cst_159 = arith.constant dense<0xFF800000> : vector<8xf32>
    %223 = vector.multi_reduction <maximumf>, %222, %cst_159 [1] : vector<8x8xf32> to vector<8xf32>
    %224 = vector.shape_cast %223 : vector<8xf32> to vector<8x1xf32>
    %225 = vector.broadcast %224 : vector<8x1xf32> to vector<8x8xf32>
    %226 = arith.subf %222, %225 : vector<8x8xf32>
    %227 = math.exp %226 : vector<8x8xf32>
    %cst_160 = arith.constant dense<0.000000e+00> : vector<8xf32>
    %228 = vector.multi_reduction <add>, %227, %cst_160 [1] : vector<8x8xf32> to vector<8xf32>
    %229 = vector.shape_cast %228 : vector<8xf32> to vector<8x1xf32>
    %230 = vector.broadcast %229 : vector<8x1xf32> to vector<8x8xf32>
    %231 = arith.divf %227, %230 : vector<8x8xf32>
    %cst_161 = arith.constant dense<0.000000e+00> : vector<8x8xf32>
    %232 = tpu.matmul %231, %220, %cst_161 {dimension_numbers = #tpu.dot_dimension_numbers<[1], [0], [0], [1], [0, 0, 1, 1], [], []>} : vector<8x8xf32>, vector<8x8xf32>, vector<8x8xf32> -> vector<8x8xf32>
    %c0_162 = arith.constant 0 : index
    %c8_163 = arith.constant 8 : index
    %233 = vector.load %arg26[%c0_162, %c8_163] : memref<16x32xf32, #tpu.memory_space<vmem>>, vector<8x8xf32>
    tpu.vector_store %arg26[%c0_162, %c8_163], %232 {strides = array<i32>} : memref<16x32xf32, #tpu.memory_space<vmem>>, vector<8x8xf32>,
    %c0_164 = arith.constant 0 : index
    %c16_165 = arith.constant 16 : index
    %234 = vector.load %arg27[%c0_164, %c16_165] : memref<16x32xf32, #tpu.memory_space<vmem>>, vector<8x8xf32>
    %cst_166 = arith.constant 0.353553385 : f32
    %235 = vector.broadcast %cst_166 : f32 to vector<8x8xf32>
    %236 = arith.mulf %234, %235 : vector<8x8xf32>
    %c0_167 = arith.constant 0 : index
    %c16_168 = arith.constant 16 : index
    %237 = vector.load %arg28[%c0_167, %c16_168] : memref<16x64xf32, #tpu.memory_space<vmem>>, vector<8x8xf32>
    %c0_169 = arith.constant 0 : index
    %c48_170 = arith.constant 48 : index
    %238 = vector.load %arg28[%c0_169, %c48_170] : memref<16x64xf32, #tpu.memory_space<vmem>>, vector<8x8xf32>
    %cst_171 = arith.constant dense<0.000000e+00> : vector<8x8xf32>
    %239 = tpu.matmul %236, %237, %cst_171 {dimension_numbers = #tpu.dot_dimension_numbers<[1], [1], [0], [0], [0, 0, 1, 0], [], []>} : vector<8x8xf32>, vector<8x8xf32>, vector<8x8xf32> -> vector<8x8xf32>
    %240 = arith.addf %239, %197 : vector<8x8xf32>
    %cst_172 = arith.constant dense<0xFF800000> : vector<8xf32>
    %241 = vector.multi_reduction <maximumf>, %240, %cst_172 [1] : vector<8x8xf32> to vector<8xf32>
    %242 = vector.shape_cast %241 : vector<8xf32> to vector<8x1xf32>
    %243 = vector.broadcast %242 : vector<8x1xf32> to vector<8x8xf32>
    %244 = arith.subf %240, %243 : vector<8x8xf32>
    %245 = math.exp %244 : vector<8x8xf32>
    %cst_173 = arith.constant dense<0.000000e+00> : vector<8xf32>
    %246 = vector.multi_reduction <add>, %245, %cst_173 [1] : vector<8x8xf32> to vector<8xf32>
    %247 = vector.shape_cast %246 : vector<8xf32> to vector<8x1xf32>
    %248 = vector.broadcast %247 : vector<8x1xf32> to vector<8x8xf32>
    %249 = arith.divf %245, %248 : vector<8x8xf32>
    %cst_174 = arith.constant dense<0.000000e+00> : vector<8x8xf32>
    %250 = tpu.matmul %249, %238, %cst_174 {dimension_numbers = #tpu.dot_dimension_numbers<[1], [0], [0], [1], [0, 0, 1, 1], [], []>} : vector<8x8xf32>, vector<8x8xf32>, vector<8x8xf32> -> vector<8x8xf32>
    %c0_175 = arith.constant 0 : index
    %c16_176 = arith.constant 16 : index
    %251 = vector.load %arg26[%c0_175, %c16_176] : memref<16x32xf32, #tpu.memory_space<vmem>>, vector<8x8xf32>
    tpu.vector_store %arg26[%c0_175, %c16_176], %250 {strides = array<i32>} : memref<16x32xf32, #tpu.memory_space<vmem>>, vector<8x8xf32>,
    %c0_177 = arith.constant 0 : index
    %c24_178 = arith.constant 24 : index
    %252 = vector.load %arg27[%c0_177, %c24_178] : memref<16x32xf32, #tpu.memory_space<vmem>>, vector<8x8xf32>
    %cst_179 = arith.constant 0.353553385 : f32
    %253 = vector.broadcast %cst_179 : f32 to vector<8x8xf32>
    %254 = arith.mulf %252, %253 : vector<8x8xf32>
    %c0_180 = arith.constant 0 : index
    %c24_181 = arith.constant 24 : index
    %255 = vector.load %arg28[%c0_180, %c24_181] : memref<16x64xf32, #tpu.memory_space<vmem>>, vector<8x8xf32>
    %c0_182 = arith.constant 0 : index
    %c56_183 = arith.constant 56 : index
    %256 = vector.load %arg28[%c0_182, %c56_183] : memref<16x64xf32, #tpu.memory_space<vmem>>, vector<8x8xf32>
    %cst_184 = arith.constant dense<0.000000e+00> : vector<8x8xf32>
    %257 = tpu.matmul %254, %255, %cst_184 {dimension_numbers = #tpu.dot_dimension_numbers<[1], [1], [0], [0], [0, 0, 1, 0], [], []>} : vector<8x8xf32>, vector<8x8xf32>, vector<8x8xf32> -> vector<8x8xf32>
    %258 = arith.addf %257, %197 : vector<8x8xf32>
    %cst_185 = arith.constant dense<0xFF800000> : vector<8xf32>
    %259 = vector.multi_reduction <maximumf>, %258, %cst_185 [1] : vector<8x8xf32> to vector<8xf32>
    %260 = vector.shape_cast %259 : vector<8xf32> to vector<8x1xf32>
    %261 = vector.broadcast %260 : vector<8x1xf32> to vector<8x8xf32>
    %262 = arith.subf %258, %261 : vector<8x8xf32>
    %263 = math.exp %262 : vector<8x8xf32>
    %cst_186 = arith.constant dense<0.000000e+00> : vector<8xf32>
    %264 = vector.multi_reduction <add>, %263, %cst_186 [1] : vector<8x8xf32> to vector<8xf32>
    %265 = vector.shape_cast %264 : vector<8xf32> to vector<8x1xf32>
    %266 = vector.broadcast %265 : vector<8x1xf32> to vector<8x8xf32>
    %267 = arith.divf %263, %266 : vector<8x8xf32>
    %cst_187 = arith.constant dense<0.000000e+00> : vector<8x8xf32>
    %268 = tpu.matmul %267, %256, %cst_187 {dimension_numbers = #tpu.dot_dimension_numbers<[1], [0], [0], [1], [0, 0, 1, 1], [], []>} : vector<8x8xf32>, vector<8x8xf32>, vector<8x8xf32> -> vector<8x8xf32>
    %c0_188 = arith.constant 0 : index
    %c24_189 = arith.constant 24 : index
    %269 = vector.load %arg26[%c0_188, %c24_189] : memref<16x32xf32, #tpu.memory_space<vmem>>, vector<8x8xf32>
    tpu.vector_store %arg26[%c0_188, %c24_189], %268 {strides = array<i32>} : memref<16x32xf32, #tpu.memory_space<vmem>>, vector<8x8xf32>,
    %c8_190 = arith.constant 8 : index
    %c0_191 = arith.constant 0 : index
    %270 = vector.load %arg3[%c8_190, %c0_191] : memref<16x8xf32, #tpu.memory_space<vmem>>, vector<8x8xf32>
    %c8_192 = arith.constant 8 : index
    %c0_193 = arith.constant 0 : index
    %271 = vector.load %arg27[%c8_192, %c0_193] : memref<16x32xf32, #tpu.memory_space<vmem>>, vector<8x8xf32>
    %cst_194 = arith.constant 0.353553385 : f32
    %272 = vector.broadcast %cst_194 : f32 to vector<8x8xf32>
    %273 = arith.mulf %271, %272 : vector<8x8xf32>
    %c8_195 = arith.constant 8 : index
    %c0_196 = arith.constant 0 : index
    %274 = vector.load %arg28[%c8_195, %c0_196] : memref<16x64xf32, #tpu.memory_space<vmem>>, vector<8x8xf32>
    %c8_197 = arith.constant 8 : index
    %c32_198 = arith.constant 32 : index
    %275 = vector.load %arg28[%c8_197, %c32_198] : memref<16x64xf32, #tpu.memory_space<vmem>>, vector<8x8xf32>
    %cst_199 = arith.constant dense<0.000000e+00> : vector<8x8xf32>
    %276 = tpu.matmul %273, %274, %cst_199 {dimension_numbers = #tpu.dot_dimension_numbers<[1], [1], [0], [0], [0, 0, 1, 0], [], []>} : vector<8x8xf32>, vector<8x8xf32>, vector<8x8xf32> -> vector<8x8xf32>
    %277 = arith.addf %276, %270 : vector<8x8xf32>
    %cst_200 = arith.constant dense<0xFF800000> : vector<8xf32>
    %278 = vector.multi_reduction <maximumf>, %277, %cst_200 [1] : vector<8x8xf32> to vector<8xf32>
    %279 = vector.shape_cast %278 : vector<8xf32> to vector<8x1xf32>
    %280 = vector.broadcast %279 : vector<8x1xf32> to vector<8x8xf32>
    %281 = arith.subf %277, %280 : vector<8x8xf32>
    %282 = math.exp %281 : vector<8x8xf32>
    %cst_201 = arith.constant dense<0.000000e+00> : vector<8xf32>
    %283 = vector.multi_reduction <add>, %282, %cst_201 [1] : vector<8x8xf32> to vector<8xf32>
    %284 = vector.shape_cast %283 : vector<8xf32> to vector<8x1xf32>
    %285 = vector.broadcast %284 : vector<8x1xf32> to vector<8x8xf32>
    %286 = arith.divf %282, %285 : vector<8x8xf32>
    %cst_202 = arith.constant dense<0.000000e+00> : vector<8x8xf32>
    %287 = tpu.matmul %286, %275, %cst_202 {dimension_numbers = #tpu.dot_dimension_numbers<[1], [0], [0], [1], [0, 0, 1, 1], [], []>} : vector<8x8xf32>, vector<8x8xf32>, vector<8x8xf32> -> vector<8x8xf32>
    %c8_203 = arith.constant 8 : index
    %c0_204 = arith.constant 0 : index
    %288 = vector.load %arg26[%c8_203, %c0_204] : memref<16x32xf32, #tpu.memory_space<vmem>>, vector<8x8xf32>
    tpu.vector_store %arg26[%c8_203, %c0_204], %287 {strides = array<i32>} : memref<16x32xf32, #tpu.memory_space<vmem>>, vector<8x8xf32>,
    %c8_205 = arith.constant 8 : index
    %c8_206 = arith.constant 8 : index
    %289 = vector.load %arg27[%c8_205, %c8_206] : memref<16x32xf32, #tpu.memory_space<vmem>>, vector<8x8xf32>
    %cst_207 = arith.constant 0.353553385 : f32
    %290 = vector.broadcast %cst_207 : f32 to vector<8x8xf32>
    %291 = arith.mulf %289, %290 : vector<8x8xf32>
    %c8_208 = arith.constant 8 : index
    %c8_209 = arith.constant 8 : index
    %292 = vector.load %arg28[%c8_208, %c8_209] : memref<16x64xf32, #tpu.memory_space<vmem>>, vector<8x8xf32>
    %c8_210 = arith.constant 8 : index
    %c40_211 = arith.constant 40 : index
    %293 = vector.load %arg28[%c8_210, %c40_211] : memref<16x64xf32, #tpu.memory_space<vmem>>, vector<8x8xf32>
    %cst_212 = arith.constant dense<0.000000e+00> : vector<8x8xf32>
    %294 = tpu.matmul %291, %292, %cst_212 {dimension_numbers = #tpu.dot_dimension_numbers<[1], [1], [0], [0], [0, 0, 1, 0], [], []>} : vector<8x8xf32>, vector<8x8xf32>, vector<8x8xf32> -> vector<8x8xf32>
    %295 = arith.addf %294, %270 : vector<8x8xf32>
    %cst_213 = arith.constant dense<0xFF800000> : vector<8xf32>
    %296 = vector.multi_reduction <maximumf>, %295, %cst_213 [1] : vector<8x8xf32> to vector<8xf32>
    %297 = vector.shape_cast %296 : vector<8xf32> to vector<8x1xf32>
    %298 = vector.broadcast %297 : vector<8x1xf32> to vector<8x8xf32>
    %299 = arith.subf %295, %298 : vector<8x8xf32>
    %300 = math.exp %299 : vector<8x8xf32>
    %cst_214 = arith.constant dense<0.000000e+00> : vector<8xf32>
    %301 = vector.multi_reduction <add>, %300, %cst_214 [1] : vector<8x8xf32> to vector<8xf32>
    %302 = vector.shape_cast %301 : vector<8xf32> to vector<8x1xf32>
    %303 = vector.broadcast %302 : vector<8x1xf32> to vector<8x8xf32>
    %304 = arith.divf %300, %303 : vector<8x8xf32>
    %cst_215 = arith.constant dense<0.000000e+00> : vector<8x8xf32>
    %305 = tpu.matmul %304, %293, %cst_215 {dimension_numbers = #tpu.dot_dimension_numbers<[1], [0], [0], [1], [0, 0, 1, 1], [], []>} : vector<8x8xf32>, vector<8x8xf32>, vector<8x8xf32> -> vector<8x8xf32>
    %c8_216 = arith.constant 8 : index
    %c8_217 = arith.constant 8 : index
    %306 = vector.load %arg26[%c8_216, %c8_217] : memref<16x32xf32, #tpu.memory_space<vmem>>, vector<8x8xf32>
    tpu.vector_store %arg26[%c8_216, %c8_217], %305 {strides = array<i32>} : memref<16x32xf32, #tpu.memory_space<vmem>>, vector<8x8xf32>,
    %c8_218 = arith.constant 8 : index
    %c16_219 = arith.constant 16 : index
    %307 = vector.load %arg27[%c8_218, %c16_219] : memref<16x32xf32, #tpu.memory_space<vmem>>, vector<8x8xf32>
    %cst_220 = arith.constant 0.353553385 : f32
    %308 = vector.broadcast %cst_220 : f32 to vector<8x8xf32>
    %309 = arith.mulf %307, %308 : vector<8x8xf32>
    %c8_221 = arith.constant 8 : index
    %c16_222 = arith.constant 16 : index
    %310 = vector.load %arg28[%c8_221, %c16_222] : memref<16x64xf32, #tpu.memory_space<vmem>>, vector<8x8xf32>
    %c8_223 = arith.constant 8 : index
    %c48_224 = arith.constant 48 : index
    %311 = vector.load %arg28[%c8_223, %c48_224] : memref<16x64xf32, #tpu.memory_space<vmem>>, vector<8x8xf32>
    %cst_225 = arith.constant dense<0.000000e+00> : vector<8x8xf32>
    %312 = tpu.matmul %309, %310, %cst_225 {dimension_numbers = #tpu.dot_dimension_numbers<[1], [1], [0], [0], [0, 0, 1, 0], [], []>} : vector<8x8xf32>, vector<8x8xf32>, vector<8x8xf32> -> vector<8x8xf32>
    %313 = arith.addf %312, %270 : vector<8x8xf32>
    %cst_226 = arith.constant dense<0xFF800000> : vector<8xf32>
    %314 = vector.multi_reduction <maximumf>, %313, %cst_226 [1] : vector<8x8xf32> to vector<8xf32>
    %315 = vector.shape_cast %314 : vector<8xf32> to vector<8x1xf32>
    %316 = vector.broadcast %315 : vector<8x1xf32> to vector<8x8xf32>
    %317 = arith.subf %313, %316 : vector<8x8xf32>
    %318 = math.exp %317 : vector<8x8xf32>
    %cst_227 = arith.constant dense<0.000000e+00> : vector<8xf32>
    %319 = vector.multi_reduction <add>, %318, %cst_227 [1] : vector<8x8xf32> to vector<8xf32>
    %320 = vector.shape_cast %319 : vector<8xf32> to vector<8x1xf32>
    %321 = vector.broadcast %320 : vector<8x1xf32> to vector<8x8xf32>
    %322 = arith.divf %318, %321 : vector<8x8xf32>
    %cst_228 = arith.constant dense<0.000000e+00> : vector<8x8xf32>
    %323 = tpu.matmul %322, %311, %cst_228 {dimension_numbers = #tpu.dot_dimension_numbers<[1], [0], [0], [1], [0, 0, 1, 1], [], []>} : vector<8x8xf32>, vector<8x8xf32>, vector<8x8xf32> -> vector<8x8xf32>
    %c8_229 = arith.constant 8 : index
    %c16_230 = arith.constant 16 : index
    %324 = vector.load %arg26[%c8_229, %c16_230] : memref<16x32xf32, #tpu.memory_space<vmem>>, vector<8x8xf32>
    tpu.vector_store %arg26[%c8_229, %c16_230], %323 {strides = array<i32>} : memref<16x32xf32, #tpu.memory_space<vmem>>, vector<8x8xf32>,
    %c8_231 = arith.constant 8 : index
    %c24_232 = arith.constant 24 : index
    %325 = vector.load %arg27[%c8_231, %c24_232] : memref<16x32xf32, #tpu.memory_space<vmem>>, vector<8x8xf32>
    %cst_233 = arith.constant 0.353553385 : f32
    %326 = vector.broadcast %cst_233 : f32 to vector<8x8xf32>
    %327 = arith.mulf %325, %326 : vector<8x8xf32>
    %c8_234 = arith.constant 8 : index
    %c24_235 = arith.constant 24 : index
    %328 = vector.load %arg28[%c8_234, %c24_235] : memref<16x64xf32, #tpu.memory_space<vmem>>, vector<8x8xf32>
    %c8_236 = arith.constant 8 : index
    %c56_237 = arith.constant 56 : index
    %329 = vector.load %arg28[%c8_236, %c56_237] : memref<16x64xf32, #tpu.memory_space<vmem>>, vector<8x8xf32>
    %cst_238 = arith.constant dense<0.000000e+00> : vector<8x8xf32>
    %330 = tpu.matmul %327, %328, %cst_238 {dimension_numbers = #tpu.dot_dimension_numbers<[1], [1], [0], [0], [0, 0, 1, 0], [], []>} : vector<8x8xf32>, vector<8x8xf32>, vector<8x8xf32> -> vector<8x8xf32>
    %331 = arith.addf %330, %270 : vector<8x8xf32>
    %cst_239 = arith.constant dense<0xFF800000> : vector<8xf32>
    %332 = vector.multi_reduction <maximumf>, %331, %cst_239 [1] : vector<8x8xf32> to vector<8xf32>
    %333 = vector.shape_cast %332 : vector<8xf32> to vector<8x1xf32>
    %334 = vector.broadcast %333 : vector<8x1xf32> to vector<8x8xf32>
    %335 = arith.subf %331, %334 : vector<8x8xf32>
    %336 = math.exp %335 : vector<8x8xf32>
    %cst_240 = arith.constant dense<0.000000e+00> : vector<8xf32>
    %337 = vector.multi_reduction <add>, %336, %cst_240 [1] : vector<8x8xf32> to vector<8xf32>
    %338 = vector.shape_cast %337 : vector<8xf32> to vector<8x1xf32>
    %339 = vector.broadcast %338 : vector<8x1xf32> to vector<8x8xf32>
    %340 = arith.divf %336, %339 : vector<8x8xf32>
    %cst_241 = arith.constant dense<0.000000e+00> : vector<8x8xf32>
    %341 = tpu.matmul %340, %329, %cst_241 {dimension_numbers = #tpu.dot_dimension_numbers<[1], [0], [0], [1], [0, 0, 1, 1], [], []>} : vector<8x8xf32>, vector<8x8xf32>, vector<8x8xf32> -> vector<8x8xf32>
    %c8_242 = arith.constant 8 : index
    %c24_243 = arith.constant 24 : index
    %342 = vector.load %arg26[%c8_242, %c24_243] : memref<16x32xf32, #tpu.memory_space<vmem>>, vector<8x8xf32>
    tpu.vector_store %arg26[%c8_242, %c24_243], %341 {strides = array<i32>} : memref<16x32xf32, #tpu.memory_space<vmem>>, vector<8x8xf32>,
    %c0_244 = arith.constant 0 : index
    %c0_245 = arith.constant 0 : index
    %343 = vector.load %arg26[%c0_244, %c0_245] : memref<16x32xf32, #tpu.memory_space<vmem>>, vector<16x32xf32>
    %c0_246 = arith.constant 0 : index
    %c0_247 = arith.constant 0 : index
    %344 = vector.load %arg14[%c0_246, %c0_247] : memref<32x32xf32, #tpu.memory_space<vmem>>, vector<32x32xf32>
    %cst_248 = arith.constant dense<0.000000e+00> : vector<16x32xf32>
    %345 = tpu.matmul %343, %344, %cst_248 {dimension_numbers = #tpu.dot_dimension_numbers<[1], [0], [0], [1], [0, 0, 1, 1], [], []>} : vector<16x32xf32>, vector<32x32xf32>, vector<16x32xf32> -> vector<16x32xf32>
    %c0_249 = arith.constant 0 : index
    %c0_250 = arith.constant 0 : index
    %346 = vector.load %arg15[%c0_249, %c0_250] : memref<1x32xf32, #tpu.memory_space<vmem>>, vector<1x32xf32>
    %347 = vector.broadcast %346 : vector<1x32xf32> to vector<16x32xf32>
    %348 = arith.addf %345, %347 : vector<16x32xf32>
    %349 = arith.addf %184, %348 : vector<16x32xf32>
    %c0_251 = arith.constant 0 : index
    %c0_252 = arith.constant 0 : index
    %350 = vector.load %arg16[%c0_251, %c0_252] : memref<1x32xf32, #tpu.memory_space<vmem>>, vector<1x32xf32>
    %c0_253 = arith.constant 0 : index
    %c0_254 = arith.constant 0 : index
    %351 = vector.load %arg17[%c0_253, %c0_254] : memref<1x32xf32, #tpu.memory_space<vmem>>, vector<1x32xf32>
    %cst_255 = arith.constant dense<0.000000e+00> : vector<16xf32>
    %352 = vector.multi_reduction <add>, %349, %cst_255 [1] : vector<16x32xf32> to vector<16xf32>
    %353 = vector.shape_cast %352 : vector<16xf32> to vector<16x1xf32>
    %cst_256 = arith.constant 3.200000e+01 : f32
    %354 = vector.broadcast %cst_256 : f32 to vector<16x1xf32>
    %355 = arith.divf %353, %354 : vector<16x1xf32>
    %356 = vector.broadcast %355 : vector<16x1xf32> to vector<16x32xf32>
    %357 = arith.subf %349, %356 : vector<16x32xf32>
    %358 = arith.mulf %357, %357 : vector<16x32xf32>
    %cst_257 = arith.constant dense<0.000000e+00> : vector<16xf32>
    %359 = vector.multi_reduction <add>, %358, %cst_257 [1] : vector<16x32xf32> to vector<16xf32>
    %360 = vector.shape_cast %359 : vector<16xf32> to vector<16x1xf32>
    %cst_258 = arith.constant 3.200000e+01 : f32
    %361 = vector.broadcast %cst_258 : f32 to vector<16x1xf32>
    %362 = arith.divf %360, %361 : vector<16x1xf32>
    %363 = vector.broadcast %355 : vector<16x1xf32> to vector<16x32xf32>
    %364 = arith.subf %349, %363 : vector<16x32xf32>
    %cst_259 = arith.constant 9.99999974E-6 : f32
    %365 = vector.broadcast %cst_259 : f32 to vector<16x1xf32>
    %366 = arith.addf %362, %365 : vector<16x1xf32>
    %367 = math.rsqrt %366 : vector<16x1xf32>
    %368 = vector.broadcast %367 : vector<16x1xf32> to vector<16x32xf32>
    %369 = arith.mulf %364, %368 : vector<16x32xf32>
    %370 = vector.broadcast %350 : vector<1x32xf32> to vector<16x32xf32>
    %371 = arith.mulf %369, %370 : vector<16x32xf32>
    %372 = vector.broadcast %351 : vector<1x32xf32> to vector<16x32xf32>
    %373 = arith.addf %371, %372 : vector<16x32xf32>
    %c0_260 = arith.constant 0 : index
    %c0_261 = arith.constant 0 : index
    %374 = vector.load %arg18[%c0_260, %c0_261] : memref<32x64xf32, #tpu.memory_space<vmem>>, vector<32x64xf32>
    %cst_262 = arith.constant dense<0.000000e+00> : vector<16x64xf32>
    %375 = tpu.matmul %373, %374, %cst_262 {dimension_numbers = #tpu.dot_dimension_numbers<[1], [0], [0], [1], [0, 0, 1, 1], [], []>} : vector<16x32xf32>, vector<32x64xf32>, vector<16x64xf32> -> vector<16x64xf32>
    %c0_263 = arith.constant 0 : index
    %c0_264 = arith.constant 0 : index
    %376 = vector.load %arg19[%c0_263, %c0_264] : memref<1x64xf32, #tpu.memory_space<vmem>>, vector<1x64xf32>
    %377 = vector.broadcast %376 : vector<1x64xf32> to vector<16x64xf32>
    %378 = arith.addf %375, %377 : vector<16x64xf32>
    %379 = arith.negf %378 : vector<16x64xf32>
    %380 = math.exp %379 : vector<16x64xf32>
    %cst_265 = arith.constant 1.000000e+00 : f32
    %381 = vector.broadcast %cst_265 : f32 to vector<16x64xf32>
    %382 = arith.addf %381, %380 : vector<16x64xf32>
    %383 = arith.divf %381, %382 : vector<16x64xf32>
    %384 = arith.mulf %378, %383 : vector<16x64xf32>
    %c0_266 = arith.constant 0 : index
    %c0_267 = arith.constant 0 : index
    %385 = vector.load %arg20[%c0_266, %c0_267] : memref<64x32xf32, #tpu.memory_space<vmem>>, vector<64x32xf32>
    %cst_268 = arith.constant dense<0.000000e+00> : vector<16x32xf32>
    %386 = tpu.matmul %384, %385, %cst_268 {dimension_numbers = #tpu.dot_dimension_numbers<[1], [0], [0], [1], [0, 0, 1, 1], [], []>} : vector<16x64xf32>, vector<64x32xf32>, vector<16x32xf32> -> vector<16x32xf32>
    %c0_269 = arith.constant 0 : index
    %c0_270 = arith.constant 0 : index
    %387 = vector.load %arg21[%c0_269, %c0_270] : memref<1x32xf32, #tpu.memory_space<vmem>>, vector<1x32xf32>
    %388 = vector.broadcast %387 : vector<1x32xf32> to vector<16x32xf32>
    %389 = arith.addf %386, %388 : vector<16x32xf32>
    %390 = arith.addf %373, %389 : vector<16x32xf32>
    %c0_271 = arith.constant 0 : index
    %c0_272 = arith.constant 0 : index
    %391 = vector.load %arg22[%c0_271, %c0_272] : memref<1x32xf32, #tpu.memory_space<vmem>>, vector<1x32xf32>
    %c0_273 = arith.constant 0 : index
    %c0_274 = arith.constant 0 : index
    %392 = vector.load %arg23[%c0_273, %c0_274] : memref<1x32xf32, #tpu.memory_space<vmem>>, vector<1x32xf32>
    %cst_275 = arith.constant dense<0.000000e+00> : vector<16xf32>
    %393 = vector.multi_reduction <add>, %390, %cst_275 [1] : vector<16x32xf32> to vector<16xf32>
    %394 = vector.shape_cast %393 : vector<16xf32> to vector<16x1xf32>
    %cst_276 = arith.constant 3.200000e+01 : f32
    %395 = vector.broadcast %cst_276 : f32 to vector<16x1xf32>
    %396 = arith.divf %394, %395 : vector<16x1xf32>
    %397 = vector.broadcast %396 : vector<16x1xf32> to vector<16x32xf32>
    %398 = arith.subf %390, %397 : vector<16x32xf32>
    %399 = arith.mulf %398, %398 : vector<16x32xf32>
    %cst_277 = arith.constant dense<0.000000e+00> : vector<16xf32>
    %400 = vector.multi_reduction <add>, %399, %cst_277 [1] : vector<16x32xf32> to vector<16xf32>
    %401 = vector.shape_cast %400 : vector<16xf32> to vector<16x1xf32>
    %cst_278 = arith.constant 3.200000e+01 : f32
    %402 = vector.broadcast %cst_278 : f32 to vector<16x1xf32>
    %403 = arith.divf %401, %402 : vector<16x1xf32>
    %404 = vector.broadcast %396 : vector<16x1xf32> to vector<16x32xf32>
    %405 = arith.subf %390, %404 : vector<16x32xf32>
    %cst_279 = arith.constant 9.99999974E-6 : f32
    %406 = vector.broadcast %cst_279 : f32 to vector<16x1xf32>
    %407 = arith.addf %403, %406 : vector<16x1xf32>
    %408 = math.rsqrt %407 : vector<16x1xf32>
    %409 = vector.broadcast %408 : vector<16x1xf32> to vector<16x32xf32>
    %410 = arith.mulf %405, %409 : vector<16x32xf32>
    %411 = vector.broadcast %391 : vector<1x32xf32> to vector<16x32xf32>
    %412 = arith.mulf %410, %411 : vector<16x32xf32>
    %413 = vector.broadcast %392 : vector<1x32xf32> to vector<16x32xf32>
    %414 = arith.addf %412, %413 : vector<16x32xf32>
    %c0_280 = arith.constant 0 : index
    %c0_281 = arith.constant 0 : index
    %415 = vector.load %arg24[%c0_280, %c0_281] : memref<16x32xf32, #tpu.memory_space<vmem>>, vector<16x32xf32>
    tpu.vector_store %arg24[%c0_280, %c0_281], %414 {strides = array<i32>} : memref<16x32xf32, #tpu.memory_space<vmem>>, vector<16x32xf32>,
    return
  }
}

</mosaic_0001>

<bundles_post_ra>
// kernel: mt_forward.9
= control target key start
LH: loop header
LB: loop body
LE: loop exit
PB: predicated region body
PF: predicated region fallthrough
CT: control target
= control target key end

     0   :  { %11 = vsyncpa [#allocation3], 0  ;;  %vm38_vm0 = vcmask 261120   ;;  %v450_v6 = vmov 0   ;;  %s584_s0 = inlined_call_operand.vmem [shape: f32[16,32], index: 0, kind: input, shape index: {}]   ;;  %s585_s1 = inlined_call_operand.vmem [shape: f32[64,32], index: 1, kind: input, shape index: {}]   ;;  %s586_s2 = inlined_call_operand.vmem [shape: f32[1,64], index: 2, kind: input, shape index: {}]   ;;  %s587_s3 = inlined_call_operand.vmem [shape: s32[16,1], index: 3, kind: input, shape index: {}]   ;;  %s588_s4 = inlined_call_operand.hbm [shape: f32[16,64], index: 4, kind: output, shape index: {0}]   ;;  %s589_s5 = inlined_call_operand.hbm [shape: f32[1,1], index: 5, kind: output, shape index: {1}]  }
   0x1   :  { %v23_v0 = vld [vmem:[%s585_s1] sm:$0xff]  ;;  %v24_v1 = vld [vmem:[%s585_s1 + $0x8] sm:$0xff]  ;;  %v25_v2 = vld [vmem:[%s585_s1 + $0x10] sm:$0xff]  ;;  %392 = vset.pattern.permute.xlu1 %v450_v6  ;;  %393 = vset.pattern.permute.xlu0 %v450_v6 }
   0x2   :  { %v356_v3 = vpack.c.bf16 %v24_v1, %v23_v0  ;;  %vm500_vm1 = vmpackc.low %vm38_vm0, %vm38_vm0  ;;  %v26_v5 = vld [vmem:[%s585_s1 + $0x18] sm:$0xff]  ;;  %v21_v8 = vld [vmem:[%s584_s0] sm:$0xff] }
   0x3   :  { %v362_v7 = vpack.c.bf16 %v26_v5, %v25_v2  ;;  %v147_v9 = vld [vmem:[%s587_s3] sm:$0xff]  ;;  %346 = vmatprep.mubr.msk.f32.mxu0 %vm38_vm0, %v21_v8 }
   0x4   :  { %358 = vmatprep.subr.msk.bf16.mxu0 %vm500_vm1, %v356_v3 }
   0x5   :  { %361 = vmatpush3.bf16.xpose.msk.msra.mxu0 %vm500_vm1, %v356_v3 }
   0x6   :  { %12 = vsyncpa [#allocation5], 0  ;;  %364 = vmatprep.subr.msk.bf16.mxu0 %vm500_vm1, %v362_v7  ;;  %176 = vperm.xlu1 %392, %v147_v9   ;;  %v27_v10 = vld [vmem:[%s585_s1 + $0x20] sm:$0xff]  ;;  %v28_v11 = vld [vmem:[%s585_s1 + $0x28] sm:$0xff]  ;;  %vm144_vm2 = vcmask 523264   ;;  %v173_v27 = vlaneseq  ;;  %v451_v35 = vmov 0.0  }
   0x7   :  { %v148_v12 = vld [vmem:[%s587_s3 + $0x8] sm:$0xff]  ;;  %v368_v13 = vpack.c.bf16 %v28_v11, %v27_v10  ;;  %v29_v14 = vld [vmem:[%s585_s1 + $0x30] sm:$0xff]  ;;  %v30_v15 = vld [vmem:[%s585_s1 + $0x38] sm:$0xff]  ;;  %v452_v46 = vmov 0.0|0.0   ;;  %vm453_vm5 = vmmov 0   ;;  %vm197_vm6 = vcmask 130048  }
   0x8   :  { %v374_v16 = vpack.c.bf16 %v30_v15, %v29_v14  ;;  %v22_v17 = vld [vmem:[%s584_s0 + $0x8] sm:$0xff]  ;;  %v303_v18 = vld [vmem:[%s586_s2] ss:$0 sm:$0xff]  ;;  %v174_v32 = vand.u32 127, %v173_v27  ;;  %380 = vmatprep.subr.bf16.mxu1 %v452_v46  ;;  %353 = vmatprep.mubr.msk.f32.mxu1 %vm453_vm5, %v451_v35  ;;  %v454_v60 = vmov 0.0625   ;;  %s455_s0 = smov [#allocation2]  }
   0x9   :  { %s278_s1 = sshll.u32 %s455_s0, 4  ;;  %s279_s1 = int_to_ptr.vmem [resolvable:$true] %s278_s1 }
   0xa   :  { %179 = vperm.xlu1 %392, %v148_v12   ;;  %s402_s2 = scalar_lea.vmem %s279_s1, 256  ;;  %p407_p1 = scmp.lt.s32.totalorder %s279_s1, %s279_s1 }
   0xb   :  { %p403_p0 = scmp.ne.s32.totalorder %s279_s1, %s402_s2  ;;  %p408_p2 = scmp.lt.s32.totalorder %s402_s2, %s402_s2 }
   0xd   :  { %367 = vmatpush3.bf16.xpose.msk.msra.mxu0 %vm500_vm1, %v362_v7  ;;  %p409_p3 = por %p408_p2, %p407_p1 }
   0xe   :  { %370 = vmatprep.subr.msk.bf16.mxu0 %vm500_vm1, %v368_v13 }
   0xf   :  { %p410_p4 = pnand %p409_p3, %p403_p0 }
  0x15   :  { %373 = vmatpush3.bf16.xpose.msk.msra.mxu0 %vm500_vm1, %v368_v13 }
  0x16   :  { %376 = vmatprep.subr.msk.bf16.mxu0 %vm500_vm1, %v374_v16 }
  0x1d   :  { %379 = vmatpush3.bf16.xpose.msk.msra.mxu0 %vm500_vm1, %v374_v16 }
  0x24   :  { %347 = vmatmul.mubr.msk.f32.vlgmr.msra.gmra.mrb[0].mxu0 %vm38_vm0, %v22_v17 }
  0x85   :  { %v177_v30 = vpop.permute.xlu1 %176 }
  0x86   :  { %vm181_vm3 = vcmp.eq.s32.totalorder %v174_v32, %v177_v30 }
  0x87   :  { %v314_v36 = vsel %vm181_vm3, 1.0, %v451_v35 }
  0x89   :  { %v180_v34 = vpop.permute.xlu1 %179 }
  0x8a   :  { %vm182_vm4 = vcmp.eq.s32.totalorder %v174_v32, %v180_v34 }
  0x8b   :  { %v315_v40 = vsel %vm182_vm4, 1.0, %v451_v35 }
  0xf7   :  { %v348_v19 = vpop.f32.mrb[0].mxu0 }
  0xf8   :  { %v141_v20 = vadd.f32 %v348_v19, %v303_v18  ;;  %v135_v21 = vpop.f32.mrb[1].mxu0 }
  0xf9   :  { %v136_v22 = vadd.f32 %v303_v18, %v135_v21 }
  0xfa   :  { %146 = vst.msk [vmem:[#allocation2 + $0x8] sm:$0xff] %vm144_vm2, %v141_v20  ;;  %v152_v24 = vsel %vm144_vm2, %v141_v20, -inf  ;;  %v188_v44 = vmul.f32 %v315_v40, %v141_v20 }
  0xfb   :  { %v149_v23 = vsel %vm144_vm2, %v136_v22, -inf  ;;  %145 = vst.msk [vmem:[#allocation2] sm:$0xff] %vm144_vm2, %v136_v22  ;;  %v187_v39 = vmul.f32 %v314_v36, %v136_v22 }
  0xfc   :  { %150 = vmax.xlane.f32.xlu0 %v149_v23  ;;  %v192_v45 = vsel %vm144_vm2, %v188_v44, 0.0 }
  0xfd   :  { %v189_v42 = vsel %vm144_vm2, %v187_v39, 0.0 }
 0x100   :  { %153 = vmax.xlane.f32.xlu0 %v152_v24 }
 0x189   :  { %v151_v25 = vpop.xlane.xlu0 %150 }
 0x18a   :  { %v155_v26 = vsub.f32 %v136_v22, %v151_v25 }
 0x18c   :  { %v157_v28 = vmul.f32 1.442695, %v155_v26 }
 0x18d   :  { %v154_v29 = vpop.xlane.xlu0 %153 }
 0x18e   :  { %394 = vpow2.f32 %v157_v28  ;;  %v156_v31 = vsub.f32 %v141_v20, %v154_v29 }
 0x190   :  { %v159_v33 = vmul.f32 1.442695, %v156_v31 }
 0x192   :  { %396 = vpow2.f32 %v159_v33 }
 0x198   :  { %v395_v37 = vpop.eup %394 }
 0x199   :  { %v161_v38 = vsel %vm144_vm2, %v395_v37, 0.0 }
 0x19a   :  { %162 = vadd.xlane.f32.xlu0 %v161_v38 }
 0x19c   :  { %v397_v41 = vpop.eup %396 }
 0x19d   :  { %v164_v43 = vsel %vm144_vm2, %v397_v41, 0.0 }
 0x19e   :  { %190 = vadd.xlane.f32.xlu0 %v189_v42  ;;  %165 = vadd.xlane.f32.xlu1 %v164_v43 }
 0x1a2   :  { %193 = vadd.xlane.f32.xlu0 %v192_v45 }
 0x227   :  { %v163_v47 = vpop.xlane.xlu0 %162 }
 0x228   :  { %398 = vlog2.f32 %v163_v47 }
 0x22b   :  { %v166_v48 = vpop.xlane.xlu1 %165  ;;  %v191_v51 = vpop.xlane.xlu0 %190 }
 0x22c   :  { %400 = vlog2.f32 %v166_v48 }
 0x22f   :  { %v194_v56 = vpop.xlane.xlu0 %193 }
 0x232   :  { %v399_v49 = vpop.eup %398 }
 0x233   :  { %v168_v50 = vmul.f32 0.6931472, %v399_v49 }
 0x235   :  { %v171_v54 = vadd.f32 %v168_v50, %v151_v25 }
 0x236   :  { %v401_v52 = vpop.eup %400 }
 0x237   :  { %v170_v53 = vmul.f32 0.6931472, %v401_v52  ;;  %v195_v57 = vsub.f32 %v171_v54, %v191_v51 }
 0x239   :  { %v172_v55 = vadd.f32 %v170_v53, %v154_v29 }
 0x23b   :  { %v196_v58 = vsub.f32 %v172_v55, %v194_v56 }
 0x23d   :  { %v381_v59 = vpack.c.bf16 %v196_v58, %v195_v57 }
 0x23f   :  { %382 = vmatpush3.bf16.msra.mxu1 %v381_v59 }
 0x242   :  { %354 = vmatmul.mubr.msk.f32.vlgmr.msra.gmra.mrb[0].mxu1 %vm197_vm6, %v454_v60 }
 0x243   :  { %413 = shalt.err (!%p410_p4)
}
 0x244   :  { %s414_s20 = scalar_lea.hbm %s588_s4, 256 }
 0x245   :  { %p415_p5 = scmp.ne.s32.totalorder %s588_s4, %s414_s20  ;;  %p418_p6 = scmp.lt.u32.totalorder %s414_s20, %s588_s4 }
 0x247   :  { %p420_p7 = pnand %p418_p6, %p415_p5 }
 0x249   :  { %423 = shalt.err (!%p420_p7)
}
 0x24a   :  { %s456_s25 = smov 128   ;;  %s457_s26 = smov 8   ;;  %vm271_vm7 = vcmask 0  }
 0x24b   :  { %284 = dma.vmem_to_hbm [thread:$0]  %s279_s1, 256, %s588_s4, [#allocation3], %s456_s25, %s456_s25, %s457_s26  }
 0x24c   :  { %s458_s29 = smov [#allocation4]  }
 0x24d   :  { %s291_s30 = sshll.u32 %s458_s29, 4  ;;  %s292_s30 = int_to_ptr.vmem [resolvable:$true] %s291_s30 }
 0x24e   :  { %s424_s6 = scalar_lea.vmem %s292_s30, 16  ;;  %s428_s7 = scalar_lea.vmem %s292_s30, 32 }
 0x24f   :  { %p425_p8 = scmp.ne.s32.totalorder %s292_s30, %s424_s6  ;;  %p429_p9 = scmp.lt.s32.totalorder %s292_s30, %s292_s30 }
 0x250   :  { %p430_p10 = scmp.lt.s32.totalorder %s428_s7, %s424_s6 }
 0x252   :  { %p431_p11 = por %p430_p10, %p429_p9 }
 0x254   :  { %p432_p12 = pnand %p431_p11, %p425_p8 }
 0x315   :  { %v267_v61 = vpop.f32.mrb[0].mxu1 }
 0x316   :  { %272 = vst.msk [vmem:[#allocation4] sm:$0x1] %vm271_vm7, %v267_v61  ;;  %v355_v62 = vpop.f32.mrb[1].mxu1 }
 0x317   :  { %435 = shalt.err (!%p432_p12)
}
 0x318   :  { %s436_s10 = scalar_lea.hbm %s589_s5, 16 }
 0x319   :  { %p437_p13 = scmp.ne.s32.totalorder %s589_s5, %s436_s10  ;;  %p440_p0 = scmp.lt.u32.totalorder %s436_s10, %s589_s5 }
 0x31b   :  { %p442_p1 = pnand %p440_p0, %p437_p13 }
 0x31d   :  { %445 = shalt.err (!%p442_p1)
}
 0x31e   :  { %294 = dma.vmem_to_hbm [thread:$0]  %s292_s30, 16, %s589_s5, [#allocation5]  }
 0x31f   :  { %446 = dma.done.wait [#allocation3], 256  }
 0x320   :  { %447 = vsyncadd [#allocation3], 4294967040 }
 0x321   :  { %448 = dma.done.wait [#allocation5], 16  }
 0x322   :  { %449 = vsyncadd [#allocation5], 4294967280 }
 0x323   :  { %301 = vsyncpa [#allocation3], 1 }
 0x324   :  { %302 = vsyncpa [#allocation5], 1 }

// kernel: mt_forward.5
= control target key start
LH: loop header
LB: loop body
LE: loop exit
PB: predicated region body
PF: predicated region fallthrough
CT: control target
= control target key end

     0   :  { %vm60_vm0 = vcmask 261120   ;;  %v2265_v8 = vmov 0.0   ;;  %vm142_vm1 = vcmask 785408   ;;  %vm2266_vm2 = vmmov 0   ;;  %s2269_s26 = smov 88   ;;  %s2270_s27 = smov 80   ;;  %s2621_s2 = inlined_call_operand.vmem [shape: f32[32,96], index: 2, kind: input, shape index: {}]   ;;  %s2622_s0 = inlined_call_operand.vmem [shape: f32[16,32], index: 0, kind: input, shape index: {}]   ;;  %s2623_s3 = inlined_call_operand.vmem [shape: f32[1,96], index: 3, kind: input, shape index: {}]   ;;  %s2624_s1 = inlined_call_operand.vmem [shape: f32[16,8], index: 1, kind: input, shape index: {}]   ;;  %s2625_s4 = inlined_call_operand.vmem [shape: f32[32,32], index: 4, kind: input, shape index: {}]   ;;  %s2626_s5 = inlined_call_operand.vmem [shape: f32[1,32], index: 5, kind: input, shape index: {}]   ;;  %s2627_s8 = inlined_call_operand.vmem [shape: f32[32,64], index: 8, kind: input, shape index: {}]   ;;  %s2628_s6 = inlined_call_operand.vmem [shape: f32[1,32], index: 6, kind: input, shape index: {}]   ;;  %s2629_s7 = inlined_call_operand.vmem [shape: f32[1,32], index: 7, kind: input, shape index: {}]   ;;  %s2630_s10 = inlined_call_operand.vmem [shape: f32[64,32], index: 10, kind: input, shape index: {}]   ;;  %s2631_s9 = inlined_call_operand.vmem [shape: f32[1,64], index: 9, kind: input, shape index: {}]   ;;  %s2632_s11 = inlined_call_operand.vmem [shape: f32[1,32], index: 11, kind: input, shape index: {}]   ;;  %s2633_s12 = inlined_call_operand.vmem [shape: f32[1,32], index: 12, kind: input, shape index: {}]   ;;  %s2634_s13 = inlined_call_operand.vmem [shape: f32[1,32], index: 13, kind: input, shape index: {}]   ;;  %s2635_s14 = inlined_call_operand.vmem [shape: f32[16,32], index: 14, kind: output, shape index: {}]  }
   0x1   :  { %v49_v0 = vld [vmem:[%s2621_s2] sm:$0xff]  ;;  %v50_v1 = vld [vmem:[%s2621_s2 + $0x8] sm:$0xff]  ;;  %v51_v2 = vld [vmem:[%s2621_s2 + $0x10] sm:$0xff]  ;;  %2050 = vmatprep.subr.mxu0 %v2265_v8  ;;  %2052 = vmatprep.mubr.msk.f32.mxu0 %vm2266_vm2, %v2265_v8  ;;  %s2271_s28 = smov 112   ;;  %s2272_s29 = smov 72   ;;  %vm151_vm3 = vcmask 64512  }
   0x2   :  { %v2161_v3 = vpack.c.bf16 %v50_v1, %v49_v0  ;;  %v52_v4 = vld [vmem:[%s2621_s2 + $0x18] sm:$0xff]  ;;  %v2371_v5 = vld [vmem:[%s2622_s0] sm:$0xff]  ;;  %v2378_v7 = vld [vmem:[%s2622_s0 + $0x8] sm:$0xff]  ;;  %s2267_s0 = smov 96   ;;  %s2273_s30 = smov 104   ;;  %vm488_vm4 = vcmask 130112  }
   0x3   :  { %v2165_v6 = vpack.c.bf16 %v52_v4, %v51_v2  ;;  %2037 = vmatprep.mubr.msk.f32.mxu1 %vm60_vm0, %v2371_v5  ;;  %v1927_v9 = vld [vmem:[%s2623_s3] ss:$0 sm:$0xff]  ;;  %s2268_s3 = smov 120   ;;  %s2274_s15 = smov 64   ;;  %v840_v49 = vld [vmem:[%s2624_s1 + $0x8] sm:$0xff]  ;;  %vm663_vm5 = vcmask 195712  }
   0x4   :  { %2162 = vmatprep.subr.bf16.mxu1 %v2161_v3  ;;  %s2275_s16 = smov 56   ;;  %v145_v33 = vld [vmem:[%s2624_s1] sm:$0xff]  ;;  %s2276_s1 = smov 40   ;;  %vm838_vm6 = vcmask 261312   ;;  %vm1793_vm7 = vcmask 523264  }
   0x5   :  { %2164 = vmatpush3.bf16.msra.mxu1 %v2161_v3  ;;  %s2277_s21 = smov 48   ;;  %s2278_s22 = smov 8  }
   0x6   :  { %2166 = vmatprep.subr.bf16.mxu1 %v2165_v6  ;;  %s2279_s23 = smov 16   ;;  %s2280_s24 = smov 24  }
   0x9   :  { %2168 = vmatpush3.bf16.msra.mxu1 %v2165_v6 }
   0xa   :  { %2040 = vmatprep.subr.mxu1 %v2265_v8 }
   0xc   :  { %2038 = vmatmul.mubr.msk.f32.vlgmr.msra.gmra.mrb[0].mxu1 %vm60_vm0, %v2378_v7 }
   0xd   :  { %2042 = vmatprep.mubr.msk.f32.mxu1 %vm2266_vm2, %v2265_v8 }
  0xdf   :  { %v2039_v10 = vpop.f32.mrb[0].mxu1 }
  0xe0   :  { %v139_v11 = vadd.f32 %v2039_v10, %v1927_v9  ;;  %v133_v12 = vpop.f32.mrb[1].mxu1 }
  0xe1   :  { %v134_v13 = vadd.f32 %v1927_v9, %v133_v12 }
  0xe2   :  { %144 = vst.msk [vmem:[#allocation2 + $0x8] sm:$0xff] %vm142_vm1, %v139_v11 }
  0xe3   :  { %143 = vst.msk [vmem:[#allocation2] sm:$0xff] %vm142_vm1, %v134_v13 }
  0xe9   :  { %v2398_v16 = vld [vmem:[#allocation2 + $0x8] sm:$0xff] }
  0xea   :  { %v2391_v14 = vld [vmem:[#allocation2] sm:$0xff]  ;;  %v842_v17 = vmul.f32 0.35355338, %v2398_v16 }
  0xeb   :  { %149 = vrot.lane.b32.xlu0 %v2391_v14, %s2267_s0  ;;  %v147_v15 = vmul.f32 0.35355338, %v2391_v14 }
  0xed   :  { %318 = vrot.lane.b32.xlu1 %v147_v15, %s2268_s3 }
  0xef   :  { %321 = vrot.lane.b32.xlu0 %v2391_v14, %s2269_s26 }
  0xf1   :  { %496 = vrot.lane.b32.xlu1 %v2391_v14, %s2270_s27 }
  0xf3   :  { %493 = vrot.lane.b32.xlu0 %v147_v15, %s2271_s28 }
  0xf5   :  { %671 = vrot.lane.b32.xlu1 %v2391_v14, %s2272_s29 }
  0xf7   :  { %668 = vrot.lane.b32.xlu0 %v147_v15, %s2273_s30 }
  0xf9   :  { %844 = vrot.lane.b32.xlu1 %v2398_v16, %s2267_s0 }
  0xfb   :  { %1015 = vrot.lane.b32.xlu0 %v2398_v16, %s2269_s26 }
  0xfd   :  { %1012 = vrot.lane.b32.xlu1 %v842_v17, %s2268_s3 }
  0xff   :  { %1189 = vrot.lane.b32.xlu0 %v2398_v16, %s2270_s27 }
 0x101   :  { %1186 = vrot.lane.b32.xlu1 %v842_v17, %s2271_s28 }
 0x103   :  { %1363 = vrot.lane.b32.xlu0 %v2398_v16, %s2272_s29 }
 0x105   :  { %1360 = vrot.lane.b32.xlu1 %v842_v17, %s2273_s30 }
 0x107   :  { %238 = vrot.lane.b32.xlu0 %v2391_v14, %s2274_s15 }
 0x109   :  { %408 = vrot.lane.b32.xlu1 %v2391_v14, %s2275_s16 }
 0x15d   :  { %v150_v18 = vpop.permute.xlu0 %149 }
 0x15e   :  { %2041 = vmatpush3.xpose.msk.msra.mxu1 %vm151_vm3, %v150_v18 }
 0x15f   :  { %v319_v19 = vpop.permute.xlu1 %318  ;;  %2045 = vmatprep.subr.mxu1 %v2265_v8 }
 0x161   :  { %v322_v20 = vpop.permute.xlu0 %321  ;;  %2043 = vmatmul.mubr.msk.f32.vlgmr.msra.gmra.mrb[2].mxu1 %vm151_vm3, %v147_v15 }
 0x162   :  { %2051 = vmatpush3.xpose.msk.msra.mxu0 %vm151_vm3, %v322_v20  ;;  %2047 = vmatprep.mubr.msk.f32.mxu1 %vm2266_vm2, %v2265_v8 }
 0x163   :  { %v497_v21 = vpop.permute.xlu1 %496  ;;  %2060 = vmatprep.subr.mxu0 %v2265_v8 }
 0x165   :  { %2053 = vmatmul.mubr.msk.f32.vlgmr.msra.gmra.mrb[0].mxu0 %vm151_vm3, %v319_v19  ;;  %v494_v22 = vpop.permute.xlu0 %493 }
 0x166   :  { %2061 = vmatpush3.xpose.msk.msra.mxu0 %vm151_vm3, %v497_v21  ;;  %2062 = vmatprep.mubr.msk.f32.mxu0 %vm2266_vm2, %v2265_v8 }
 0x167   :  { %v672_v23 = vpop.permute.xlu1 %671  ;;  %2070 = vmatprep.subr.mxu0 %v2265_v8 }
 0x169   :  { %2063 = vmatmul.mubr.msk.f32.vlgmr.msra.gmra.mrb[2].mxu0 %vm151_vm3, %v494_v22  ;;  %v669_v24 = vpop.permute.xlu0 %668 }
 0x16a   :  { %2071 = vmatpush3.xpose.msk.msra.mxu0 %vm151_vm3, %v672_v23  ;;  %2072 = vmatprep.mubr.msk.f32.mxu0 %vm2266_vm2, %v2265_v8 }
 0x16b   :  { %v845_v25 = vpop.permute.xlu1 %844  ;;  %2080 = vmatprep.subr.mxu0 %v2265_v8 }
 0x16d   :  { %2073 = vmatmul.mubr.msk.f32.vlgmr.msra.gmra.mrb[4].mxu0 %vm151_vm3, %v669_v24  ;;  %v1016_v26 = vpop.permute.xlu0 %1015 }
 0x16e   :  { %2081 = vmatpush3.xpose.msk.msra.mxu0 %vm151_vm3, %v845_v25  ;;  %2082 = vmatprep.mubr.msk.f32.mxu0 %vm2266_vm2, %v2265_v8 }
 0x16f   :  { %2090 = vmatprep.subr.mxu0 %v2265_v8  ;;  %v1013_v27 = vpop.permute.xlu1 %1012 }
 0x171   :  { %2083 = vmatmul.mubr.msk.f32.vlgmr.msra.gmra.mrb[6].mxu0 %vm151_vm3, %v842_v17  ;;  %v1190_v28 = vpop.permute.xlu0 %1189 }
 0x172   :  { %2091 = vmatpush3.xpose.msk.msra.mxu0 %vm151_vm3, %v1016_v26  ;;  %2092 = vmatprep.mubr.msk.f32.mxu0 %vm2266_vm2, %v2265_v8 }
 0x173   :  { %2100 = vmatprep.subr.mxu0 %v2265_v8  ;;  %v1187_v30 = vpop.permute.xlu1 %1186 }
 0x175   :  { %2093 = vmatmul.mubr.msk.f32.vlgmr.msra.gmra.mrb[8].mxu0 %vm151_vm3, %v1013_v27  ;;  %v1364_v29 = vpop.permute.xlu0 %1363 }
 0x176   :  { %2101 = vmatpush3.xpose.msk.msra.mxu0 %vm151_vm3, %v1190_v28  ;;  %2102 = vmatprep.mubr.msk.f32.mxu0 %vm2266_vm2, %v2265_v8 }
 0x177   :  { %2110 = vmatprep.subr.mxu0 %v2265_v8  ;;  %v1361_v32 = vpop.permute.xlu1 %1360 }
 0x179   :  { %2103 = vmatmul.mubr.msk.f32.vlgmr.msra.gmra.mrb[10].mxu0 %vm151_vm3, %v1187_v30  ;;  %v239_v31 = vpop.permute.xlu0 %238 }
 0x17a   :  { %2046 = vmatpush3.msra.mxu1 %v239_v31  ;;  %2111 = vmatpush3.xpose.msk.msra.mxu0 %vm151_vm3, %v1364_v29 }
 0x17b   :  { %2112 = vmatprep.mubr.msk.f32.mxu0 %vm2266_vm2, %v2265_v8  ;;  %2055 = vmatprep.subr.mxu1 %v2265_v8  ;;  %v2465_v3 = vpop.permute.xlu1 %408 }
 0x17d   :  { %2113 = vmatmul.mubr.msk.f32.vlgmr.msra.gmra.mrb[12].mxu0 %vm151_vm3, %v1361_v32 }
 0x234   :  { %v223_v34 = vpop.f32.mrb[2].mxu1 }
 0x235   :  { %v224_v35 = vadd.f32 %v223_v34, %v145_v33  ;;  %v2044_v36 = vpop.f32.mrb[3].mxu1 }
 0x237   :  { %v227_v37 = vsel %vm151_vm3, %v224_v35, -inf }
 0x238   :  { %v393_v38 = vpop.f32.mrb[0].mxu0  ;;  %228 = vmax.xlane.f32.xlu0 %v227_v37 }
 0x239   :  { %v394_v39 = vadd.f32 %v393_v38, %v145_v33  ;;  %v2054_v40 = vpop.f32.mrb[1].mxu0 }
 0x23b   :  { %v397_v41 = vsel %vm151_vm3, %v394_v39, -inf }
 0x23c   :  { %398 = vmax.xlane.f32.xlu1 %v397_v41  ;;  %v568_v42 = vpop.f32.mrb[2].mxu0 }
 0x23d   :  { %v569_v43 = vadd.f32 %v568_v42, %v145_v33  ;;  %v2064_v44 = vpop.f32.mrb[3].mxu0 }
 0x23f   :  { %v572_v45 = vsel %vm151_vm3, %v569_v43, -inf }
 0x240   :  { %v743_v46 = vpop.f32.mrb[4].mxu0  ;;  %573 = vmax.xlane.f32.xlu0 %v572_v45 }
 0x241   :  { %v744_v47 = vadd.f32 %v743_v46, %v145_v33  ;;  %v2074_v48 = vpop.f32.mrb[5].mxu0 }
 0x243   :  { %v747_v50 = vsel %vm151_vm3, %v744_v47, -inf }
 0x244   :  { %v917_v51 = vpop.f32.mrb[6].mxu0  ;;  %748 = vmax.xlane.f32.xlu0 %v747_v50 }
 0x245   :  { %v918_v52 = vadd.f32 %v917_v51, %v840_v49  ;;  %v2084_v53 = vpop.f32.mrb[7].mxu0 }
 0x247   :  { %v921_v54 = vsel %vm151_vm3, %v918_v52, -inf }
 0x248   :  { %922 = vmax.xlane.f32.xlu1 %v921_v54  ;;  %v1087_v55 = vpop.f32.mrb[8].mxu0 }
 0x249   :  { %v1088_v56 = vadd.f32 %v1087_v55, %v840_v49  ;;  %v2094_v57 = vpop.f32.mrb[9].mxu0 }
 0x24b   :  { %v1091_v58 = vsel %vm151_vm3, %v1088_v56, -inf }
 0x24c   :  { %v1261_v59 = vpop.f32.mrb[10].mxu0  ;;  %1092 = vmax.xlane.f32.xlu0 %v1091_v58 }
 0x24d   :  { %v1262_v60 = vadd.f32 %v1261_v59, %v840_v49  ;;  %v2104_v61 = vpop.f32.mrb[11].mxu0 }
 0x24f   :  { %v1265_v62 = vsel %vm151_vm3, %v1262_v60, -inf }
 0x250   :  { %1266 = vmax.xlane.f32.xlu1 %v1265_v62  ;;  %v1435_v63 = vpop.f32.mrb[12].mxu0 }
 0x251   :  { %v1436_v0 = vadd.f32 %v1435_v63, %v840_v49  ;;  %v2114_v1 = vpop.f32.mrb[13].mxu0 }
 0x253   :  { %v1439_v2 = vsel %vm151_vm3, %v1436_v0, -inf }
 0x254   :  { %1440 = vmax.xlane.f32.xlu0 %v1439_v2 }
 0x261   :  { %758 = vrot.lane.b32.xlu1 %v2391_v14, %s2276_s1 }
 0x26a   :  { %583 = vrot.lane.b32.xlu0 %v2391_v14, %s2277_s21 }
 0x2c5   :  { %v229_v4 = vpop.xlane.xlu0 %228 }
 0x2c6   :  { %v230_v6 = vsub.f32 %v224_v35, %v229_v4 }
 0x2c8   :  { %v231_v9 = vmul.f32 1.442695, %v230_v6 }
 0x2c9   :  { %v399_v10 = vpop.xlane.xlu1 %398 }
 0x2ca   :  { %2217 = vpow2.f32 %v231_v9  ;;  %v400_v11 = vsub.f32 %v394_v39, %v399_v10 }
 0x2cc   :  { %v401_v12 = vmul.f32 1.442695, %v400_v11 }
 0x2cd   :  { %v574_v13 = vpop.xlane.xlu0 %573 }
 0x2ce   :  { %2219 = vpow2.f32 %v401_v12  ;;  %v575_v15 = vsub.f32 %v569_v43, %v574_v13 }
 0x2d0   :  { %v576_v17 = vmul.f32 1.442695, %v575_v15 }
 0x2d1   :  { %v749_v18 = vpop.xlane.xlu0 %748 }
 0x2d2   :  { %2221 = vpow2.f32 %v576_v17  ;;  %v750_v19 = vsub.f32 %v744_v47, %v749_v18 }
 0x2d4   :  { %v2218_v20 = vpop.eup %2217  ;;  %v751_v21 = vmul.f32 1.442695, %v750_v19 }
 0x2d5   :  { %v233_v14 = vsel %vm151_vm3, %v2218_v20, 0.0  ;;  %v923_v28 = vpop.xlane.xlu1 %922 }
 0x2d6   :  { %2223 = vpow2.f32 %v751_v21  ;;  %234 = vadd.xlane.f32.xlu1 %v233_v14  ;;  %v924_v29 = vsub.f32 %v918_v52, %v923_v28 }
 0x2d8   :  { %v2220_v22 = vpop.eup %2219  ;;  %v925_v33 = vmul.f32 1.442695, %v924_v29  ;;  %v1535_v29 = vld [vmem:[%s2625_s4 + $0x10] sm:$0xff] }
 0x2d9   :  { %v403_v23 = vsel %vm151_vm3, %v2220_v22, 0.0  ;;  %v1093_v30 = vpop.xlane.xlu0 %1092 }
 0x2da   :  { %404 = vadd.xlane.f32.xlu0 %v403_v23  ;;  %v1094_v32 = vsub.f32 %v1088_v56, %v1093_v30  ;;  %2225 = vpow2.f32 %v925_v33  ;;  %v1536_v30 = vld [vmem:[%s2625_s4 + $0x18] sm:$0xff] }
 0x2dc   :  { %v2222_v24 = vpop.eup %2221  ;;  %v1095_v36 = vmul.f32 1.442695, %v1094_v32 }
 0x2dd   :  { %v578_v25 = vsel %vm151_vm3, %v2222_v24, 0.0  ;;  %v1267_v31 = vpop.xlane.xlu1 %1266 }
 0x2de   :  { %579 = vadd.xlane.f32.xlu1 %v578_v25  ;;  %v1268_v34 = vsub.f32 %v1262_v60, %v1267_v31  ;;  %2227 = vpow2.f32 %v1095_v36  ;;  %v1534_v25 = vld [vmem:[%s2625_s4 + $0x8] sm:$0xff]  ;;  %v2173_v31 = vpack.c.bf16 %v1536_v30, %v1535_v29  ;;  %v1782_v29 = vld [vmem:[%s2630_s10 + $0x20] sm:$0xff] }
 0x2df   :  { %v1783_v30 = vld [vmem:[%s2630_s10 + $0x28] sm:$0xff] }
 0x2e0   :  { %v2470_v26 = vpop.eup %2223  ;;  %v1269_v37 = vmul.f32 1.442695, %v1268_v34 }
 0x2e1   :  { %v753_v27 = vsel %vm151_vm3, %v2470_v26, 0.0  ;;  %v1441_v35 = vpop.xlane.xlu0 %1440  ;;  %v759_v48 = vpop.permute.xlu1 %758 }
 0x2e2   :  { %754 = vadd.xlane.f32.xlu0 %v753_v27  ;;  %v1442_v38 = vsub.f32 %v1436_v0, %v1441_v35  ;;  %2229 = vpow2.f32 %v1269_v37 }
 0x2e4   :  { %v1443_v39 = vmul.f32 1.442695, %v1442_v38  ;;  %v2226_v40 = vpop.eup %2225 }
 0x2e5   :  { %v927_v42 = vsel %vm151_vm3, %v2226_v40, 0.0  ;;  %v584_v49 = vpop.permute.xlu0 %583 }
 0x2e6   :  { %2231 = vpow2.f32 %v1443_v39 }
 0x2e8   :  { %v2478_v41 = vpop.eup %2227 }
 0x2e9   :  { %v1097_v45 = vsel %vm151_vm3, %v2478_v41, 0.0 }
 0x2ec   :  { %v2481_v43 = vpop.eup %2229 }
 0x2ed   :  { %v1271_v44 = vsel %vm151_vm3, %v2481_v43, 0.0 }
 0x2ef   :  { %1102 = vrot.lane.b32.xlu1 %v2398_v16, %s2275_s16 }
 0x2f0   :  { %v2487_v46 = vpop.eup %2231 }
 0x2f1   :  { %v1445_v47 = vsel %vm151_vm3, %v2487_v46, 0.0 }
 0x2f8   :  { %932 = vrot.lane.b32.xlu0 %v2398_v16, %s2274_s15 }
 0x313   :  { %928 = vadd.xlane.f32.xlu1 %v927_v42 }
 0x317   :  { %1272 = vadd.xlane.f32.xlu1 %v1271_v44  ;;  %1098 = vadd.xlane.f32.xlu0 %v1097_v45 }
 0x31b   :  { %1446 = vadd.xlane.f32.xlu1 %v1445_v47 }
 0x32c   :  { %1450 = vrot.lane.b32.xlu1 %v2398_v16, %s2276_s1 }
 0x32d   :  { %1276 = vrot.lane.b32.xlu0 %v2398_v16, %s2277_s21 }
 0x363   :  { %v235_v50 = vpop.xlane.xlu1 %234 }
 0x364   :  { %2233 = vrcp.f32 %v235_v50 }
 0x367   :  { %v405_v51 = vpop.xlane.xlu0 %404 }
 0x368   :  { %2235 = vrcp.f32 %v405_v51 }
 0x36b   :  { %v580_v52 = vpop.xlane.xlu1 %579 }
 0x36c   :  { %2237 = vrcp.f32 %v580_v52 }
 0x36e   :  { %v2234_v53 = vpop.eup %2233 }
 0x36f   :  { %v237_v54 = vmul.f32 %v2234_v53, %v2218_v20  ;;  %v755_v55 = vpop.xlane.xlu0 %754  ;;  %v1103_v62 = vpop.permute.xlu1 %1102 }
 0x370   :  { %2239 = vrcp.f32 %v755_v55 }
 0x371   :  { %2048 = vmatmul.mubr.msk.f32.vlgmr.msra.gmra.mrb[4].mxu1 %vm151_vm3, %v237_v54 }
 0x372   :  { %v2236_v56 = vpop.eup %2235  ;;  %2056 = vmatpush3.msra.mxu1 %v2465_v3  ;;  %2057 = vmatprep.mubr.msk.f32.mxu1 %vm2266_vm2, %v2265_v8 }
 0x373   :  { %v407_v16 = vmul.f32 %v2236_v56, %v2220_v22  ;;  %2065 = vmatprep.subr.mxu1 %v2265_v8  ;;  %v933_v61 = vpop.permute.xlu0 %932 }
 0x375   :  { %2058 = vmatmul.mubr.msk.f32.vlgmr.msra.gmra.mrb[6].mxu1 %vm151_vm3, %v407_v16 }
 0x376   :  { %v2238_v57 = vpop.eup %2237  ;;  %2066 = vmatpush3.msra.mxu1 %v584_v49  ;;  %2067 = vmatprep.mubr.msk.f32.mxu1 %vm2266_vm2, %v2265_v8 }
 0x377   :  { %v582_v58 = vmul.f32 %v2238_v57, %v2222_v24  ;;  %2075 = vmatprep.subr.mxu1 %v2265_v8  ;;  %v1533_v24 = vld [vmem:[%s2625_s4] sm:$0xff] }
 0x378   :  { %v2169_v27 = vpack.c.bf16 %v1534_v25, %v1533_v24  ;;  %v1779_v24 = vld [vmem:[%s2630_s10 + $0x8] sm:$0xff] }
 0x379   :  { %2068 = vmatmul.mubr.msk.f32.vlgmr.msra.gmra.mrb[8].mxu1 %vm151_vm3, %v582_v58 }
 0x37a   :  { %v2240_v59 = vpop.eup %2239  ;;  %2076 = vmatpush3.msra.mxu1 %v759_v48  ;;  %2077 = vmatprep.mubr.msk.f32.mxu1 %vm2266_vm2, %v2265_v8 }
 0x37b   :  { %v757_v60 = vmul.f32 %v2240_v59, %v2470_v26  ;;  %2085 = vmatprep.subr.mxu1 %v2265_v8  ;;  %2170 = vmatprep.subr.bf16.mxu0 %v2169_v27 }
 0x37c   :  { %2172 = vmatpush3.bf16.msra.mxu0 %v2169_v27  ;;  %v1781_v27 = vld [vmem:[%s2630_s10 + $0x18] sm:$0xff] }
 0x37d   :  { %2078 = vmatmul.mubr.msk.f32.vlgmr.msra.gmra.mrb[10].mxu1 %vm151_vm3, %v757_v60  ;;  %2174 = vmatprep.subr.bf16.mxu0 %v2173_v31 }
 0x37e   :  { %2086 = vmatpush3.msra.mxu1 %v933_v61  ;;  %2087 = vmatprep.mubr.msk.f32.mxu1 %vm2266_vm2, %v2265_v8 }
 0x37f   :  { %2095 = vmatprep.subr.mxu1 %v2265_v8 }
 0x380   :  { %2176 = vmatpush3.bf16.msra.mxu0 %v2173_v31  ;;  %v2193_v31 = vpack.c.bf16 %v1783_v30, %v1782_v29 }
 0x3a0   :  { %v929_v63 = vpop.xlane.xlu1 %928 }
 0x3a1   :  { %2241 = vrcp.f32 %v929_v63  ;;  %v1673_v63 = vld [vmem:[%s2627_s8 + $0x8] sm:$0xff] }
 0x3a4   :  { %v1273_v0 = vpop.xlane.xlu1 %1272  ;;  %v1099_v1 = vpop.xlane.xlu0 %1098 }
 0x3a5   :  { %2243 = vrcp.f32 %v1099_v1  ;;  %v1674_v1 = vld [vmem:[%s2627_s8 + $0x10] sm:$0xff] }
 0x3a6   :  { %2245 = vrcp.f32 %v1273_v0 }
 0x3a8   :  { %v1447_v2 = vpop.xlane.xlu1 %1446  ;;  %v1277_v11 = vpop.permute.xlu0 %1276 }
 0x3a9   :  { %2247 = vrcp.f32 %v1447_v2  ;;  %v1675_v2 = vld [vmem:[%s2627_s8 + $0x18] sm:$0xff] }
 0x3ab   :  { %v2242_v3 = vpop.eup %2241 }
 0x3ac   :  { %v931_v4 = vmul.f32 %v2242_v3, %v2226_v40  ;;  %v1451_v15 = vpop.permute.xlu1 %1450  ;;  %v2181_v3 = vpack.c.bf16 %v1675_v2, %v1674_v1 }
 0x3ae   :  { %2088 = vmatmul.mubr.msk.f32.vlgmr.msra.gmra.mrb[12].mxu1 %vm151_vm3, %v931_v4 }
 0x3af   :  { %2096 = vmatpush3.msra.mxu1 %v1103_v62  ;;  %2097 = vmatprep.mubr.msk.f32.mxu1 %vm2266_vm2, %v2265_v8  ;;  %v2244_v6 = vpop.eup %2243 }
 0x3b0   :  { %2105 = vmatprep.subr.mxu1 %v2265_v8  ;;  %v1101_v9 = vmul.f32 %v2244_v6, %v2478_v41  ;;  %v2246_v10 = vpop.eup %2245 }
 0x3b1   :  { %v1275_v12 = vmul.f32 %v2246_v10, %v2481_v43 }
 0x3b2   :  { %2098 = vmatmul.mubr.msk.f32.vlgmr.msra.gmra.mrb[14].mxu1 %vm151_vm3, %v1101_v9 }
 0x3b3   :  { %2106 = vmatpush3.msra.mxu1 %v1277_v11  ;;  %2107 = vmatprep.mubr.msk.f32.mxu1 %vm2266_vm2, %v2265_v8  ;;  %v2248_v13 = vpop.eup %2247 }
 0x3b4   :  { %2115 = vmatprep.subr.mxu1 %v2265_v8  ;;  %v1449_v17 = vmul.f32 %v2248_v13, %v2487_v46  ;;  %v1954_v46 = vld [vmem:[%s2626_s5] ss:$0 sm:$0xff] }
 0x3b6   :  { %2108 = vmatmul.mubr.msk.f32.vlgmr.msra.gmra.mrb[16].mxu1 %vm151_vm3, %v1275_v12 }
 0x3b7   :  { %2116 = vmatpush3.msra.mxu1 %v1451_v15  ;;  %2117 = vmatprep.mubr.msk.f32.mxu1 %vm2266_vm2, %v2265_v8  ;;  %v1957_v15 = vld [vmem:[%s2628_s6] ss:$0 sm:$0xff] }
 0x3ba   :  { %2118 = vmatmul.mubr.msk.f32.vlgmr.msra.gmra.mrb[18].mxu1 %vm151_vm3, %v1449_v17 }
 0x444   :  { %v310_v18 = vpop.f32.mrb[4].mxu1 }
 0x445   :  { %314 = vst.msk [vmem:[#allocation3] sm:$0xff] %vm151_vm3, %v310_v18  ;;  %v2049_v19 = vpop.f32.mrb[5].mxu1  ;;  %v1958_v18 = vld [vmem:[%s2629_s7] ss:$0 sm:$0xff] }
 0x448   :  { %v480_v20 = vpop.f32.mrb[6].mxu1 }
 0x449   :  { %485 = vrot.lane.b32.xlu0 %v480_v20, %s2278_s22  ;;  %v2059_v21 = vpop.f32.mrb[7].mxu1 }
 0x44c   :  { %v655_v14 = vpop.f32.mrb[8].mxu1 }
 0x44d   :  { %660 = vrot.lane.b32.xlu1 %v655_v14, %s2279_s23  ;;  %v2069_v22 = vpop.f32.mrb[9].mxu1 }
 0x450   :  { %v830_v23 = vpop.f32.mrb[10].mxu1 }
 0x451   :  { %835 = vrot.lane.b32.xlu1 %v830_v23, %s2280_s24  ;;  %v2079_v8 = vpop.f32.mrb[11].mxu1 }
 0x452   :  { %v1778_v8 = vld [vmem:[%s2630_s10] sm:$0xff] }
 0x453   :  { %v2185_v25 = vpack.c.bf16 %v1779_v24, %v1778_v8 }
 0x455   :  { %2186 = vmatprep.subr.bf16.mxu0 %v2185_v25 }
 0x481   :  { %v1004_v26 = vpop.f32.mrb[12].mxu1 }
 0x482   :  { %1008 = vst.msk [vmem:[#allocation3 + $0x8] sm:$0xff] %vm151_vm3, %v1004_v26  ;;  %v2089_v28 = vpop.f32.mrb[13].mxu1  ;;  %v1780_v26 = vld [vmem:[%s2630_s10 + $0x10] sm:$0xff] }
 0x483   :  { %v2189_v28 = vpack.c.bf16 %v1781_v27, %v1780_v26 }
 0x485   :  { %v1174_v32 = vpop.f32.mrb[14].mxu1 }
 0x486   :  { %1179 = vrot.lane.b32.xlu0 %v1174_v32, %s2278_s22  ;;  %v2099_v33 = vpop.f32.mrb[15].mxu1  ;;  %v1784_v32 = vld [vmem:[%s2630_s10 + $0x30] sm:$0xff] }
 0x487   :  { %v1785_v33 = vld [vmem:[%s2630_s10 + $0x38] sm:$0xff] }
 0x489   :  { %v1348_v34 = vpop.f32.mrb[16].mxu1 }
 0x48a   :  { %1353 = vrot.lane.b32.xlu0 %v1348_v34, %s2279_s23  ;;  %v2109_v35 = vpop.f32.mrb[17].mxu1  ;;  %v2197_v34 = vpack.c.bf16 %v1785_v33, %v1784_v32 }
 0x48b   :  { %v1959_v35 = vld [vmem:[%s2631_s9] ss:$0 sm:$0xff] }
 0x48d   :  { %v1522_v36 = vpop.f32.mrb[18].mxu1 }
 0x48e   :  { %1527 = vrot.lane.b32.xlu1 %v1522_v36, %s2280_s24  ;;  %v2119_v37 = vpop.f32.mrb[19].mxu1 }
 0x4bb   :  { %v486_v38 = vpop.permute.xlu0 %485 }
 0x4bc   :  { %489 = vst.msk [vmem:[#allocation3] sm:$0xff] %vm488_vm4, %v486_v38 }
 0x4bf   :  { %v661_v39 = vpop.permute.xlu1 %660 }
 0x4c0   :  { %664 = vst.msk [vmem:[#allocation3] sm:$0xff] %vm663_vm5, %v661_v39 }
 0x4c3   :  { %v836_v40 = vpop.permute.xlu1 %835 }
 0x4c4   :  { %839 = vst.msk [vmem:[#allocation3] sm:$0xff] %vm838_vm6, %v836_v40 }
 0x4cb   :  { %v1531_v41 = vld [vmem:[#allocation3] sm:$0xff] }
 0x4cc   :  { %2128 = vmatprep.mubr.msk.f32.mxu0 %vm60_vm0, %v1531_v41 }
 0x4f8   :  { %v1180_v42 = vpop.permute.xlu0 %1179 }
 0x4f9   :  { %1182 = vst.msk [vmem:[#allocation3 + $0x8] sm:$0xff] %vm488_vm4, %v1180_v42 }
 0x4fc   :  { %v1354_v43 = vpop.permute.xlu0 %1353 }
 0x4fd   :  { %1356 = vst.msk [vmem:[#allocation3 + $0x8] sm:$0xff] %vm663_vm5, %v1354_v43 }
 0x500   :  { %v1528_v44 = vpop.permute.xlu1 %1527 }
 0x501   :  { %1530 = vst.msk [vmem:[#allocation3 + $0x8] sm:$0xff] %vm838_vm6, %v1528_v44 }
 0x508   :  { %v1532_v45 = vld [vmem:[#allocation3 + $0x8] sm:$0xff] }
 0x509   :  { %2129 = vmatmul.mubr.msk.f32.vlgmr.msra.gmra.mrb[14].mxu0 %vm60_vm0, %v1532_v45 }
 0x50a   :  { %2188 = vmatpush3.bf16.msra.mxu0 %v2185_v25 }
 0x50b   :  { %2190 = vmatprep.subr.bf16.mxu0 %v2189_v28 }
 0x50e   :  { %2192 = vmatpush3.bf16.msra.mxu0 %v2189_v28 }
 0x50f   :  { %2194 = vmatprep.subr.bf16.mxu0 %v2193_v31 }
 0x512   :  { %2196 = vmatpush3.bf16.msra.mxu0 %v2193_v31 }
 0x513   :  { %2198 = vmatprep.subr.bf16.mxu0 %v2197_v34 }
 0x516   :  { %2200 = vmatpush3.bf16.msra.mxu0 %v2197_v34 }
 0x5dc   :  { %v2130_v47 = vpop.f32.mrb[14].mxu0 }
 0x5dd   :  { %v1622_v48 = vadd.f32 %v2130_v47, %v1954_v46  ;;  %v1616_v49 = vpop.f32.mrb[15].mxu0 }
 0x5de   :  { %v1617_v50 = vadd.f32 %v1954_v46, %v1616_v49 }
 0x5df   :  { %v1626_v51 = vadd.f32 %v1622_v48, %v2378_v7 }
 0x5e0   :  { %v1625_v52 = vadd.f32 %v1617_v50, %v2371_v5  ;;  %v1672_v5 = vld [vmem:[%s2627_s8] sm:$0xff] }
 0x5e1   :  { %v1632_v53 = vsel %vm60_vm0, %v1626_v51, 0.0  ;;  %v2177_v0 = vpack.c.bf16 %v1673_v63, %v1672_v5  ;;  %v1964_v50 = vld [vmem:[%s2632_s11] ss:$0 sm:$0xff] }
 0x5e2   :  { %1633 = vadd.xlane.f32.xlu1 %v1632_v53  ;;  %v1629_v54 = vsel %vm60_vm0, %v1625_v52, 0.0 }
 0x5e3   :  { %1630 = vadd.xlane.f32.xlu0 %v1629_v54  ;;  %2178 = vmatprep.subr.bf16.mxu1 %v2177_v0 }
 0x5e4   :  { %2180 = vmatpush3.bf16.msra.mxu1 %v2177_v0 }
 0x5e5   :  { %2182 = vmatprep.subr.bf16.mxu1 %v2181_v3 }
 0x5e8   :  { %2184 = vmatpush3.bf16.msra.mxu1 %v2181_v3 }
 0x66f   :  { %v1634_v55 = vpop.xlane.xlu1 %1633 }
 0x670   :  { %v1637_v56 = vmul.f32 0.03125, %v1634_v55  ;;  %v1631_v16 = vpop.xlane.xlu0 %1630 }
 0x671   :  { %v1636_v57 = vmul.f32 0.03125, %v1631_v16 }
 0x672   :  { %v1639_v58 = vsub.f32 %v1626_v51, %v1637_v56 }
 0x673   :  { %v1638_v59 = vsub.f32 %v1625_v52, %v1636_v57 }
 0x674   :  { %v1641_v62 = vmul.f32 %v1639_v58, %v1639_v58 }
 0x675   :  { %v1640_v60 = vmul.f32 %v1638_v59, %v1638_v59 }
 0x676   :  { %v1645_v7 = vsel %vm60_vm0, %v1641_v62, 0.0 }
 0x677   :  { %v1642_v61 = vsel %vm60_vm0, %v1640_v60, 0.0 }
 0x678   :  { %1643 = vadd.xlane.f32.xlu0 %v1642_v61 }
 0x67c   :  { %1646 = vadd.xlane.f32.xlu0 %v1645_v7 }
 0x705   :  { %v1644_v4 = vpop.xlane.xlu0 %1643 }
 0x706   :  { %v1648_v6 = vmul.f32 0.03125, %v1644_v4 }
 0x708   :  { %v1650_v9 = vadd.f32 1e-05, %v1648_v6 }
 0x709   :  { %v1647_v10 = vpop.xlane.xlu0 %1646 }
 0x70a   :  { %2249 = vrsqrt.f32 %v1650_v9  ;;  %v1649_v11 = vmul.f32 0.03125, %v1647_v10 }
 0x70c   :  { %v1651_v12 = vadd.f32 1e-05, %v1649_v11 }
 0x70e   :  { %2251 = vrsqrt.f32 %v1651_v12  ;;  %v1967_v12 = vld [vmem:[%s2633_s12] ss:$0 sm:$0xff] }
 0x714   :  { %v2250_v13 = vpop.eup %2249 }
 0x715   :  { %v1654_v17 = vmul.f32 %v2250_v13, %v1638_v59 }
 0x717   :  { %v1662_v19 = vmul.f32 %v1957_v15, %v1654_v17  ;;  %v1968_v17 = vld [vmem:[%s2634_s13] ss:$0 sm:$0xff] }
 0x718   :  { %v2252_v20 = vpop.eup %2251 }
 0x719   :  { %v1655_v21 = vmul.f32 %v2252_v20, %v1639_v58  ;;  %v1670_v14 = vadd.f32 %v1958_v18, %v1662_v19 }
 0x71b   :  { %v1663_v22 = vmul.f32 %v1957_v15, %v1655_v21  ;;  %2139 = vmatprep.mubr.msk.f32.mxu1 %vm60_vm0, %v1670_v14 }
 0x71d   :  { %v1671_v23 = vadd.f32 %v1958_v18, %v1663_v22 }
 0x71f   :  { %2140 = vmatmul.mubr.msk.f32.vlgmr.msra.gmra.mrb[20].mxu1 %vm60_vm0, %v1671_v23 }
 0x7f2   :  { %v2141_v36 = vpop.f32.mrb[20].mxu1 }
 0x7f3   :  { %v1761_v37 = vadd.f32 %v2141_v36, %v1959_v35  ;;  %v1755_v38 = vpop.f32.mrb[21].mxu1 }
 0x7f4   :  { %v1756_v39 = vadd.f32 %v1959_v35, %v1755_v38 }
 0x7f5   :  { %v1963_v40 = vmul.f32 -1.442695, %v1761_v37 }
 0x7f6   :  { %v1962_v41 = vmul.f32 -1.442695, %v1756_v39 }
 0x7f7   :  { %2253 = vpow2.f32 %v1963_v40 }
 0x7f8   :  { %2255 = vpow2.f32 %v1962_v41 }
 0x801   :  { %v2254_v42 = vpop.eup %2253 }
 0x802   :  { %v2256_v43 = vpop.eup %2255  ;;  %v1771_v44 = vadd.f32 1.0, %v2254_v42 }
 0x803   :  { %v1770_v45 = vadd.f32 1.0, %v2256_v43 }
 0x804   :  { %2257 = vrcp.f32 %v1771_v44 }
 0x805   :  { %2259 = vrcp.f32 %v1770_v45 }
 0x80e   :  { %v2258_v46 = vpop.eup %2257 }
 0x80f   :  { %v2260_v47 = vpop.eup %2259  ;;  %v1777_v49 = vmul.f32 %v2258_v46, %v1761_v37 }
 0x810   :  { %v1776_v48 = vmul.f32 %v2260_v47, %v1756_v39 }
 0x812   :  { %2158 = vmatprep.mubr.msk.f32.mxu0 %vm1793_vm7, %v1776_v48 }
 0x813   :  { %2159 = vmatmul.mubr.msk.f32.vlgmr.msra.gmra.mrb[16].mxu0 %vm1793_vm7, %v1777_v49 }
 0x8e6   :  { %v2160_v51 = vpop.f32.mrb[16].mxu0 }
 0x8e7   :  { %v1872_v52 = vadd.f32 %v2160_v51, %v1964_v50  ;;  %v1866_v53 = vpop.f32.mrb[17].mxu0 }
 0x8e8   :  { %v1867_v54 = vadd.f32 %v1964_v50, %v1866_v53 }
 0x8e9   :  { %v1876_v55 = vadd.f32 %v1872_v52, %v1671_v23 }
 0x8ea   :  { %v1875_v56 = vadd.f32 %v1867_v54, %v1670_v14 }
 0x8eb   :  { %v1882_v16 = vsel %vm60_vm0, %v1876_v55, 0.0 }
 0x8ec   :  { %1883 = vadd.xlane.f32.xlu0 %v1882_v16  ;;  %v1879_v57 = vsel %vm60_vm0, %v1875_v56, 0.0 }
 0x8ed   :  { %1880 = vadd.xlane.f32.xlu1 %v1879_v57 }
 0x979   :  { %v1884_v58 = vpop.xlane.xlu0 %1883 }
 0x97a   :  { %v1886_v59 = vmul.f32 0.03125, %v1884_v58  ;;  %v1881_v60 = vpop.xlane.xlu1 %1880 }
 0x97b   :  { %v1885_v61 = vmul.f32 0.03125, %v1881_v60 }
 0x97c   :  { %v1888_v62 = vsub.f32 %v1876_v55, %v1886_v59 }
 0x97d   :  { %v1887_v7 = vsub.f32 %v1875_v56, %v1885_v61 }
 0x97e   :  { %v1890_v5 = vmul.f32 %v1888_v62, %v1888_v62 }
 0x97f   :  { %v1889_v63 = vmul.f32 %v1887_v7, %v1887_v7 }
 0x980   :  { %v1894_v0 = vsel %vm60_vm0, %v1890_v5, 0.0 }
 0x981   :  { %1895 = vadd.xlane.f32.xlu0 %v1894_v0  ;;  %v1891_v1 = vsel %vm60_vm0, %v1889_v63, 0.0 }
 0x982   :  { %1892 = vadd.xlane.f32.xlu1 %v1891_v1 }
 0xa0e   :  { %v1896_v2 = vpop.xlane.xlu0 %1895 }
 0xa0f   :  { %v1898_v3 = vmul.f32 0.03125, %v1896_v2  ;;  %v1893_v4 = vpop.xlane.xlu1 %1892 }
 0xa10   :  { %v1897_v6 = vmul.f32 0.03125, %v1893_v4 }
 0xa11   :  { %v1900_v9 = vadd.f32 1e-05, %v1898_v3 }
 0xa12   :  { %v1899_v10 = vadd.f32 1e-05, %v1897_v6 }
 0xa13   :  { %2261 = vrsqrt.f32 %v1900_v9 }
 0xa14   :  { %2263 = vrsqrt.f32 %v1899_v10 }
 0xa1d   :  { %v2262_v11 = vpop.eup %2261 }
 0xa1e   :  { %v2264_v13 = vpop.eup %2263  ;;  %v1904_v15 = vmul.f32 %v2262_v11, %v1888_v62 }
 0xa1f   :  { %v1903_v18 = vmul.f32 %v2264_v13, %v1887_v7 }
 0xa20   :  { %v1912_v19 = vmul.f32 %v1967_v12, %v1904_v15 }
 0xa21   :  { %v1911_v20 = vmul.f32 %v1967_v12, %v1903_v18 }
 0xa22   :  { %v1920_v21 = vadd.f32 %v1968_v17, %v1912_v19 }
 0xa23   :  { %v1919_v14 = vadd.f32 %v1968_v17, %v1911_v20 }
 0xa24   :  { %1922 = vst.msk [vmem:[%s2635_s14 + $0x8] sm:$0xff] %vm60_vm0, %v1920_v21 }
 0xa25   :  { %1921 = vst.msk [vmem:[%s2635_s14] sm:$0xff] %vm60_vm0, %v1919_v14 }

// kernel: mt_forward.7
= control target key start
LH: loop header
LB: loop body
LE: loop exit
PB: predicated region body
PF: predicated region fallthrough
CT: control target
= control target key end

     0   :  { %vm92_vm0 = vcmask 261120   ;;  %v4269_v8 = vmov 0.0   ;;  %vm174_vm1 = vcmask 785408   ;;  %vm4270_vm2 = vmmov 0   ;;  %s4272_s28 = smov 120   ;;  %s4275_s29 = smov 112   ;;  %s4946_s4 = inlined_call_operand.vmem [shape: f32[32,96], index: 4, kind: input, shape index: {}]   ;;  %s4947_s0 = inlined_call_operand.vmem [shape: f32[16,32], index: 0, kind: input, shape index: {}]   ;;  %s4948_s5 = inlined_call_operand.vmem [shape: f32[1,96], index: 5, kind: input, shape index: {}]   ;;  %s4949_s2 = inlined_call_operand.vmem [shape: f32[16,8], index: 2, kind: input, shape index: {}]   ;;  %s4950_s6 = inlined_call_operand.vmem [shape: f32[32,32], index: 6, kind: input, shape index: {}]   ;;  %s4951_s7 = inlined_call_operand.vmem [shape: f32[1,32], index: 7, kind: input, shape index: {}]   ;;  %s4952_s12 = inlined_call_operand.vmem [shape: f32[32,64], index: 12, kind: input, shape index: {}]   ;;  %s4953_s10 = inlined_call_operand.vmem [shape: f32[32,32], index: 10, kind: input, shape index: {}]   ;;  %s4954_s1 = inlined_call_operand.vmem [shape: f32[16,32], index: 1, kind: input, shape index: {}]   ;;  %s4955_s8 = inlined_call_operand.vmem [shape: f32[1,32], index: 8, kind: input, shape index: {}]   ;;  %s4956_s9 = inlined_call_operand.vmem [shape: f32[1,32], index: 9, kind: input, shape index: {}]   ;;  %s4957_s13 = inlined_call_operand.vmem [shape: f32[1,64], index: 13, kind: input, shape index: {}]   ;;  %s4958_s11 = inlined_call_operand.vmem [shape: f32[1,32], index: 11, kind: input, shape index: {}]   ;;  %s4959_s3 = inlined_call_operand.vmem [shape: f32[16,8], index: 3, kind: input, shape index: {}]   ;;  %s4960_s14 = inlined_call_operand.vmem [shape: f32[32,32], index: 14, kind: input, shape index: {}]   ;;  %s4961_s15 = inlined_call_operand.vmem [shape: f32[1,32], index: 15, kind: input, shape index: {}]   ;;  %s4962_s18 = inlined_call_operand.vmem [shape: f32[32,64], index: 18, kind: input, shape index: {}]   ;;  %s4963_s16 = inlined_call_operand.vmem [shape: f32[1,32], index: 16, kind: input, shape index: {}]   ;;  %s4964_s17 = inlined_call_operand.vmem [shape: f32[1,32], index: 17, kind: input, shape index: {}]   ;;  %s4965_s20 = inlined_call_operand.vmem [shape: f32[64,32], index: 20, kind: input, shape index: {}]   ;;  %s4966_s19 = inlined_call_operand.vmem [shape: f32[1,64], index: 19, kind: input, shape index: {}]   ;;  %s4967_s21 = inlined_call_operand.vmem [shape: f32[1,32], index: 21, kind: input, shape index: {}]   ;;  %s4968_s22 = inlined_call_operand.vmem [shape: f32[1,32], index: 22, kind: input, shape index: {}]   ;;  %s4969_s23 = inlined_call_operand.vmem [shape: f32[1,32], index: 23, kind: input, shape index: {}]   ;;  %s4970_s24 = inlined_call_operand.vmem [shape: f32[16,32], index: 24, kind: output, shape index: {}]  }
   0x1   :  { %4992 = sst [smem:[#allocation6_spill]] %s4946_s4  ;;  %3881 = vmatprep.subr.mxu0 %v4269_v8  ;;  %3883 = vmatprep.mubr.msk.f32.mxu0 %vm4270_vm2, %v4269_v8  ;;  %s4278_s30 = smov 64   ;;  %vm183_vm3 = vcmask 64512   ;;  %vm520_vm4 = vcmask 130112   ;;  %vm695_vm5 = vcmask 195712   ;;  %vm870_vm6 = vcmask 261312  }
   0x2   :  { %4993 = sst [smem:[#allocation7_spill]] %s4947_s0  ;;  %s5001_s27 = sld [smem:[#allocation6_spill]]  ;;  %vm1890_vm7 = vcmask 523264  }
   0x3   :  { %4994 = sst [smem:[#allocation8_spill]] %s4948_s5  ;;  %s5002_s4 = sld [smem:[#allocation7_spill]] }
   0x4   :  { %4995 = sst [smem:[#allocation9_spill]] %s4949_s2  ;;  %s5003_s26 = sld [smem:[#allocation8_spill]] }
   0x5   :  { %4996 = sst [smem:[#allocation10_spill]] %s4950_s6  ;;  %s4978_s5 = smov 80  }
   0x6   :  { %4997 = sst [smem:[#allocation11_spill]] %s4951_s7  ;;  %s4980_s2 = smov 72  }
   0x7   :  { %4998 = sst [smem:[#allocation12_spill]] %s4952_s12  ;;  %s4984_s12 = smov 88  }
   0x8   :  { %4999 = sst [smem:[#allocation13_spill]] %s4953_s10  ;;  %v81_v0 = vld [vmem:[%s5001_s27] sm:$0xff]  ;;  %v82_v1 = vld [vmem:[%s5001_s27 + $0x8] sm:$0xff]  ;;  %v83_v2 = vld [vmem:[%s5001_s27 + $0x10] sm:$0xff]  ;;  %s4277_s10 = smov 104  }
   0x9   :  { %5000 = sst [smem:[#allocation14_spill]] %s4954_s1  ;;  %v4105_v3 = vpack.c.bf16 %v82_v1, %v81_v0  ;;  %v84_v4 = vld [vmem:[%s5001_s27 + $0x18] sm:$0xff]  ;;  %v4425_v5 = vld [vmem:[%s5002_s4] sm:$0xff]  ;;  %v4432_v7 = vld [vmem:[%s5002_s4 + $0x8] sm:$0xff]  ;;  %s4982_s27 = smov 96  }
   0xa   :  { %v4109_v6 = vpack.c.bf16 %v84_v4, %v83_v2  ;;  %3868 = vmatprep.mubr.msk.f32.mxu1 %vm92_vm0, %v4425_v5  ;;  %v3673_v9 = vld [vmem:[%s5003_s26] ss:$0 sm:$0xff]  ;;  %s4279_s1 = smov 56   ;;  %s5004_s6 = sld [smem:[#allocation9_spill]] }
   0xb   :  { %4106 = vmatprep.subr.bf16.mxu1 %v4105_v3  ;;  %s4280_s26 = smov 40   ;;  %s4281_s4 = smov 48  }
   0xc   :  { %4108 = vmatpush3.bf16.msra.mxu1 %v4105_v3  ;;  %s4986_s25 = smov 24   ;;  %s5005_s7 = sld [smem:[#allocation10_spill]] }
   0xd   :  { %4110 = vmatprep.subr.bf16.mxu1 %v4109_v6  ;;  %s5007_s0 = sld [smem:[#allocation12_spill]] }
  0x10   :  { %4112 = vmatpush3.bf16.msra.mxu1 %v4109_v6  ;;  %v177_v33 = vld [vmem:[%s5004_s6] sm:$0xff]  ;;  %v872_v49 = vld [vmem:[%s5004_s6 + $0x8] sm:$0xff]  ;;  %s5008_s6 = sld [smem:[#allocation13_spill]] }
  0x11   :  { %3871 = vmatprep.subr.mxu1 %v4269_v8 }
  0x13   :  { %3869 = vmatmul.mubr.msk.f32.vlgmr.msra.gmra.mrb[0].mxu1 %vm92_vm0, %v4432_v7 }
  0x14   :  { %3873 = vmatprep.mubr.msk.f32.mxu1 %vm4270_vm2, %v4269_v8 }
  0xe6   :  { %v3870_v10 = vpop.f32.mrb[0].mxu1 }
  0xe7   :  { %v171_v11 = vadd.f32 %v3870_v10, %v3673_v9  ;;  %v165_v12 = vpop.f32.mrb[1].mxu1 }
  0xe8   :  { %v166_v13 = vadd.f32 %v3673_v9, %v165_v12 }
  0xe9   :  { %176 = vst.msk [vmem:[#allocation2 + $0x8] sm:$0xff] %vm174_vm1, %v171_v11 }
  0xea   :  { %175 = vst.msk [vmem:[#allocation2] sm:$0xff] %vm174_vm1, %v166_v13 }
  0xf0   :  { %v4459_v16 = vld [vmem:[#allocation2 + $0x8] sm:$0xff] }
  0xf1   :  { %v4445_v14 = vld [vmem:[#allocation2] sm:$0xff]  ;;  %v874_v17 = vmul.f32 0.35355338, %v4459_v16 }
  0xf2   :  { %181 = vrot.lane.b32.xlu0 %v4445_v14, %s4982_s27  ;;  %v179_v15 = vmul.f32 0.35355338, %v4445_v14 }
  0xf4   :  { %350 = vrot.lane.b32.xlu1 %v179_v15, %s4272_s28 }
  0xf6   :  { %353 = vrot.lane.b32.xlu0 %v4445_v14, %s4984_s12 }
  0xf8   :  { %528 = vrot.lane.b32.xlu1 %v4445_v14, %s4978_s5 }
  0xfa   :  { %525 = vrot.lane.b32.xlu0 %v179_v15, %s4275_s29 }
  0xfc   :  { %703 = vrot.lane.b32.xlu1 %v4445_v14, %s4980_s2 }
  0xfe   :  { %700 = vrot.lane.b32.xlu0 %v179_v15, %s4277_s10 }
 0x100   :  { %876 = vrot.lane.b32.xlu1 %v4459_v16, %s4982_s27  ;;  %s5013_s27 = smov 80  }
 0x102   :  { %1047 = vrot.lane.b32.xlu0 %v4459_v16, %s4984_s12  ;;  %s5016_s12 = smov 24  }
 0x104   :  { %1044 = vrot.lane.b32.xlu1 %v874_v17, %s4272_s28 }
 0x106   :  { %1221 = vrot.lane.b32.xlu0 %v4459_v16, %s4978_s5  ;;  %s5006_s5 = sld [smem:[#allocation11_spill]] }
 0x108   :  { %1218 = vrot.lane.b32.xlu1 %v874_v17, %s4275_s29 }
 0x10a   :  { %1395 = vrot.lane.b32.xlu0 %v4459_v16, %s4980_s2 }
 0x10c   :  { %1392 = vrot.lane.b32.xlu1 %v874_v17, %s4277_s10 }
 0x10e   :  { %270 = vrot.lane.b32.xlu0 %v4445_v14, %s4278_s30 }
 0x110   :  { %440 = vrot.lane.b32.xlu1 %v4445_v14, %s4279_s1 }
 0x164   :  { %v182_v18 = vpop.permute.xlu0 %181 }
 0x165   :  { %3872 = vmatpush3.xpose.msk.msra.mxu1 %vm183_vm3, %v182_v18 }
 0x166   :  { %v351_v19 = vpop.permute.xlu1 %350  ;;  %3876 = vmatprep.subr.mxu1 %v4269_v8 }
 0x168   :  { %v354_v20 = vpop.permute.xlu0 %353  ;;  %3874 = vmatmul.mubr.msk.f32.vlgmr.msra.gmra.mrb[2].mxu1 %vm183_vm3, %v179_v15 }
 0x169   :  { %3882 = vmatpush3.xpose.msk.msra.mxu0 %vm183_vm3, %v354_v20  ;;  %3878 = vmatprep.mubr.msk.f32.mxu1 %vm4270_vm2, %v4269_v8 }
 0x16a   :  { %v529_v21 = vpop.permute.xlu1 %528  ;;  %3891 = vmatprep.subr.mxu0 %v4269_v8 }
 0x16c   :  { %3884 = vmatmul.mubr.msk.f32.vlgmr.msra.gmra.mrb[0].mxu0 %vm183_vm3, %v351_v19  ;;  %v526_v22 = vpop.permute.xlu0 %525 }
 0x16d   :  { %3892 = vmatpush3.xpose.msk.msra.mxu0 %vm183_vm3, %v529_v21  ;;  %3893 = vmatprep.mubr.msk.f32.mxu0 %vm4270_vm2, %v4269_v8 }
 0x16e   :  { %v704_v23 = vpop.permute.xlu1 %703  ;;  %3901 = vmatprep.subr.mxu0 %v4269_v8 }
 0x170   :  { %3894 = vmatmul.mubr.msk.f32.vlgmr.msra.gmra.mrb[2].mxu0 %vm183_vm3, %v526_v22  ;;  %v701_v24 = vpop.permute.xlu0 %700 }
 0x171   :  { %3902 = vmatpush3.xpose.msk.msra.mxu0 %vm183_vm3, %v704_v23  ;;  %3903 = vmatprep.mubr.msk.f32.mxu0 %vm4270_vm2, %v4269_v8 }
 0x172   :  { %v877_v25 = vpop.permute.xlu1 %876  ;;  %3911 = vmatprep.subr.mxu0 %v4269_v8 }
 0x174   :  { %3904 = vmatmul.mubr.msk.f32.vlgmr.msra.gmra.mrb[4].mxu0 %vm183_vm3, %v701_v24  ;;  %v1048_v26 = vpop.permute.xlu0 %1047 }
 0x175   :  { %3912 = vmatpush3.xpose.msk.msra.mxu0 %vm183_vm3, %v877_v25  ;;  %3913 = vmatprep.mubr.msk.f32.mxu0 %vm4270_vm2, %v4269_v8 }
 0x176   :  { %3921 = vmatprep.subr.mxu0 %v4269_v8  ;;  %v1045_v27 = vpop.permute.xlu1 %1044 }
 0x178   :  { %3914 = vmatmul.mubr.msk.f32.vlgmr.msra.gmra.mrb[6].mxu0 %vm183_vm3, %v874_v17  ;;  %v1222_v28 = vpop.permute.xlu0 %1221 }
 0x179   :  { %3922 = vmatpush3.xpose.msk.msra.mxu0 %vm183_vm3, %v1048_v26  ;;  %3923 = vmatprep.mubr.msk.f32.mxu0 %vm4270_vm2, %v4269_v8 }
 0x17a   :  { %3931 = vmatprep.subr.mxu0 %v4269_v8  ;;  %v1219_v30 = vpop.permute.xlu1 %1218 }
 0x17c   :  { %3924 = vmatmul.mubr.msk.f32.vlgmr.msra.gmra.mrb[8].mxu0 %vm183_vm3, %v1045_v27  ;;  %v1396_v29 = vpop.permute.xlu0 %1395 }
 0x17d   :  { %3932 = vmatpush3.xpose.msk.msra.mxu0 %vm183_vm3, %v1222_v28  ;;  %3933 = vmatprep.mubr.msk.f32.mxu0 %vm4270_vm2, %v4269_v8 }
 0x17e   :  { %3941 = vmatprep.subr.mxu0 %v4269_v8  ;;  %v1393_v32 = vpop.permute.xlu1 %1392 }
 0x180   :  { %3934 = vmatmul.mubr.msk.f32.vlgmr.msra.gmra.mrb[10].mxu0 %vm183_vm3, %v1219_v30  ;;  %v271_v31 = vpop.permute.xlu0 %270 }
 0x181   :  { %3877 = vmatpush3.msra.mxu1 %v271_v31  ;;  %3942 = vmatpush3.xpose.msk.msra.mxu0 %vm183_vm3, %v1396_v29 }
 0x182   :  { %3943 = vmatprep.mubr.msk.f32.mxu0 %vm4270_vm2, %v4269_v8  ;;  %3886 = vmatprep.subr.mxu1 %v4269_v8  ;;  %v4533_v3 = vpop.permute.xlu1 %440 }
 0x184   :  { %3944 = vmatmul.mubr.msk.f32.vlgmr.msra.gmra.mrb[12].mxu0 %vm183_vm3, %v1393_v32 }
 0x23b   :  { %v255_v34 = vpop.f32.mrb[2].mxu1 }
 0x23c   :  { %v256_v35 = vadd.f32 %v255_v34, %v177_v33  ;;  %v3875_v36 = vpop.f32.mrb[3].mxu1 }
 0x23e   :  { %v259_v37 = vsel %vm183_vm3, %v256_v35, -inf }
 0x23f   :  { %v425_v38 = vpop.f32.mrb[0].mxu0  ;;  %260 = vmax.xlane.f32.xlu0 %v259_v37 }
 0x240   :  { %v426_v39 = vadd.f32 %v425_v38, %v177_v33  ;;  %v3885_v40 = vpop.f32.mrb[1].mxu0 }
 0x242   :  { %v429_v41 = vsel %vm183_vm3, %v426_v39, -inf }
 0x243   :  { %430 = vmax.xlane.f32.xlu1 %v429_v41  ;;  %v600_v42 = vpop.f32.mrb[2].mxu0 }
 0x244   :  { %v601_v43 = vadd.f32 %v600_v42, %v177_v33  ;;  %v3895_v44 = vpop.f32.mrb[3].mxu0 }
 0x246   :  { %v604_v45 = vsel %vm183_vm3, %v601_v43, -inf }
 0x247   :  { %v775_v46 = vpop.f32.mrb[4].mxu0  ;;  %605 = vmax.xlane.f32.xlu0 %v604_v45 }
 0x248   :  { %v776_v47 = vadd.f32 %v775_v46, %v177_v33  ;;  %v3905_v48 = vpop.f32.mrb[5].mxu0 }
 0x24a   :  { %v779_v50 = vsel %vm183_vm3, %v776_v47, -inf }
 0x24b   :  { %v949_v51 = vpop.f32.mrb[6].mxu0  ;;  %780 = vmax.xlane.f32.xlu0 %v779_v50 }
 0x24c   :  { %v950_v52 = vadd.f32 %v949_v51, %v872_v49  ;;  %v3915_v53 = vpop.f32.mrb[7].mxu0 }
 0x24e   :  { %v953_v54 = vsel %vm183_vm3, %v950_v52, -inf }
 0x24f   :  { %954 = vmax.xlane.f32.xlu1 %v953_v54  ;;  %v1119_v55 = vpop.f32.mrb[8].mxu0 }
 0x250   :  { %v1120_v56 = vadd.f32 %v1119_v55, %v872_v49  ;;  %v3925_v57 = vpop.f32.mrb[9].mxu0 }
 0x252   :  { %v1123_v58 = vsel %vm183_vm3, %v1120_v56, -inf }
 0x253   :  { %v1293_v59 = vpop.f32.mrb[10].mxu0  ;;  %1124 = vmax.xlane.f32.xlu0 %v1123_v58 }
 0x254   :  { %v1294_v60 = vadd.f32 %v1293_v59, %v872_v49  ;;  %v3935_v61 = vpop.f32.mrb[11].mxu0 }
 0x256   :  { %v1297_v62 = vsel %vm183_vm3, %v1294_v60, -inf }
 0x257   :  { %1298 = vmax.xlane.f32.xlu1 %v1297_v62  ;;  %v1467_v63 = vpop.f32.mrb[12].mxu0 }
 0x258   :  { %v1468_v0 = vadd.f32 %v1467_v63, %v872_v49  ;;  %v3945_v1 = vpop.f32.mrb[13].mxu0 }
 0x25a   :  { %v1471_v2 = vsel %vm183_vm3, %v1468_v0, -inf }
 0x25b   :  { %1472 = vmax.xlane.f32.xlu0 %v1471_v2 }
 0x268   :  { %790 = vrot.lane.b32.xlu1 %v4445_v14, %s4280_s26 }
 0x271   :  { %615 = vrot.lane.b32.xlu0 %v4445_v14, %s4281_s4 }
 0x2cc   :  { %v261_v4 = vpop.xlane.xlu0 %260 }
 0x2cd   :  { %v262_v6 = vsub.f32 %v256_v35, %v261_v4 }
 0x2cf   :  { %v263_v9 = vmul.f32 1.442695, %v262_v6 }
 0x2d0   :  { %v431_v10 = vpop.xlane.xlu1 %430 }
 0x2d1   :  { %4185 = vpow2.f32 %v263_v9  ;;  %v432_v11 = vsub.f32 %v426_v39, %v431_v10 }
 0x2d3   :  { %v433_v12 = vmul.f32 1.442695, %v432_v11 }
 0x2d4   :  { %v606_v13 = vpop.xlane.xlu0 %605 }
 0x2d5   :  { %4187 = vpow2.f32 %v433_v12  ;;  %v607_v15 = vsub.f32 %v601_v43, %v606_v13 }
 0x2d7   :  { %v608_v17 = vmul.f32 1.442695, %v607_v15 }
 0x2d8   :  { %v781_v18 = vpop.xlane.xlu0 %780 }
 0x2d9   :  { %4189 = vpow2.f32 %v608_v17  ;;  %v782_v19 = vsub.f32 %v776_v47, %v781_v18 }
 0x2db   :  { %v4186_v20 = vpop.eup %4185  ;;  %v783_v21 = vmul.f32 1.442695, %v782_v19 }
 0x2dc   :  { %v265_v14 = vsel %vm183_vm3, %v4186_v20, 0.0  ;;  %v955_v28 = vpop.xlane.xlu1 %954 }
 0x2dd   :  { %4191 = vpow2.f32 %v783_v21  ;;  %266 = vadd.xlane.f32.xlu1 %v265_v14  ;;  %v956_v29 = vsub.f32 %v950_v52, %v955_v28 }
 0x2df   :  { %v4188_v22 = vpop.eup %4187  ;;  %v957_v33 = vmul.f32 1.442695, %v956_v29 }
 0x2e0   :  { %v435_v23 = vsel %vm183_vm3, %v4188_v22, 0.0  ;;  %v1125_v30 = vpop.xlane.xlu0 %1124 }
 0x2e1   :  { %436 = vadd.xlane.f32.xlu0 %v435_v23  ;;  %v1126_v32 = vsub.f32 %v1120_v56, %v1125_v30  ;;  %4193 = vpow2.f32 %v957_v33  ;;  %v1567_v30 = vld [vmem:[%s5005_s7 + $0x10] sm:$0xff] }
 0x2e3   :  { %v4190_v24 = vpop.eup %4189  ;;  %v1127_v36 = vmul.f32 1.442695, %v1126_v32 }
 0x2e4   :  { %v610_v25 = vsel %vm183_vm3, %v4190_v24, 0.0  ;;  %v1299_v31 = vpop.xlane.xlu1 %1298 }
 0x2e5   :  { %611 = vadd.xlane.f32.xlu1 %v610_v25  ;;  %v1300_v34 = vsub.f32 %v1294_v60, %v1299_v31  ;;  %4195 = vpow2.f32 %v1127_v36  ;;  %v1565_v25 = vld [vmem:[%s5005_s7] sm:$0xff]  ;;  %v1568_v31 = vld [vmem:[%s5005_s7 + $0x18] sm:$0xff] }
 0x2e6   :  { %v4117_v32 = vpack.c.bf16 %v1568_v31, %v1567_v30 }
 0x2e7   :  { %v4538_v26 = vpop.eup %4191  ;;  %v1301_v37 = vmul.f32 1.442695, %v1300_v34 }
 0x2e8   :  { %v785_v27 = vsel %vm183_vm3, %v4538_v26, 0.0  ;;  %v1473_v35 = vpop.xlane.xlu0 %1472  ;;  %v791_v48 = vpop.permute.xlu1 %790 }
 0x2e9   :  { %786 = vadd.xlane.f32.xlu0 %v785_v27  ;;  %v1474_v38 = vsub.f32 %v1468_v0, %v1473_v35  ;;  %4197 = vpow2.f32 %v1301_v37 }
 0x2eb   :  { %v1475_v39 = vmul.f32 1.442695, %v1474_v38  ;;  %v4194_v40 = vpop.eup %4193 }
 0x2ec   :  { %v959_v42 = vsel %vm183_vm3, %v4194_v40, 0.0  ;;  %v616_v49 = vpop.permute.xlu0 %615 }
 0x2ed   :  { %4199 = vpow2.f32 %v1475_v39 }
 0x2ef   :  { %v4546_v41 = vpop.eup %4195 }
 0x2f0   :  { %v1129_v45 = vsel %vm183_vm3, %v4546_v41, 0.0 }
 0x2f3   :  { %v4549_v43 = vpop.eup %4197 }
 0x2f4   :  { %v1303_v44 = vsel %vm183_vm3, %v4549_v43, 0.0 }
 0x2f6   :  { %1134 = vrot.lane.b32.xlu1 %v4459_v16, %s4279_s1  ;;  %s4988_s1 = smov 16  }
 0x2f7   :  { %v4555_v46 = vpop.eup %4199 }
 0x2f8   :  { %v1477_v47 = vsel %vm183_vm3, %v4555_v46, 0.0 }
 0x2ff   :  { %964 = vrot.lane.b32.xlu0 %v4459_v16, %s4278_s30  ;;  %s4990_s30 = smov 8  }
 0x31a   :  { %960 = vadd.xlane.f32.xlu1 %v959_v42 }
 0x31e   :  { %1304 = vadd.xlane.f32.xlu1 %v1303_v44  ;;  %1130 = vadd.xlane.f32.xlu0 %v1129_v45 }
 0x322   :  { %1478 = vadd.xlane.f32.xlu1 %v1477_v47  ;;  %v3700_v47 = vld [vmem:[%s5006_s5] ss:$0 sm:$0xff] }
 0x333   :  { %1482 = vrot.lane.b32.xlu1 %v4459_v16, %s4280_s26 }
 0x334   :  { %1308 = vrot.lane.b32.xlu0 %v4459_v16, %s4281_s4  ;;  %s5009_s4 = sld [smem:[#allocation14_spill]] }
 0x36a   :  { %v267_v50 = vpop.xlane.xlu1 %266 }
 0x36b   :  { %4201 = vrcp.f32 %v267_v50 }
 0x36e   :  { %v437_v51 = vpop.xlane.xlu0 %436 }
 0x36f   :  { %4203 = vrcp.f32 %v437_v51 }
 0x372   :  { %v612_v52 = vpop.xlane.xlu1 %611 }
 0x373   :  { %4205 = vrcp.f32 %v612_v52 }
 0x375   :  { %v4202_v53 = vpop.eup %4201 }
 0x376   :  { %v269_v54 = vmul.f32 %v4202_v53, %v4186_v20  ;;  %v787_v55 = vpop.xlane.xlu0 %786  ;;  %v1135_v62 = vpop.permute.xlu1 %1134 }
 0x377   :  { %4207 = vrcp.f32 %v787_v55 }
 0x378   :  { %3879 = vmatmul.mubr.msk.f32.vlgmr.msra.gmra.mrb[4].mxu1 %vm183_vm3, %v269_v54 }
 0x379   :  { %v4204_v56 = vpop.eup %4203  ;;  %3887 = vmatpush3.msra.mxu1 %v4533_v3  ;;  %3888 = vmatprep.mubr.msk.f32.mxu1 %vm4270_vm2, %v4269_v8 }
 0x37a   :  { %v439_v16 = vmul.f32 %v4204_v56, %v4188_v22  ;;  %3896 = vmatprep.subr.mxu1 %v4269_v8  ;;  %v965_v61 = vpop.permute.xlu0 %964 }
 0x37c   :  { %3889 = vmatmul.mubr.msk.f32.vlgmr.msra.gmra.mrb[6].mxu1 %vm183_vm3, %v439_v16 }
 0x37d   :  { %v4206_v57 = vpop.eup %4205  ;;  %3897 = vmatpush3.msra.mxu1 %v616_v49  ;;  %3898 = vmatprep.mubr.msk.f32.mxu1 %vm4270_vm2, %v4269_v8 }
 0x37e   :  { %v614_v58 = vmul.f32 %v4206_v57, %v4190_v24  ;;  %3906 = vmatprep.subr.mxu1 %v4269_v8 }
 0x380   :  { %3899 = vmatmul.mubr.msk.f32.vlgmr.msra.gmra.mrb[8].mxu1 %vm183_vm3, %v614_v58 }
 0x381   :  { %v4208_v59 = vpop.eup %4207  ;;  %3907 = vmatpush3.msra.mxu1 %v791_v48  ;;  %3908 = vmatprep.mubr.msk.f32.mxu1 %vm4270_vm2, %v4269_v8 }
 0x382   :  { %v789_v60 = vmul.f32 %v4208_v59, %v4538_v26  ;;  %3916 = vmatprep.subr.mxu1 %v4269_v8  ;;  %v1566_v26 = vld [vmem:[%s5005_s7 + $0x8] sm:$0xff] }
 0x383   :  { %v4113_v28 = vpack.c.bf16 %v1566_v26, %v1565_v25  ;;  %v3704_v26 = vld [vmem:[%s4956_s9] ss:$0 sm:$0xff] }
 0x384   :  { %3909 = vmatmul.mubr.msk.f32.vlgmr.msra.gmra.mrb[10].mxu1 %vm183_vm3, %v789_v60 }
 0x385   :  { %3917 = vmatpush3.msra.mxu1 %v965_v61  ;;  %3918 = vmatprep.mubr.msk.f32.mxu1 %vm4270_vm2, %v4269_v8 }
 0x386   :  { %3926 = vmatprep.subr.mxu1 %v4269_v8  ;;  %4114 = vmatprep.subr.bf16.mxu0 %v4113_v28 }
 0x387   :  { %4116 = vmatpush3.bf16.msra.mxu0 %v4113_v28 }
 0x388   :  { %4118 = vmatprep.subr.bf16.mxu0 %v4117_v32 }
 0x38b   :  { %4120 = vmatpush3.bf16.msra.mxu0 %v4117_v32 }
 0x3a7   :  { %v961_v63 = vpop.xlane.xlu1 %960 }
 0x3a8   :  { %4209 = vrcp.f32 %v961_v63 }
 0x3ab   :  { %v1305_v0 = vpop.xlane.xlu1 %1304  ;;  %v1131_v1 = vpop.xlane.xlu0 %1130 }
 0x3ac   :  { %4211 = vrcp.f32 %v1131_v1 }
 0x3ad   :  { %4213 = vrcp.f32 %v1305_v0  ;;  %v1799_v0 = vld [vmem:[%s5007_s0 + $0x8] sm:$0xff] }
 0x3af   :  { %v1479_v2 = vpop.xlane.xlu1 %1478  ;;  %v1309_v11 = vpop.permute.xlu0 %1308 }
 0x3b0   :  { %4215 = vrcp.f32 %v1479_v2  ;;  %v1800_v2 = vld [vmem:[%s5007_s0 + $0x10] sm:$0xff] }
 0x3b2   :  { %v4210_v3 = vpop.eup %4209 }
 0x3b3   :  { %v963_v4 = vmul.f32 %v4210_v3, %v4194_v40  ;;  %v1483_v15 = vpop.permute.xlu1 %1482  ;;  %v1801_v3 = vld [vmem:[%s5007_s0 + $0x18] sm:$0xff] }
 0x3b5   :  { %3919 = vmatmul.mubr.msk.f32.vlgmr.msra.gmra.mrb[12].mxu1 %vm183_vm3, %v963_v4  ;;  %v4133_v4 = vpack.c.bf16 %v1801_v3, %v1800_v2 }
 0x3b6   :  { %3927 = vmatpush3.msra.mxu1 %v1135_v62  ;;  %3928 = vmatprep.mubr.msk.f32.mxu1 %vm4270_vm2, %v4269_v8  ;;  %v4212_v6 = vpop.eup %4211 }
 0x3b7   :  { %3936 = vmatprep.subr.mxu1 %v4269_v8  ;;  %v1133_v9 = vmul.f32 %v4212_v6, %v4546_v41  ;;  %v4214_v10 = vpop.eup %4213  ;;  %v1704_v6 = vld [vmem:[%s5008_s6] sm:$0xff] }
 0x3b8   :  { %v1307_v12 = vmul.f32 %v4214_v10, %v4549_v43 }
 0x3b9   :  { %3929 = vmatmul.mubr.msk.f32.vlgmr.msra.gmra.mrb[14].mxu1 %vm183_vm3, %v1133_v9  ;;  %v1705_v9 = vld [vmem:[%s5008_s6 + $0x8] sm:$0xff] }
 0x3ba   :  { %3937 = vmatpush3.msra.mxu1 %v1309_v11  ;;  %3938 = vmatprep.mubr.msk.f32.mxu1 %vm4270_vm2, %v4269_v8  ;;  %v4216_v13 = vpop.eup %4215  ;;  %v4121_v10 = vpack.c.bf16 %v1705_v9, %v1704_v6  ;;  %v79_v11 = vld [vmem:[%s5009_s4] sm:$0xff] }
 0x3bb   :  { %3946 = vmatprep.subr.mxu1 %v4269_v8  ;;  %v1481_v17 = vmul.f32 %v4216_v13, %v4555_v46  ;;  %v1706_v13 = vld [vmem:[%s5008_s6 + $0x10] sm:$0xff] }
 0x3bd   :  { %3939 = vmatmul.mubr.msk.f32.vlgmr.msra.gmra.mrb[16].mxu1 %vm183_vm3, %v1307_v12  ;;  %v80_v12 = vld [vmem:[%s5009_s4 + $0x8] sm:$0xff]  ;;  %s5011_s4 = smov 96  }
 0x3be   :  { %3947 = vmatpush3.msra.mxu1 %v1483_v15  ;;  %3948 = vmatprep.mubr.msk.f32.mxu1 %vm4270_vm2, %v4269_v8  ;;  %v1707_v15 = vld [vmem:[%s5008_s6 + $0x18] sm:$0xff] }
 0x3bf   :  { %4122 = vmatprep.subr.bf16.mxu1 %v4121_v10 }
 0x3c1   :  { %3949 = vmatmul.mubr.msk.f32.vlgmr.msra.gmra.mrb[18].mxu1 %vm183_vm3, %v1481_v17  ;;  %v4125_v17 = vpack.c.bf16 %v1707_v15, %v1706_v13  ;;  %v2586_v15 = vld [vmem:[%s4959_s3 + $0x8] sm:$0xff] }
 0x3c2   :  { %4124 = vmatpush3.bf16.msra.mxu1 %v4121_v10 }
 0x3c3   :  { %4126 = vmatprep.subr.bf16.mxu1 %v4125_v17 }
 0x3c6   :  { %4128 = vmatpush3.bf16.msra.mxu1 %v4125_v17 }
 0x3c7   :  { %3984 = vmatprep.subr.mxu1 %v4269_v8 }
 0x44b   :  { %v342_v18 = vpop.f32.mrb[4].mxu1 }
 0x44c   :  { %346 = vst.msk [vmem:[#allocation3] sm:$0xff] %vm183_vm3, %v342_v18  ;;  %v3880_v19 = vpop.f32.mrb[5].mxu1 }
 0x44f   :  { %v512_v20 = vpop.f32.mrb[6].mxu1 }
 0x450   :  { %517 = vrot.lane.b32.xlu0 %v512_v20, %s4990_s30  ;;  %v3890_v21 = vpop.f32.mrb[7].mxu1 }
 0x453   :  { %v687_v14 = vpop.f32.mrb[8].mxu1 }
 0x454   :  { %692 = vrot.lane.b32.xlu1 %v687_v14, %s4988_s1  ;;  %v3900_v22 = vpop.f32.mrb[9].mxu1 }
 0x457   :  { %v862_v23 = vpop.f32.mrb[10].mxu1 }
 0x458   :  { %867 = vrot.lane.b32.xlu1 %v862_v23, %s4986_s25  ;;  %v3910_v24 = vpop.f32.mrb[11].mxu1 }
 0x459   :  { %v3703_v24 = vld [vmem:[%s4955_s8] ss:$0 sm:$0xff] }
 0x488   :  { %v1036_v27 = vpop.f32.mrb[12].mxu1 }
 0x489   :  { %1040 = vst.msk [vmem:[#allocation3 + $0x8] sm:$0xff] %vm183_vm3, %v1036_v27  ;;  %v3920_v29 = vpop.f32.mrb[13].mxu1 }
 0x48c   :  { %v1206_v33 = vpop.f32.mrb[14].mxu1 }
 0x48d   :  { %1211 = vrot.lane.b32.xlu0 %v1206_v33, %s4990_s30  ;;  %v3930_v34 = vpop.f32.mrb[15].mxu1  ;;  %v3708_v33 = vld [vmem:[%s4957_s13] ss:$0 sm:$0xff] }
 0x490   :  { %v1380_v35 = vpop.f32.mrb[16].mxu1 }
 0x491   :  { %1385 = vrot.lane.b32.xlu0 %v1380_v35, %s4988_s1  ;;  %v3940_v36 = vpop.f32.mrb[17].mxu1  ;;  %s5014_s1 = smov 8  }
 0x494   :  { %v1554_v37 = vpop.f32.mrb[18].mxu1 }
 0x495   :  { %1559 = vrot.lane.b32.xlu1 %v1554_v37, %s4986_s25  ;;  %v3950_v38 = vpop.f32.mrb[19].mxu1  ;;  %s5015_s25 = smov 16  }
 0x4c2   :  { %v518_v39 = vpop.permute.xlu0 %517 }
 0x4c3   :  { %521 = vst.msk [vmem:[#allocation3] sm:$0xff] %vm520_vm4, %v518_v39 }
 0x4c6   :  { %v693_v40 = vpop.permute.xlu1 %692 }
 0x4c7   :  { %696 = vst.msk [vmem:[#allocation3] sm:$0xff] %vm695_vm5, %v693_v40  ;;  %v3705_v40 = vld [vmem:[%s4958_s11] ss:$0 sm:$0xff]  ;;  %s5010_s11 = smov 88  }
 0x4ca   :  { %v868_v41 = vpop.permute.xlu1 %867 }
 0x4cb   :  { %871 = vst.msk [vmem:[#allocation3] sm:$0xff] %vm870_vm6, %v868_v41 }
 0x4d2   :  { %v1563_v42 = vld [vmem:[#allocation3] sm:$0xff] }
 0x4d3   :  { %3959 = vmatprep.mubr.msk.f32.mxu0 %vm92_vm0, %v1563_v42 }
 0x4ff   :  { %v1212_v43 = vpop.permute.xlu0 %1211 }
 0x500   :  { %1214 = vst.msk [vmem:[#allocation3 + $0x8] sm:$0xff] %vm520_vm4, %v1212_v43 }
 0x503   :  { %v1386_v44 = vpop.permute.xlu0 %1385 }
 0x504   :  { %1388 = vst.msk [vmem:[#allocation3 + $0x8] sm:$0xff] %vm695_vm5, %v1386_v44 }
 0x507   :  { %v1560_v45 = vpop.permute.xlu1 %1559 }
 0x508   :  { %1562 = vst.msk [vmem:[#allocation3 + $0x8] sm:$0xff] %vm870_vm6, %v1560_v45 }
 0x50f   :  { %v1564_v46 = vld [vmem:[#allocation3 + $0x8] sm:$0xff] }
 0x510   :  { %3960 = vmatmul.mubr.msk.f32.vlgmr.msra.gmra.mrb[14].mxu0 %vm92_vm0, %v1564_v46 }
 0x511   :  { %3981 = vmatprep.mubr.msk.f32.mxu0 %vm92_vm0, %v79_v11 }
 0x5e3   :  { %v3961_v48 = vpop.f32.mrb[14].mxu0 }
 0x5e4   :  { %v1654_v49 = vadd.f32 %v3961_v48, %v3700_v47  ;;  %v1648_v50 = vpop.f32.mrb[15].mxu0 }
 0x5e5   :  { %v1649_v51 = vadd.f32 %v3700_v47, %v1648_v50 }
 0x5e6   :  { %v1658_v52 = vadd.f32 %v1654_v49, %v4432_v7 }
 0x5e7   :  { %v1657_v53 = vadd.f32 %v1649_v51, %v4425_v5  ;;  %v1798_v5 = vld [vmem:[%s5007_s0] sm:$0xff] }
 0x5e8   :  { %v1664_v54 = vsel %vm92_vm0, %v1658_v52, 0.0  ;;  %v4129_v1 = vpack.c.bf16 %v1799_v0, %v1798_v5 }
 0x5e9   :  { %1665 = vadd.xlane.f32.xlu1 %v1664_v54  ;;  %v1661_v55 = vsel %vm92_vm0, %v1657_v53, 0.0 }
 0x5ea   :  { %1662 = vadd.xlane.f32.xlu0 %v1661_v55  ;;  %4130 = vmatprep.subr.bf16.mxu0 %v4129_v1 }
 0x5eb   :  { %4132 = vmatpush3.bf16.msra.mxu0 %v4129_v1 }
 0x5ec   :  { %4134 = vmatprep.subr.bf16.mxu0 %v4133_v4 }
 0x5ef   :  { %4136 = vmatpush3.bf16.msra.mxu0 %v4133_v4 }
 0x5f0   :  { %3994 = vmatprep.subr.mxu0 %v4269_v8 }
 0x5f2   :  { %3982 = vmatmul.mubr.msk.f32.vlgmr.msra.gmra.mrb[16].mxu0 %vm92_vm0, %v80_v12 }
 0x5f3   :  { %3996 = vmatprep.mubr.msk.f32.mxu0 %vm4270_vm2, %v4269_v8 }
 0x676   :  { %v1666_v56 = vpop.xlane.xlu1 %1665 }
 0x677   :  { %v1669_v16 = vmul.f32 0.03125, %v1666_v56  ;;  %v1663_v57 = vpop.xlane.xlu0 %1662 }
 0x678   :  { %v1668_v58 = vmul.f32 0.03125, %v1663_v57 }
 0x679   :  { %v1671_v59 = vsub.f32 %v1658_v52, %v1669_v16 }
 0x67a   :  { %v1670_v60 = vsub.f32 %v1657_v53, %v1668_v58 }
 0x67b   :  { %v1673_v63 = vmul.f32 %v1671_v59, %v1671_v59 }
 0x67c   :  { %v1672_v61 = vmul.f32 %v1670_v60, %v1670_v60 }
 0x67d   :  { %v1677_v7 = vsel %vm92_vm0, %v1673_v63, 0.0 }
 0x67e   :  { %v1674_v62 = vsel %vm92_vm0, %v1672_v61, 0.0  ;;  %v1893_v61 = vld [vmem:[%s4959_s3] sm:$0xff]  ;;  %s5012_s3 = smov 72  }
 0x67f   :  { %1675 = vadd.xlane.f32.xlu0 %v1674_v62 }
 0x683   :  { %1678 = vadd.xlane.f32.xlu0 %v1677_v7 }
 0x6c5   :  { %v3983_v34 = vpop.f32.mrb[16].mxu0 }
 0x6c6   :  { %v1887_v35 = vadd.f32 %v3983_v34, %v3708_v33  ;;  %v1881_v36 = vpop.f32.mrb[17].mxu0 }
 0x6c7   :  { %v1882_v37 = vadd.f32 %v3708_v33, %v1881_v36 }
 0x6c8   :  { %1892 = vst.msk [vmem:[#allocation5 + $0x8] sm:$0xff] %vm1890_vm7, %v1887_v35 }
 0x6c9   :  { %1891 = vst.msk [vmem:[#allocation5] sm:$0xff] %vm1890_vm7, %v1882_v37 }
 0x6cf   :  { %v4714_v49 = vld [vmem:[#allocation5 + $0x8] sm:$0xff] }
 0x6d0   :  { %v4690_v38 = vld [vmem:[#allocation5] sm:$0xff] }
 0x6d1   :  { %2068 = vrot.lane.b32.xlu1 %v4690_v38, %s4272_s28 }
 0x6d5   :  { %2243 = vrot.lane.b32.xlu1 %v4690_v38, %s4275_s29 }
 0x70c   :  { %v1676_v18 = vpop.xlane.xlu0 %1675 }
 0x70d   :  { %v1680_v19 = vmul.f32 0.03125, %v1676_v18 }
 0x70f   :  { %v1682_v20 = vadd.f32 1e-05, %v1680_v19 }
 0x710   :  { %v1679_v21 = vpop.xlane.xlu0 %1678 }
 0x711   :  { %4217 = vrsqrt.f32 %v1682_v20  ;;  %v1681_v14 = vmul.f32 0.03125, %v1679_v21 }
 0x713   :  { %v1683_v22 = vadd.f32 1e-05, %v1681_v14 }
 0x715   :  { %4219 = vrsqrt.f32 %v1683_v22 }
 0x71b   :  { %v4218_v23 = vpop.eup %4217 }
 0x71c   :  { %v1686_v25 = vmul.f32 %v4218_v23, %v1670_v60 }
 0x71e   :  { %v1694_v27 = vmul.f32 %v3703_v24, %v1686_v25 }
 0x71f   :  { %v4220_v28 = vpop.eup %4219 }
 0x720   :  { %v1687_v29 = vmul.f32 %v4220_v28, %v1671_v59  ;;  %v4675_v30 = vadd.f32 %v3704_v26, %v1694_v27 }
 0x722   :  { %v1695_v31 = vmul.f32 %v3703_v24, %v1687_v29  ;;  %3970 = vmatprep.mubr.msk.f32.mxu1 %vm92_vm0, %v4675_v30 }
 0x724   :  { %v4679_v32 = vadd.f32 %v3704_v26, %v1695_v31 }
 0x726   :  { %3971 = vmatmul.mubr.msk.f32.vlgmr.msra.gmra.mrb[20].mxu1 %vm92_vm0, %v4679_v32 }
 0x727   :  { %3986 = vmatprep.mubr.msk.f32.mxu1 %vm4270_vm2, %v4269_v8  ;;  %3985 = vmatpush3.xpose.msk.msra.mxu1 %vm183_vm3, %v4690_v38 }
 0x728   :  { %3989 = vmatprep.subr.mxu1 %v4269_v8 }
 0x743   :  { %v2069_v39 = vpop.permute.xlu1 %2068 }
 0x744   :  { %3995 = vmatpush3.xpose.msk.msra.mxu0 %vm183_vm3, %v2069_v39 }
 0x745   :  { %4004 = vmatprep.subr.mxu0 %v4269_v8 }
 0x747   :  { %v2244_v50 = vpop.permute.xlu1 %2243 }
 0x7f9   :  { %v3972_v41 = vpop.f32.mrb[20].mxu1 }
 0x7fa   :  { %v1793_v42 = vadd.f32 %v3972_v41, %v3705_v40  ;;  %v1787_v43 = vpop.f32.mrb[21].mxu1 }
 0x7fb   :  { %v1788_v44 = vadd.f32 %v3705_v40, %v1787_v43 }
 0x7fc   :  { %1797 = vst.msk [vmem:[#allocation4 + $0x8] sm:$0xff] %vm92_vm0, %v1793_v42 }
 0x7fd   :  { %1796 = vst.msk [vmem:[#allocation4] sm:$0xff] %vm92_vm0, %v1788_v44 }
 0x803   :  { %v2754_v47 = vld [vmem:[#allocation4 + $0x8] sm:$0xff] }
 0x804   :  { %v2236_v45 = vld [vmem:[#allocation4] sm:$0xff]  ;;  %v2755_v48 = vmul.f32 0.35355338, %v2754_v47 }
 0x805   :  { %v2237_v46 = vmul.f32 0.35355338, %v2236_v45 }
 0x807   :  { %2240 = vrot.lane.b32.xlu1 %v2237_v46, %s4275_s29  ;;  %2065 = vrot.lane.b32.xlu0 %v2237_v46, %s4272_s28 }
 0x808   :  { %3987 = vmatmul.mubr.msk.f32.vlgmr.msra.gmra.mrb[22].mxu1 %vm183_vm3, %v2237_v46 }
 0x809   :  { %3991 = vmatprep.mubr.msk.f32.mxu1 %vm4270_vm2, %v4269_v8 }
 0x80b   :  { %2415 = vrot.lane.b32.xlu1 %v2237_v46, %s4277_s10  ;;  %2418 = vrot.lane.b32.xlu0 %v4690_v38, %s4277_s10 }
 0x80f   :  { %2758 = vrot.lane.b32.xlu1 %v2755_v48, %s4272_s28  ;;  %2761 = vrot.lane.b32.xlu0 %v4714_v49, %s4272_s28 }
 0x813   :  { %2933 = vrot.lane.b32.xlu1 %v2755_v48, %s4275_s29  ;;  %2936 = vrot.lane.b32.xlu0 %v4714_v49, %s4275_s29 }
 0x817   :  { %3108 = vrot.lane.b32.xlu1 %v2755_v48, %s4277_s10  ;;  %3111 = vrot.lane.b32.xlu0 %v4714_v49, %s4277_s10 }
 0x81b   :  { %2155 = vrot.lane.b32.xlu1 %v4690_v38, %s5010_s11  ;;  %1984 = vrot.lane.b32.xlu0 %v4690_v38, %s5011_s4 }
 0x879   :  { %v2241_v51 = vpop.permute.xlu1 %2240  ;;  %v2066_v52 = vpop.permute.xlu0 %2065 }
 0x87a   :  { %3997 = vmatmul.mubr.msk.f32.vlgmr.msra.gmra.mrb[18].mxu0 %vm183_vm3, %v2066_v52 }
 0x87b   :  { %4005 = vmatpush3.xpose.msk.msra.mxu0 %vm183_vm3, %v2244_v50  ;;  %4006 = vmatprep.mubr.msk.f32.mxu0 %vm4270_vm2, %v4269_v8 }
 0x87c   :  { %4014 = vmatprep.subr.mxu0 %v4269_v8 }
 0x87d   :  { %v2419_v53 = vpop.permute.xlu0 %2418  ;;  %v2416_v54 = vpop.permute.xlu1 %2415 }
 0x87e   :  { %4007 = vmatmul.mubr.msk.f32.vlgmr.msra.gmra.mrb[20].mxu0 %vm183_vm3, %v2241_v51 }
 0x87f   :  { %4015 = vmatpush3.xpose.msk.msra.mxu0 %vm183_vm3, %v2419_v53  ;;  %4016 = vmatprep.mubr.msk.f32.mxu0 %vm4270_vm2, %v4269_v8 }
 0x880   :  { %4024 = vmatprep.subr.mxu0 %v4269_v8 }
 0x881   :  { %v2762_v55 = vpop.permute.xlu0 %2761  ;;  %v2759_v56 = vpop.permute.xlu1 %2758 }
 0x882   :  { %4017 = vmatmul.mubr.msk.f32.vlgmr.msra.gmra.mrb[22].mxu0 %vm183_vm3, %v2416_v54 }
 0x883   :  { %4025 = vmatpush3.xpose.msk.msra.mxu0 %vm183_vm3, %v4714_v49  ;;  %4026 = vmatprep.mubr.msk.f32.mxu0 %vm4270_vm2, %v4269_v8 }
 0x884   :  { %4034 = vmatprep.subr.mxu0 %v4269_v8 }
 0x885   :  { %v2937_v16 = vpop.permute.xlu0 %2936  ;;  %v2934_v58 = vpop.permute.xlu1 %2933 }
 0x886   :  { %4027 = vmatmul.mubr.msk.f32.vlgmr.msra.gmra.mrb[24].mxu0 %vm183_vm3, %v2755_v48 }
 0x887   :  { %4035 = vmatpush3.xpose.msk.msra.mxu0 %vm183_vm3, %v2762_v55  ;;  %4036 = vmatprep.mubr.msk.f32.mxu0 %vm4270_vm2, %v4269_v8 }
 0x888   :  { %4044 = vmatprep.subr.mxu0 %v4269_v8 }
 0x889   :  { %v3112_v57 = vpop.permute.xlu0 %3111  ;;  %v3109_v60 = vpop.permute.xlu1 %3108 }
 0x88a   :  { %4037 = vmatmul.mubr.msk.f32.vlgmr.msra.gmra.mrb[26].mxu0 %vm183_vm3, %v2759_v56 }
 0x88b   :  { %4045 = vmatpush3.xpose.msk.msra.mxu0 %vm183_vm3, %v2937_v16  ;;  %4046 = vmatprep.mubr.msk.f32.mxu0 %vm4270_vm2, %v4269_v8 }
 0x88c   :  { %4054 = vmatprep.subr.mxu0 %v4269_v8 }
 0x88d   :  { %v1985_v59 = vpop.permute.xlu0 %1984  ;;  %v2156_v41 = vpop.permute.xlu1 %2155 }
 0x88e   :  { %3990 = vmatpush3.msra.mxu1 %v1985_v59  ;;  %4047 = vmatmul.mubr.msk.f32.vlgmr.msra.gmra.mrb[28].mxu0 %vm183_vm3, %v2934_v58 }
 0x88f   :  { %4055 = vmatpush3.xpose.msk.msra.mxu0 %vm183_vm3, %v3112_v57  ;;  %4056 = vmatprep.mubr.msk.f32.mxu0 %vm4270_vm2, %v4269_v8 }
 0x890   :  { %3999 = vmatprep.subr.mxu1 %v4269_v8 }
 0x892   :  { %4057 = vmatmul.mubr.msk.f32.vlgmr.msra.gmra.mrb[30].mxu0 %vm183_vm3, %v3109_v60 }
 0x8db   :  { %v1969_v62 = vpop.f32.mrb[22].mxu1 }
 0x8dc   :  { %v1970_v63 = vadd.f32 %v1969_v62, %v1893_v61  ;;  %v3988_v7 = vpop.f32.mrb[23].mxu1 }
 0x8de   :  { %v1973_v5 = vsel %vm183_vm3, %v1970_v63, -inf }
 0x8df   :  { %1974 = vmax.xlane.f32.xlu0 %v1973_v5 }
 0x94d   :  { %v2140_v0 = vpop.f32.mrb[18].mxu0 }
 0x94e   :  { %v2141_v1 = vadd.f32 %v2140_v0, %v1893_v61  ;;  %v3998_v2 = vpop.f32.mrb[19].mxu0 }
 0x950   :  { %v2144_v3 = vsel %vm183_vm3, %v2141_v1, -inf }
 0x951   :  { %2145 = vmax.xlane.f32.xlu1 %v2144_v3  ;;  %v2315_v4 = vpop.f32.mrb[20].mxu0 }
 0x952   :  { %v2316_v6 = vadd.f32 %v2315_v4, %v1893_v61  ;;  %v4008_v9 = vpop.f32.mrb[21].mxu0 }
 0x954   :  { %v2319_v10 = vsel %vm183_vm3, %v2316_v6, -inf }
 0x955   :  { %v2490_v11 = vpop.f32.mrb[22].mxu0  ;;  %2320 = vmax.xlane.f32.xlu0 %v2319_v10 }
 0x956   :  { %v2491_v12 = vadd.f32 %v2490_v11, %v1893_v61  ;;  %v4018_v13 = vpop.f32.mrb[23].mxu0 }
 0x958   :  { %v2494_v17 = vsel %vm183_vm3, %v2491_v12, -inf }
 0x959   :  { %v2662_v18 = vpop.f32.mrb[24].mxu0  ;;  %2495 = vmax.xlane.f32.xlu0 %v2494_v17 }
 0x95a   :  { %v2663_v19 = vadd.f32 %v2662_v18, %v2586_v15  ;;  %v4028_v20 = vpop.f32.mrb[25].mxu0 }
 0x95c   :  { %v2666_v21 = vsel %vm183_vm3, %v2663_v19, -inf }
 0x95d   :  { %2667 = vmax.xlane.f32.xlu1 %v2666_v21  ;;  %v2833_v14 = vpop.f32.mrb[26].mxu0 }
 0x95e   :  { %v2834_v22 = vadd.f32 %v2833_v14, %v2586_v15  ;;  %v4038_v23 = vpop.f32.mrb[27].mxu0 }
 0x960   :  { %v2837_v24 = vsel %vm183_vm3, %v2834_v22, -inf }
 0x961   :  { %v3008_v25 = vpop.f32.mrb[28].mxu0  ;;  %2838 = vmax.xlane.f32.xlu0 %v2837_v24 }
 0x962   :  { %v3009_v26 = vadd.f32 %v3008_v25, %v2586_v15  ;;  %v4048_v27 = vpop.f32.mrb[29].mxu0 }
 0x964   :  { %v3012_v28 = vsel %vm183_vm3, %v3009_v26, -inf }
 0x965   :  { %3013 = vmax.xlane.f32.xlu1 %v3012_v28  ;;  %v3183_v29 = vpop.f32.mrb[30].mxu0 }
 0x966   :  { %v3184_v31 = vadd.f32 %v3183_v29, %v2586_v15  ;;  %v4058_v33 = vpop.f32.mrb[31].mxu0 }
 0x968   :  { %v3187_v34 = vsel %vm183_vm3, %v3184_v31, -inf }
 0x969   :  { %3188 = vmax.xlane.f32.xlu0 %v3187_v34 }
 0x96c   :  { %v1975_v35 = vpop.xlane.xlu0 %1974 }
 0x96d   :  { %v1976_v36 = vsub.f32 %v1970_v63, %v1975_v35 }
 0x96f   :  { %v1977_v37 = vmul.f32 1.442695, %v1976_v36 }
 0x971   :  { %4221 = vpow2.f32 %v1977_v37 }
 0x976   :  { %2505 = vrot.lane.b32.xlu1 %v4690_v38, %s5012_s3 }
 0x97b   :  { %v4222_v39 = vpop.eup %4221 }
 0x97c   :  { %v1979_v40 = vsel %vm183_vm3, %v4222_v39, 0.0 }
 0x97f   :  { %2330 = vrot.lane.b32.xlu0 %v4690_v38, %s5013_s27 }
 0x99a   :  { %1980 = vadd.xlane.f32.xlu1 %v1979_v40 }
 0x9de   :  { %v2146_v42 = vpop.xlane.xlu1 %2145 }
 0x9df   :  { %v2147_v43 = vsub.f32 %v2141_v1, %v2146_v42 }
 0x9e1   :  { %v2148_v44 = vmul.f32 1.442695, %v2147_v43 }
 0x9e2   :  { %v2321_v45 = vpop.xlane.xlu0 %2320 }
 0x9e3   :  { %4223 = vpow2.f32 %v2148_v44  ;;  %v2322_v46 = vsub.f32 %v2316_v6, %v2321_v45 }
 0x9e5   :  { %v2323_v47 = vmul.f32 1.442695, %v2322_v46 }
 0x9e6   :  { %v2496_v48 = vpop.xlane.xlu0 %2495 }
 0x9e7   :  { %4225 = vpow2.f32 %v2323_v47  ;;  %v2497_v50 = vsub.f32 %v2491_v12, %v2496_v48 }
 0x9e9   :  { %v2498_v38 = vmul.f32 1.442695, %v2497_v50 }
 0x9ea   :  { %v2668_v16 = vpop.xlane.xlu1 %2667 }
 0x9eb   :  { %4227 = vpow2.f32 %v2498_v38  ;;  %v2669_v57 = vsub.f32 %v2663_v19, %v2668_v16 }
 0x9ed   :  { %v4224_v51 = vpop.eup %4223  ;;  %v2670_v61 = vmul.f32 1.442695, %v2669_v57  ;;  %v3283_v57 = vld [vmem:[%s4960_s14 + $0x10] sm:$0xff] }
 0x9ee   :  { %v2150_v52 = vsel %vm183_vm3, %v4224_v51, 0.0  ;;  %v2839_v58 = vpop.xlane.xlu0 %2838 }
 0x9ef   :  { %2151 = vadd.xlane.f32.xlu0 %v2150_v52  ;;  %v2840_v60 = vsub.f32 %v2834_v22, %v2839_v58  ;;  %4229 = vpow2.f32 %v2670_v61  ;;  %v3284_v58 = vld [vmem:[%s4960_s14 + $0x18] sm:$0xff] }
 0x9f1   :  { %v4226_v53 = vpop.eup %4225  ;;  %v2841_v7 = vmul.f32 1.442695, %v2840_v60 }
 0x9f2   :  { %v2325_v54 = vsel %vm183_vm3, %v4226_v53, 0.0  ;;  %v3014_v59 = vpop.xlane.xlu1 %3013 }
 0x9f3   :  { %2326 = vadd.xlane.f32.xlu1 %v2325_v54  ;;  %v3015_v62 = vsub.f32 %v3009_v26, %v3014_v59  ;;  %4231 = vpow2.f32 %v2841_v7  ;;  %v3282_v54 = vld [vmem:[%s4960_s14 + $0x8] sm:$0xff]  ;;  %v4141_v59 = vpack.c.bf16 %v3284_v58, %v3283_v57  ;;  %v3529_v57 = vld [vmem:[%s4965_s20 + $0x20] sm:$0xff] }
 0x9f4   :  { %v3530_v58 = vld [vmem:[%s4965_s20 + $0x28] sm:$0xff] }
 0x9f5   :  { %v4782_v55 = vpop.eup %4227  ;;  %v3016_v5 = vmul.f32 1.442695, %v3015_v62 }
 0x9f6   :  { %v2500_v56 = vsel %vm183_vm3, %v4782_v55, 0.0  ;;  %v3189_v63 = vpop.xlane.xlu0 %3188  ;;  %v2506_v2 = vpop.permute.xlu1 %2505 }
 0x9f7   :  { %2501 = vadd.xlane.f32.xlu0 %v2500_v56  ;;  %v3190_v0 = vsub.f32 %v3184_v31, %v3189_v63  ;;  %4233 = vpow2.f32 %v3016_v5 }
 0x9f9   :  { %v3191_v1 = vmul.f32 1.442695, %v3190_v0  ;;  %v4230_v3 = vpop.eup %4229 }
 0x9fa   :  { %v2672_v9 = vsel %vm183_vm3, %v4230_v3, 0.0  ;;  %v2331_v19 = vpop.permute.xlu0 %2330 }
 0x9fb   :  { %4235 = vpow2.f32 %v3191_v1 }
 0x9fd   :  { %v4790_v4 = vpop.eup %4231 }
 0x9fe   :  { %v2843_v12 = vsel %vm183_vm3, %v4790_v4, 0.0 }
 0xa01   :  { %v4793_v10 = vpop.eup %4233 }
 0xa02   :  { %v3018_v11 = vsel %vm183_vm3, %v4793_v10, 0.0 }
 0xa04   :  { %2848 = vrot.lane.b32.xlu1 %v4714_v49, %s5010_s11 }
 0xa05   :  { %v4799_v13 = vpop.eup %4235 }
 0xa06   :  { %v3193_v15 = vsel %vm183_vm3, %v4799_v13, 0.0 }
 0xa0d   :  { %2677 = vrot.lane.b32.xlu0 %v4714_v49, %s5011_s4 }
 0xa27   :  { %v1981_v6 = vpop.xlane.xlu1 %1980 }
 0xa28   :  { %4237 = vrcp.f32 %v1981_v6  ;;  %2673 = vadd.xlane.f32.xlu1 %v2672_v9 }
 0xa2c   :  { %3019 = vadd.xlane.f32.xlu1 %v3018_v11  ;;  %2844 = vadd.xlane.f32.xlu0 %v2843_v12  ;;  %v3735_v11 = vld [vmem:[%s4961_s15] ss:$0 sm:$0xff] }
 0xa30   :  { %3194 = vadd.xlane.f32.xlu1 %v3193_v15 }
 0xa32   :  { %v4238_v17 = vpop.eup %4237 }
 0xa33   :  { %v1983_v18 = vmul.f32 %v4238_v17, %v4222_v39 }
 0xa35   :  { %3992 = vmatmul.mubr.msk.f32.vlgmr.msra.gmra.mrb[24].mxu1 %vm183_vm3, %v1983_v18 }
 0xa36   :  { %4000 = vmatpush3.msra.mxu1 %v2156_v41  ;;  %4001 = vmatprep.mubr.msk.f32.mxu1 %vm4270_vm2, %v4269_v8 }
 0xa37   :  { %4009 = vmatprep.subr.mxu1 %v4269_v8 }
 0xa41   :  { %3198 = vrot.lane.b32.xlu1 %v4714_v49, %s5012_s3 }
 0xa42   :  { %3023 = vrot.lane.b32.xlu0 %v4714_v49, %s5013_s27 }
 0xa7c   :  { %v2152_v20 = vpop.xlane.xlu0 %2151 }
 0xa7d   :  { %4239 = vrcp.f32 %v2152_v20 }
 0xa80   :  { %v2327_v21 = vpop.xlane.xlu1 %2326 }
 0xa81   :  { %4241 = vrcp.f32 %v2327_v21 }
 0xa84   :  { %v2502_v14 = vpop.xlane.xlu0 %2501  ;;  %v2849_v28 = vpop.permute.xlu1 %2848 }
 0xa85   :  { %4243 = vrcp.f32 %v2502_v14 }
 0xa87   :  { %v4240_v22 = vpop.eup %4239 }
 0xa88   :  { %v2154_v23 = vmul.f32 %v4240_v22, %v4224_v51  ;;  %v2678_v27 = vpop.permute.xlu0 %2677 }
 0xa8a   :  { %4002 = vmatmul.mubr.msk.f32.vlgmr.msra.gmra.mrb[26].mxu1 %vm183_vm3, %v2154_v23 }
 0xa8b   :  { %v4242_v24 = vpop.eup %4241  ;;  %4010 = vmatpush3.msra.mxu1 %v2331_v19  ;;  %4011 = vmatprep.mubr.msk.f32.mxu1 %vm4270_vm2, %v4269_v8 }
 0xa8c   :  { %v2329_v25 = vmul.f32 %v4242_v24, %v4226_v53  ;;  %4019 = vmatprep.subr.mxu1 %v4269_v8  ;;  %v3281_v53 = vld [vmem:[%s4960_s14] sm:$0xff] }
 0xa8d   :  { %v4137_v56 = vpack.c.bf16 %v3282_v54, %v3281_v53  ;;  %v3526_v53 = vld [vmem:[%s4965_s20 + $0x8] sm:$0xff] }
 0xa8e   :  { %4012 = vmatmul.mubr.msk.f32.vlgmr.msra.gmra.mrb[28].mxu1 %vm183_vm3, %v2329_v25 }
 0xa8f   :  { %v4244_v49 = vpop.eup %4243  ;;  %4020 = vmatpush3.msra.mxu1 %v2506_v2  ;;  %4021 = vmatprep.mubr.msk.f32.mxu1 %vm4270_vm2, %v4269_v8 }
 0xa90   :  { %v2504_v26 = vmul.f32 %v4244_v49, %v4782_v55  ;;  %4029 = vmatprep.subr.mxu1 %v4269_v8  ;;  %4138 = vmatprep.subr.bf16.mxu0 %v4137_v56 }
 0xa91   :  { %4140 = vmatpush3.bf16.msra.mxu0 %v4137_v56  ;;  %v3528_v56 = vld [vmem:[%s4965_s20 + $0x18] sm:$0xff] }
 0xa92   :  { %4022 = vmatmul.mubr.msk.f32.vlgmr.msra.gmra.mrb[30].mxu1 %vm183_vm3, %v2504_v26  ;;  %4142 = vmatprep.subr.bf16.mxu0 %v4141_v59 }
 0xa93   :  { %4030 = vmatpush3.msra.mxu1 %v2678_v27  ;;  %4031 = vmatprep.mubr.msk.f32.mxu1 %vm4270_vm2, %v4269_v8 }
 0xa94   :  { %4039 = vmatprep.subr.mxu1 %v4269_v8 }
 0xa95   :  { %4144 = vmatpush3.bf16.msra.mxu0 %v4141_v59  ;;  %v4161_v59 = vpack.c.bf16 %v3530_v58, %v3529_v57 }
 0xab5   :  { %v2674_v29 = vpop.xlane.xlu1 %2673 }
 0xab6   :  { %4245 = vrcp.f32 %v2674_v29  ;;  %v3420_v29 = vld [vmem:[%s4962_s18 + $0x8] sm:$0xff] }
 0xab9   :  { %v3020_v31 = vpop.xlane.xlu1 %3019  ;;  %v2845_v33 = vpop.xlane.xlu0 %2844 }
 0xaba   :  { %4247 = vrcp.f32 %v2845_v33  ;;  %v3421_v33 = vld [vmem:[%s4962_s18 + $0x10] sm:$0xff] }
 0xabb   :  { %4249 = vrcp.f32 %v3020_v31 }
 0xabd   :  { %v3195_v34 = vpop.xlane.xlu1 %3194  ;;  %v3024_v41 = vpop.permute.xlu0 %3023 }
 0xabe   :  { %4251 = vrcp.f32 %v3195_v34  ;;  %v3422_v34 = vld [vmem:[%s4962_s18 + $0x18] sm:$0xff] }
 0xac0   :  { %v4246_v35 = vpop.eup %4245 }
 0xac1   :  { %v2676_v36 = vmul.f32 %v4246_v35, %v4230_v3  ;;  %v3199_v44 = vpop.permute.xlu1 %3198  ;;  %v4149_v35 = vpack.c.bf16 %v3422_v34, %v3421_v33 }
 0xac3   :  { %4032 = vmatmul.mubr.msk.f32.vlgmr.msra.gmra.mrb[32].mxu1 %vm183_vm3, %v2676_v36 }
 0xac4   :  { %4040 = vmatpush3.msra.mxu1 %v2849_v28  ;;  %4041 = vmatprep.mubr.msk.f32.mxu1 %vm4270_vm2, %v4269_v8  ;;  %v4248_v37 = vpop.eup %4247 }
 0xac5   :  { %4049 = vmatprep.subr.mxu1 %v4269_v8  ;;  %v2847_v39 = vmul.f32 %v4248_v37, %v4790_v4  ;;  %v4250_v40 = vpop.eup %4249 }
 0xac6   :  { %v3022_v42 = vmul.f32 %v4250_v40, %v4793_v10 }
 0xac7   :  { %4042 = vmatmul.mubr.msk.f32.vlgmr.msra.gmra.mrb[34].mxu1 %vm183_vm3, %v2847_v39 }
 0xac8   :  { %4050 = vmatpush3.msra.mxu1 %v3024_v41  ;;  %4051 = vmatprep.mubr.msk.f32.mxu1 %vm4270_vm2, %v4269_v8  ;;  %v4252_v43 = vpop.eup %4251 }
 0xac9   :  { %4059 = vmatprep.subr.mxu1 %v4269_v8  ;;  %v3197_v45 = vmul.f32 %v4252_v43, %v4799_v13 }
 0xacb   :  { %4052 = vmatmul.mubr.msk.f32.vlgmr.msra.gmra.mrb[36].mxu1 %vm183_vm3, %v3022_v42 }
 0xacc   :  { %4060 = vmatpush3.msra.mxu1 %v3199_v44  ;;  %4061 = vmatprep.mubr.msk.f32.mxu1 %vm4270_vm2, %v4269_v8  ;;  %v3738_v44 = vld [vmem:[%s4963_s16] ss:$0 sm:$0xff] }
 0xacf   :  { %4062 = vmatmul.mubr.msk.f32.vlgmr.msra.gmra.mrb[38].mxu1 %vm183_vm3, %v3197_v45 }
 0xb08   :  { %v2056_v46 = vpop.f32.mrb[24].mxu1 }
 0xb09   :  { %2060 = vst.msk [vmem:[#allocation3] sm:$0xff] %vm183_vm3, %v2056_v46  ;;  %v3993_v47 = vpop.f32.mrb[25].mxu1  ;;  %v3739_v46 = vld [vmem:[%s4964_s17] ss:$0 sm:$0xff] }
 0xb5d   :  { %v2227_v48 = vpop.f32.mrb[26].mxu1 }
 0xb5e   :  { %2232 = vrot.lane.b32.xlu0 %v2227_v48, %s5014_s1  ;;  %v4003_v50 = vpop.f32.mrb[27].mxu1 }
 0xb61   :  { %v2402_v38 = vpop.f32.mrb[28].mxu1 }
 0xb62   :  { %2407 = vrot.lane.b32.xlu1 %v2402_v38, %s5015_s25  ;;  %v4013_v51 = vpop.f32.mrb[29].mxu1 }
 0xb65   :  { %v2577_v52 = vpop.f32.mrb[30].mxu1 }
 0xb66   :  { %2582 = vrot.lane.b32.xlu1 %v2577_v52, %s5016_s12  ;;  %v4023_v8 = vpop.f32.mrb[31].mxu1 }
 0xb67   :  { %v3525_v8 = vld [vmem:[%s4965_s20] sm:$0xff] }
 0xb68   :  { %v4153_v54 = vpack.c.bf16 %v3526_v53, %v3525_v8 }
 0xb6a   :  { %4154 = vmatprep.subr.bf16.mxu0 %v4153_v54 }
 0xb96   :  { %v2749_v55 = vpop.f32.mrb[32].mxu1 }
 0xb97   :  { %2753 = vst.msk [vmem:[#allocation3 + $0x8] sm:$0xff] %vm183_vm3, %v2749_v55  ;;  %v4033_v16 = vpop.f32.mrb[33].mxu1  ;;  %v3527_v55 = vld [vmem:[%s4965_s20 + $0x10] sm:$0xff] }
 0xb98   :  { %v4157_v16 = vpack.c.bf16 %v3528_v56, %v3527_v55 }
 0xb9a   :  { %v2920_v60 = vpop.f32.mrb[34].mxu1 }
 0xb9b   :  { %2925 = vrot.lane.b32.xlu0 %v2920_v60, %s5014_s1  ;;  %v4043_v61 = vpop.f32.mrb[35].mxu1  ;;  %v3531_v60 = vld [vmem:[%s4965_s20 + $0x30] sm:$0xff] }
 0xb9c   :  { %v3532_v61 = vld [vmem:[%s4965_s20 + $0x38] sm:$0xff] }
 0xb9e   :  { %v3095_v62 = vpop.f32.mrb[36].mxu1 }
 0xb9f   :  { %3100 = vrot.lane.b32.xlu0 %v3095_v62, %s5015_s25  ;;  %v4053_v63 = vpop.f32.mrb[37].mxu1  ;;  %v4165_v62 = vpack.c.bf16 %v3532_v61, %v3531_v60 }
 0xba0   :  { %v3740_v63 = vld [vmem:[%s4966_s19] ss:$0 sm:$0xff] }
 0xba2   :  { %v3270_v7 = vpop.f32.mrb[38].mxu1 }
 0xba3   :  { %3275 = vrot.lane.b32.xlu1 %v3270_v7, %s5016_s12  ;;  %v4063_v5 = vpop.f32.mrb[39].mxu1 }
 0xbd0   :  { %v2233_v0 = vpop.permute.xlu0 %2232 }
 0xbd1   :  { %2235 = vst.msk [vmem:[#allocation3] sm:$0xff] %vm520_vm4, %v2233_v0 }
 0xbd4   :  { %v2408_v1 = vpop.permute.xlu1 %2407 }
 0xbd5   :  { %2410 = vst.msk [vmem:[#allocation3] sm:$0xff] %vm695_vm5, %v2408_v1 }
 0xbd8   :  { %v2583_v2 = vpop.permute.xlu1 %2582 }
 0xbd9   :  { %2585 = vst.msk [vmem:[#allocation3] sm:$0xff] %vm870_vm6, %v2583_v2 }
 0xbe0   :  { %v3279_v3 = vld [vmem:[#allocation3] sm:$0xff] }
 0xbe1   :  { %4072 = vmatprep.mubr.msk.f32.mxu0 %vm92_vm0, %v3279_v3 }
 0xc0d   :  { %v2926_v4 = vpop.permute.xlu0 %2925 }
 0xc0e   :  { %2928 = vst.msk [vmem:[#allocation3 + $0x8] sm:$0xff] %vm520_vm4, %v2926_v4 }
 0xc11   :  { %v3101_v6 = vpop.permute.xlu0 %3100 }
 0xc12   :  { %3103 = vst.msk [vmem:[#allocation3 + $0x8] sm:$0xff] %vm695_vm5, %v3101_v6 }
 0xc15   :  { %v3276_v9 = vpop.permute.xlu1 %3275 }
 0xc16   :  { %3278 = vst.msk [vmem:[#allocation3 + $0x8] sm:$0xff] %vm870_vm6, %v3276_v9 }
 0xc1d   :  { %v3280_v10 = vld [vmem:[#allocation3 + $0x8] sm:$0xff] }
 0xc1e   :  { %4073 = vmatmul.mubr.msk.f32.vlgmr.msra.gmra.mrb[32].mxu0 %vm92_vm0, %v3280_v10 }
 0xc1f   :  { %4156 = vmatpush3.bf16.msra.mxu0 %v4153_v54 }
 0xc20   :  { %4158 = vmatprep.subr.bf16.mxu0 %v4157_v16 }
 0xc23   :  { %4160 = vmatpush3.bf16.msra.mxu0 %v4157_v16 }
 0xc24   :  { %4162 = vmatprep.subr.bf16.mxu0 %v4161_v59 }
 0xc27   :  { %4164 = vmatpush3.bf16.msra.mxu0 %v4161_v59 }
 0xc28   :  { %4166 = vmatprep.subr.bf16.mxu0 %v4165_v62 }
 0xc2b   :  { %4168 = vmatpush3.bf16.msra.mxu0 %v4165_v62 }
 0xcf1   :  { %v4074_v12 = vpop.f32.mrb[32].mxu0 }
 0xcf2   :  { %v3370_v13 = vadd.f32 %v4074_v12, %v3735_v11  ;;  %v3364_v15 = vpop.f32.mrb[33].mxu0 }
 0xcf3   :  { %v3365_v17 = vadd.f32 %v3735_v11, %v3364_v15 }
 0xcf4   :  { %v3374_v18 = vadd.f32 %v3370_v13, %v4679_v32 }
 0xcf5   :  { %v3373_v19 = vadd.f32 %v3365_v17, %v4675_v30  ;;  %v3419_v30 = vld [vmem:[%s4962_s18] sm:$0xff] }
 0xcf6   :  { %v3380_v20 = vsel %vm92_vm0, %v3374_v18, 0.0  ;;  %v4145_v31 = vpack.c.bf16 %v3420_v29, %v3419_v30  ;;  %v3745_v17 = vld [vmem:[%s4967_s21] ss:$0 sm:$0xff] }
 0xcf7   :  { %3381 = vadd.xlane.f32.xlu1 %v3380_v20  ;;  %v3377_v21 = vsel %vm92_vm0, %v3373_v19, 0.0 }
 0xcf8   :  { %3378 = vadd.xlane.f32.xlu0 %v3377_v21  ;;  %4146 = vmatprep.subr.bf16.mxu1 %v4145_v31 }
 0xcf9   :  { %4148 = vmatpush3.bf16.msra.mxu1 %v4145_v31 }
 0xcfa   :  { %4150 = vmatprep.subr.bf16.mxu1 %v4149_v35 }
 0xcfd   :  { %4152 = vmatpush3.bf16.msra.mxu1 %v4149_v35 }
 0xd84   :  { %v3382_v14 = vpop.xlane.xlu1 %3381 }
 0xd85   :  { %v3384_v22 = vmul.f32 0.03125, %v3382_v14  ;;  %v3379_v23 = vpop.xlane.xlu0 %3378 }
 0xd86   :  { %v3383_v24 = vmul.f32 0.03125, %v3379_v23 }
 0xd87   :  { %v3386_v25 = vsub.f32 %v3374_v18, %v3384_v22 }
 0xd88   :  { %v3385_v49 = vsub.f32 %v3373_v19, %v3383_v24 }
 0xd89   :  { %v3388_v28 = vmul.f32 %v3386_v25, %v3386_v25 }
 0xd8a   :  { %v3387_v26 = vmul.f32 %v3385_v49, %v3385_v49 }
 0xd8b   :  { %v3392_v32 = vsel %vm92_vm0, %v3388_v28, 0.0 }
 0xd8c   :  { %v3389_v27 = vsel %vm92_vm0, %v3387_v26, 0.0 }
 0xd8d   :  { %3390 = vadd.xlane.f32.xlu0 %v3389_v27 }
 0xd91   :  { %3393 = vadd.xlane.f32.xlu0 %v3392_v32 }
 0xe1a   :  { %v3391_v36 = vpop.xlane.xlu0 %3390 }
 0xe1b   :  { %v3395_v37 = vmul.f32 0.03125, %v3391_v36 }
 0xe1d   :  { %v3397_v39 = vadd.f32 1e-05, %v3395_v37 }
 0xe1e   :  { %v3394_v40 = vpop.xlane.xlu0 %3393 }
 0xe1f   :  { %4253 = vrsqrt.f32 %v3397_v39  ;;  %v3396_v41 = vmul.f32 0.03125, %v3394_v40 }
 0xe21   :  { %v3398_v42 = vadd.f32 1e-05, %v3396_v41 }
 0xe23   :  { %4255 = vrsqrt.f32 %v3398_v42  ;;  %v3748_v42 = vld [vmem:[%s4968_s22] ss:$0 sm:$0xff] }
 0xe29   :  { %v4254_v43 = vpop.eup %4253 }
 0xe2a   :  { %v3401_v45 = vmul.f32 %v4254_v43, %v3385_v49 }
 0xe2c   :  { %v3409_v47 = vmul.f32 %v3738_v44, %v3401_v45  ;;  %v3749_v45 = vld [vmem:[%s4969_s23] ss:$0 sm:$0xff] }
 0xe2d   :  { %v4256_v48 = vpop.eup %4255 }
 0xe2e   :  { %v3402_v50 = vmul.f32 %v4256_v48, %v3386_v25  ;;  %v3417_v38 = vadd.f32 %v3739_v46, %v3409_v47 }
 0xe30   :  { %v3410_v51 = vmul.f32 %v3738_v44, %v3402_v50  ;;  %4083 = vmatprep.mubr.msk.f32.mxu1 %vm92_vm0, %v3417_v38 }
 0xe32   :  { %v3418_v52 = vadd.f32 %v3739_v46, %v3410_v51 }
 0xe34   :  { %4084 = vmatmul.mubr.msk.f32.vlgmr.msra.gmra.mrb[40].mxu1 %vm92_vm0, %v3418_v52 }
 0xf07   :  { %v4085_v7 = vpop.f32.mrb[40].mxu1 }
 0xf08   :  { %v3508_v5 = vadd.f32 %v4085_v7, %v3740_v63  ;;  %v3502_v0 = vpop.f32.mrb[41].mxu1 }
 0xf09   :  { %v3503_v1 = vadd.f32 %v3740_v63, %v3502_v0 }
 0xf0a   :  { %v3744_v2 = vmul.f32 -1.442695, %v3508_v5 }
 0xf0b   :  { %v3743_v3 = vmul.f32 -1.442695, %v3503_v1 }
 0xf0c   :  { %4257 = vpow2.f32 %v3744_v2 }
 0xf0d   :  { %4259 = vpow2.f32 %v3743_v3 }
 0xf16   :  { %v4258_v4 = vpop.eup %4257 }
 0xf17   :  { %v4260_v6 = vpop.eup %4259  ;;  %v3518_v9 = vadd.f32 1.0, %v4258_v4 }
 0xf18   :  { %v3517_v10 = vadd.f32 1.0, %v4260_v6 }
 0xf19   :  { %4261 = vrcp.f32 %v3518_v9 }
 0xf1a   :  { %4263 = vrcp.f32 %v3517_v10 }
 0xf23   :  { %v4262_v11 = vpop.eup %4261 }
 0xf24   :  { %v4264_v12 = vpop.eup %4263  ;;  %v3524_v15 = vmul.f32 %v4262_v11, %v3508_v5 }
 0xf25   :  { %v3523_v13 = vmul.f32 %v4264_v12, %v3503_v1 }
 0xf27   :  { %4102 = vmatprep.mubr.msk.f32.mxu0 %vm1890_vm7, %v3523_v13 }
 0xf28   :  { %4103 = vmatmul.mubr.msk.f32.vlgmr.msra.gmra.mrb[34].mxu0 %vm1890_vm7, %v3524_v15 }
 0xffb   :  { %v4104_v18 = vpop.f32.mrb[34].mxu0 }
 0xffc   :  { %v3618_v19 = vadd.f32 %v4104_v18, %v3745_v17  ;;  %v3612_v20 = vpop.f32.mrb[35].mxu0 }
 0xffd   :  { %v3613_v21 = vadd.f32 %v3745_v17, %v3612_v20 }
 0xffe   :  { %v3622_v14 = vadd.f32 %v3618_v19, %v3418_v52 }
 0xfff   :  { %v3621_v22 = vadd.f32 %v3613_v21, %v3417_v38 }
0x1000   :  { %v3628_v23 = vsel %vm92_vm0, %v3622_v14, 0.0 }
0x1001   :  { %3629 = vadd.xlane.f32.xlu0 %v3628_v23  ;;  %v3625_v24 = vsel %vm92_vm0, %v3621_v22, 0.0 }
0x1002   :  { %3626 = vadd.xlane.f32.xlu1 %v3625_v24 }
0x108e   :  { %v3630_v25 = vpop.xlane.xlu0 %3629 }
0x108f   :  { %v3632_v49 = vmul.f32 0.03125, %v3630_v25  ;;  %v3627_v26 = vpop.xlane.xlu1 %3626 }
0x1090   :  { %v3631_v27 = vmul.f32 0.03125, %v3627_v26 }
0x1091   :  { %v3634_v28 = vsub.f32 %v3622_v14, %v3632_v49 }
0x1092   :  { %v3633_v32 = vsub.f32 %v3621_v22, %v3631_v27 }
0x1093   :  { %v3636_v30 = vmul.f32 %v3634_v28, %v3634_v28 }
0x1094   :  { %v3635_v29 = vmul.f32 %v3633_v32, %v3633_v32 }
0x1095   :  { %v3640_v31 = vsel %vm92_vm0, %v3636_v30, 0.0 }
0x1096   :  { %3641 = vadd.xlane.f32.xlu0 %v3640_v31  ;;  %v3637_v33 = vsel %vm92_vm0, %v3635_v29, 0.0 }
0x1097   :  { %3638 = vadd.xlane.f32.xlu1 %v3637_v33 }
0x1123   :  { %v3642_v34 = vpop.xlane.xlu0 %3641 }
0x1124   :  { %v3644_v35 = vmul.f32 0.03125, %v3642_v34  ;;  %v3639_v36 = vpop.xlane.xlu1 %3638 }
0x1125   :  { %v3643_v37 = vmul.f32 0.03125, %v3639_v36 }
0x1126   :  { %v3646_v39 = vadd.f32 1e-05, %v3644_v35 }
0x1127   :  { %v3645_v40 = vadd.f32 1e-05, %v3643_v37 }
0x1128   :  { %4265 = vrsqrt.f32 %v3646_v39 }
0x1129   :  { %4267 = vrsqrt.f32 %v3645_v40 }
0x1132   :  { %v4266_v41 = vpop.eup %4265 }
0x1133   :  { %v4268_v43 = vpop.eup %4267  ;;  %v3650_v44 = vmul.f32 %v4266_v41, %v3634_v28 }
0x1134   :  { %v3649_v46 = vmul.f32 %v4268_v43, %v3633_v32 }
0x1135   :  { %v3658_v47 = vmul.f32 %v3748_v42, %v3650_v44 }
0x1136   :  { %v3657_v48 = vmul.f32 %v3748_v42, %v3649_v46 }
0x1137   :  { %v3666_v50 = vadd.f32 %v3749_v45, %v3658_v47 }
0x1138   :  { %v3665_v38 = vadd.f32 %v3749_v45, %v3657_v48 }
0x1139   :  { %3668 = vst.msk [vmem:[%s4970_s24 + $0x8] sm:$0xff] %vm92_vm0, %v3666_v50 }
0x113a   :  { %3667 = vst.msk [vmem:[%s4970_s24] sm:$0xff] %vm92_vm0, %v3665_v38 }

</bundles_post_ra>
